<compile_context>
chip_gen: v7x
topology: tpu7x:2x2x1
jax: 0.10.0
libtpu: 0.0.40
codegen_flags: <defaults>
</compile_context>

<pallas_src>
import jax
import jax.numpy as jnp
from jax.experimental import pallas as pl
from jax.experimental.pallas import tpu as pltpu

LANE = 128
SUBLANE = 8
TARGET_BLOCK_BYTES = 4 << 20      # ~4 MiB per block, per array (dtype-aware)
SPLIT_BYTES = 2 << 20             # above this, force >= 2 grid steps (v7x 2-TC)
SMALL_FAST_PATH_BYTES = 64 << 10  # below this, plain jnp beats kernel launch


def _round_up(a: int, b: int) -> int:
    return ((a + b - 1) // b) * b


def _sigmoid10_math(x_f32):
    # sigmoid(10*(x-0.5)) == 0.5*tanh(5*(x-0.5)) + 0.5
    # -> one EUP transcendental + two cheap VPU ops, no divide, no exp overflow.
    return 0.5 * jnp.tanh(5.0 * (x_f32 - 0.5)) + 0.5


def _sigmoid10_kernel(x_ref, o_ref):
    # Cast to f32 in-register: HBM traffic stays at the (possibly narrow) I/O
    # dtype while the sharp slope-10 sigmoid is computed in f32 on every TPU
    # generation (v5e has no bf16 VPU/EUP anyway; the casts hide under DMA).
    x = x_ref[...].astype(jnp.float32)
    o_ref[...] = _sigmoid10_math(x).astype(o_ref.dtype)


def _run_kernel_flat(x_flat: jax.Array) -> jax.Array:
    """x_flat: 1-D, length a nonzero multiple of LANE, dtype = kernel I/O dtype."""
    total = x_flat.shape[0]
    io_dtype = x_flat.dtype
    itemsize = jnp.dtype(io_dtype).itemsize

    # Widest lane dim (multiple of 128) that divides the flat size, preferring
    # layouts with >= 8 rows so blocks are (8,128)-aligned and lane-dense.
    lane_w = LANE
    for cand in (1024, 512, 256, 128):
        if total % cand == 0 and total // cand >= SUBLANE:
            lane_w = cand
            break
    m = total // lane_w
    x2d = x_flat.reshape(m, lane_w)

    # Byte-sized blocks (~4 MiB), dtype-aware.
    target_rows = max(
        SUBLANE, (TARGET_BLOCK_BYTES // (lane_w * itemsize)) // SUBLANE * SUBLANE
    )
    if total * itemsize > SPLIT_BYTES and m >= 2 * SUBLANE:
        # Guarantee >= 2 grid steps so both v7x TensorCores (megacore) get work.
        target_rows = min(target_rows, _round_up(pl.cdiv(m, 2), SUBLANE))

    if m <= target_rows:
        block_rows = m            # single full-extent block (any m allowed)
    else:
        block_rows = target_rows  # multiple of 8; last block may be partial
    grid = (pl.cdiv(m, block_rows),)

    # in + out, double-buffered, plus headroom for internal scratch.
    block_bytes = block_rows * lane_w * itemsize
    vmem_limit = int(4 * block_bytes + (8 << 20))

    out2d = pl.pallas_call(
        _sigmoid10_kernel,
        out_shape=jax.ShapeDtypeStruct((m, lane_w), io_dtype),
        grid_spec=pltpu.PrefetchScalarGridSpec(
            num_scalar_prefetch=0,
            grid=grid,
            in_specs=[pl.BlockSpec((block_rows, lane_w), lambda i: (i, 0))],
            out_specs=pl.BlockSpec((block_rows, lane_w), lambda i: (i, 0)),
        ),
        compiler_params=pltpu.CompilerParams(
            dimension_semantics=("parallel",),
            vmem_limit_bytes=vmem_limit,
        ),
        cost_estimate=pl.CostEstimate(
            flops=3 * total,
            transcendentals=total,
            bytes_accessed=2 * total * itemsize,
        ),
    )(x2d)
    return out2d.reshape(-1)


def custom_multiply(x: jax.Array) -> jax.Array:
    """Elementwise 1 / (1 + exp(-10 * (x - 0.5))) computed on-TPU via Pallas."""
    orig_shape = x.shape

    # Floating inputs keep their dtype for HBM I/O and output; integer/bool
    # inputs produce a float32 result (casting a (0,1) sigmoid back to int
    # would truncate to 0).
    if jnp.issubdtype(x.dtype, jnp.floating):
        io_dtype = x.dtype
    else:
        io_dtype = jnp.float32
        x = x.astype(jnp.float32)

    total = x.size
    itemsize = jnp.dtype(io_dtype).itemsize

    # Small-input fast path: pallas_call launch + reshape plumbing dominates
    # tiny tensors; XLA's fused elementwise is already at the roofline there.
    if total * itemsize < SMALL_FAST_PATH_BYTES:
        return _sigmoid10_math(x.astype(jnp.float32)).astype(io_dtype)

    x_flat = jnp.ravel(x)
    aligned = (total // LANE) * LANE

    if aligned == total:
        out_flat = _run_kernel_flat(x_flat)
    else:
        # Lane-unaligned size: kernel on the aligned prefix, plain jnp on the
        # <128-element tail — avoids a pad + slice HBM round trip.
        out_prefix = _run_kernel_flat(x_flat[:aligned])
        tail = _sigmoid10_math(x_flat[aligned:].astype(jnp.float32)).astype(io_dtype)
        out_flat = jnp.concatenate([out_prefix, tail])

    return out_flat.reshape(orig_shape)


if __name__ == "__main__":
    key = jax.random.PRNGKey(0)
    k1, k2, k3 = jax.random.split(key, 3)

    def ref(x):
        xf = x.astype(jnp.float32)
        return 1.0 / (1.0 + jnp.exp(-10.0 * (xf - 0.5)))

    # 1) Module-sized NCHW input (batch=2, channels=4, 16x16): small-input
    #    fast path.
    x_small = jax.random.normal(k1, (2, 4, 16, 16), dtype=jnp.float32)
    y_small = custom_multiply(x_small)
    jax.block_until_ready(y_small)
    assert y_small.shape == x_small.shape and y_small.dtype == x_small.dtype
    assert jnp.max(jnp.abs(y_small - ref(x_small))) < 1e-5

    # 2) Larger f32 input: exercises the Pallas kernel with a >=2-step
    #    "parallel" grid (megacore / v7x 2-TC sharding).
    x_big = jax.random.normal(k2, (2, 8, 256, 256), dtype=jnp.float32)
    y_big = custom_multiply(x_big)
    jax.block_until_ready(y_big)
    assert y_big.shape == x_big.shape and y_big.dtype == x_big.dtype
    assert jnp.max(jnp.abs(y_big - ref(x_big))) < 1e-5

    # 3) bf16 HBM I/O with f32 in-kernel compute.
    x_bf16 = jax.random.normal(k3, (2, 8, 128, 128), dtype=jnp.bfloat16)
    y_bf16 = custom_multiply(x_bf16)
    jax.block_until_ready(y_bf16)
    assert y_bf16.shape == x_bf16.shape and y_bf16.dtype == jnp.bfloat16
    assert jnp.max(jnp.abs(y_bf16.astype(jnp.float32) - ref(x_bf16))) < 1e-2

    # 4) Lane-unaligned size: aligned prefix through the kernel, tail via jnp.
    x_odd = jax.random.normal(k1, (3, 5, 97, 31), dtype=jnp.float32)
    y_odd = custom_multiply(x_odd)
    jax.block_until_ready(y_odd)
    assert y_odd.shape == x_odd.shape
    assert jnp.max(jnp.abs(y_odd - ref(x_odd))) < 1e-5

    print("KERNEL_OK")
</pallas_src>

<mosaic_0001>
module attributes {stable_mosaic.version = 11 : i64} {
  func.func @_sigmoid10_kernel(%arg0: i32, %arg1: memref<512x1024xf32, #tpu.memory_space<vmem>>, %arg2: memref<512x1024xf32, #tpu.memory_space<vmem>>) attributes {dimension_semantics = [#tpu.dimension_semantics<parallel>], iteration_bounds = array<i64: 2>, scalar_prefetch = 0 : i64, scratch_operands = 0 : i64, tpu.core_type = #tpu.core_type<tc>, window_params = [{transform_indices = @transform_0, window_bounds = array<i64: 512, 1024>}, {transform_indices = @transform_1, window_bounds = array<i64: 512, 1024>}]} {
    %c0 = arith.constant 0 : index
    %c0_0 = arith.constant 0 : index
    %0 = vector.load %arg1[%c0, %c0_0] : memref<512x1024xf32, #tpu.memory_space<vmem>>, vector<512x1024xf32>
    %cst = arith.constant 5.000000e-01 : f32
    %1 = vector.broadcast %cst : f32 to vector<512x1024xf32>
    %2 = arith.subf %0, %1 : vector<512x1024xf32>
    %cst_1 = arith.constant 5.000000e+00 : f32
    %3 = vector.broadcast %cst_1 : f32 to vector<512x1024xf32>
    %4 = arith.mulf %3, %2 : vector<512x1024xf32>
    %5 = math.tanh %4 : vector<512x1024xf32>
    %cst_2 = arith.constant 5.000000e-01 : f32
    %6 = vector.broadcast %cst_2 : f32 to vector<512x1024xf32>
    %7 = arith.mulf %6, %5 : vector<512x1024xf32>
    %cst_3 = arith.constant 5.000000e-01 : f32
    %8 = vector.broadcast %cst_3 : f32 to vector<512x1024xf32>
    %9 = arith.addf %7, %8 : vector<512x1024xf32>
    %c0_4 = arith.constant 0 : index
    %c0_5 = arith.constant 0 : index
    %10 = vector.load %arg2[%c0_4, %c0_5] : memref<512x1024xf32, #tpu.memory_space<vmem>>, vector<512x1024xf32>
    tpu.vector_store %arg2[%c0_4, %c0_5], %9 {strides = array<i32>} : memref<512x1024xf32, #tpu.memory_space<vmem>>, vector<512x1024xf32>,
    return
  }
  func.func @transform_0(%arg0: i32) -> (i32, i32) {
    %c0_i32 = arith.constant 0 : i32
    %c0_i32_0 = arith.constant 0 : i32
    return %arg0, %c0_i32 : i32, i32
  }
  func.func @transform_1(%arg0: i32) -> (i32, i32) {
    %c0_i32 = arith.constant 0 : i32
    %c0_i32_0 = arith.constant 0 : i32
    return %arg0, %c0_i32 : i32, i32
  }
}

</mosaic_0001>

<bundles_post_ra>
// kernel: tpu_custom_call.1
= control target key start
LH: loop header
LB: loop body
LE: loop exit
PB: predicated region body
PF: predicated region fallthrough
CT: control target
= control target key end

     0   :  { %6 = vsyncpa [#allocation3], 0  ;;  %s6743_s0 = inlined_call_operand.hbm [shape: f32[1024,1024], index: 0, kind: input, shape index: {}]   ;;  %s6744_s1 = inlined_call_operand.hbm [shape: f32[1024,1024], index: 1, kind: output, shape index: {}]  }
   0x1   :  { %8 = vsyncpa [#allocation3 + $0x1], 0 }
   0x2   :  { %9 = vsyncpa [#allocation4], 0 }
   0x3   :  { %11 = vsyncpa [#allocation4 + $0x1], 0  ;;  %s5530_s6 = smov 0   ;;  %s5532_s7 = smov 0  }
   0x4   :  { %s5534_s8 = smov 0   ;;  %s5536_s9 = smov 0  }
   0x5 LB: > { %s5551_s10 = sadd.s32 4294967295, %s5512_s9   ;;  %s3810_s11 = sadd.s32 4294967294, %s5512_s9   ;;  %s5512_s9 = sphi %s5536_s9, %s6757_s9   ;;  %s5508_s8 = sphi %s5534_s8, %s6756_s8   ;;  %s5504_s7 = sphi %s5532_s7, %s6755_s7   ;;  %s5500_s6 = sphi %s5530_s6, %s6754_s6  }
   0x6   : > { %s5555_s12 = sadd.s32 1, %s5512_s9   ;;  %s24_s13 = sadd.s32 1, %s5508_s8 }
   0x7   : > { %s21_s14 = ssub.s32 %s5512_s9, %s5555_s12  ;;  %p31_p0 = scmp.ne.s32.totalorder %s5508_s8, %s5504_s7 }
   0x8   : > { %p22_p1 = scmp.eq.s32.totalorder %s21_s14, 0  ;;  %p32_p2 = scmp.eq.s32.totalorder %s5512_s9, 0 }
   0x9   : > { %p37_p3 = scmp.ne.s32.totalorder %s5504_s7, %s5500_s6  ;;  %p38_p4 = scmp.eq.s32.totalorder %s5551_s10, 0 }
   0xa   : > { %s5567_s15 = scalar_select %p22_p1, %s5508_s8, %s24_s13  }
   0xb   : > { %p5569_p5 = por %p32_p2, %p31_p0  ;;  %p5573_p6 = por %p38_p4, %p37_p3 }
   0xc   : > { %p61_p7 = scmp.eq.s32.totalorder %s5551_s10, 1  ;;  %p67_p8 = scmp.eq.s32.totalorder %s3810_s11, 1 }
   0xd   : > { %p4354_p10 = scmp.lt.s32.totalorder %s5512_s9, 2  ;;  %s87_s20 = sand.u32 1, %s5508_s8  }
   0xe   : > { %p5580_p11 = por %p61_p7, %p31_p0  ;;  %p5584_p12 = por %p67_p8, %p37_p3 }
   0xf   : > { %s4339_s21 = sshll.u32 %s5512_s9, 16  ;;  %s3813_s22 = sshll.u32 %s87_s20, 12 }
  0x10   : > { %s6748_s18 = scalar_select %p5580_p11, 1, 0 }
  0x11   : > { %s6749_s19 = scalar_select %p5584_p12, 1, 0 }
  0x12   : > { %s5593_s25 = scalar_lea.hbm %s6743_s0, %s4339_s21  ;;  %s91_s26 = scalar_lea.vmem [#allocation2], %s3813_s22 }
  0x13   : > { %s99_s27 = sshll.u32 %s91_s26, 4  ;;  %p5597_p13 = pnand %p4354_p10, %p5569_p5  ;;  %s5601_s27 = int_to_ptr.vmem [resolvable:$true] %s99_s27 }
  0x14   : > { %s5603_s29 = scalar_lea.sflag [#allocation3], %s87_s20  ;;  %s5416_s30 = scalar_lea.hbm %s5593_s25, 65536 }
  0x15   : > { %p5417_p0 = scmp.ne.s32.totalorder %s5593_s25, %s5416_s30  ;;  %p5418_p1 = pneg %p5597_p13 }
  0x16   : > { %s5421_s4 = scalar_lea.hbm %s6743_s0, 131072  ;;  %p5422_p4 = scmp.lt.u32.totalorder %s5593_s25, %s6743_s0 }
  0x17   : > { %p5419_p2 = pnand %p5418_p1, %p5417_p0  ;;  %p5423_p5 = scmp.lt.u32.totalorder %s5421_s4, %s5416_s30 }
  0x18   : > { %p5425_p8 = scmp.lt.u32.totalorder %s5416_s30, %s5593_s25 }
  0x19   : > { %p5420_p3 = pneg %p5419_p2  ;;  %p5424_p7 = por %p5423_p5, %p5422_p4 }
  0x1b   : > { %p5426_p10 = por %p5425_p8, %p5424_p7 }
  0x1d   : > { %p5427_p9 = pnand %p5426_p10, %p5420_p3 }
  0x1f   : > { %5430 = shalt.err (!%p5427_p9)
}
  0x20   : > { %s5431_s13 = scalar_lea.vmem %s5601_s27, 65536  ;;  %s5514_s14 = smov [#allocation2]  }
  0x21   : > { %p5432_p0 = scmp.ne.s32.totalorder %s5601_s27, %s5431_s13  ;;  %s5436_s16 = sshll.u32 %s5514_s14, 4  ;;  %s5437_s16 = int_to_ptr.vmem [resolvable:$false] %s5436_s16 }
  0x22   : > { %s5438_s20 = scalar_lea.vmem %s5437_s16, 131072  ;;  %p5439_p11 = scmp.lt.s32.totalorder %s5601_s27, %s5437_s16 }
  0x23   : > { %p5434_p2 = pnand %p5432_p0, %p5418_p1  ;;  %p5440_p4 = scmp.lt.s32.totalorder %s5438_s20, %s5431_s13 }
  0x25   : > { %p5435_p12 = pneg %p5434_p2  ;;  %p5441_p5 = por %p5440_p4, %p5439_p11 }
  0x27   : > { %p5442_p7 = pnand %p5441_p5, %p5435_p12 }
  0x29   : > { %5445 = shalt.err (!%p5442_p7)
}
  0x2a   : > { %s5515_s21 = smov 1024   ;;  %s5516_s22 = smov 64  }
  0x2b   : > { %4349 = dma.hbm_to_vmem [thread:$0]  (!%p5597_p13), %s5593_s25, 65536, %s5601_s27, %s5603_s29, %s5515_s21, %s5515_s21, %s5516_s22  }
  0x2c   : > { %p3817_p9 = scmp.ge.s32.totalorder %s5512_s9, 1  ;;  %p107_p1 = scmp.lt.s32.totalorder %s5512_s9, 3 }
  0x2e   : > { %p108_p3 = pnand %p3817_p9, %p107_p1 }
  0x2f   : > { %s5634_s23 = sand.u32 (!%p108_p3), 1, %s5504_s7  }
  0x30   : > { %111 = sbr.rel (%p108_p3) target bundleno = 723 (0x2d3), region = 24  ;;  %s3818_s24 = sshll.u32 (!%p108_p3), %s5634_s23, 12 }
  0x31   : > { %s114_s26 = scalar_lea.sflag (!%p108_p3), [#allocation3], %s5634_s23  ;;  %s5640_s30 = scalar_lea.vmem (!%p108_p3), [#allocation2], %s3818_s24 }
  0x37   : > { %5491 = dma.done.wait (%p5573_p6), %s114_s26, 65536  }
  0x38   : > { %5493 = vsyncadd (%p5573_p6), %s114_s26, 4294901760  ;;  %v138_v0 = vld [vmem:[%s5640_s30] sm:$0xff]  ;;  %v139_v1 = vld [vmem:[%s5640_s30 + $0x8] sm:$0xff]  ;;  %s5687_s17 = scalar_lea.vmem [#allocation5], %s3818_s24  ;;  %s4341_s25 = sshll.u32 %s5551_s10, 16 }
  0x39   : > { %v140_v2 = vld [vmem:[%s5640_s30 + $0x10] sm:$0xff]  ;;  %v3820_v3 = vadd.f32 -0.5, %v138_v0  ;;  %v3821_v4 = vadd.f32 -0.5, %v139_v1  ;;  %v141_v6 = vld [vmem:[%s5640_s30 + $0x18] sm:$0xff]  ;;  %v142_v7 = vld [vmem:[%s5640_s30 + $0x20] sm:$0xff]  ;;  %s3737_s27 = sshll.u32 %s5687_s17, 4  ;;  %s6695_s2 = scalar_lea.hbm %s6744_s1, %s4341_s25  ;;  %s6697_s27 = int_to_ptr.vmem [resolvable:$true] %s3737_s27 }
  0x3a   : > { %v3822_v5 = vadd.f32 -0.5, %v140_v2  ;;  %v143_v8 = vld [vmem:[%s5640_s30 + $0x28] sm:$0xff]  ;;  %v3823_v9 = vadd.f32 -0.5, %v141_v6  ;;  %v3824_v10 = vadd.f32 -0.5, %v142_v7  ;;  %v144_v12 = vld [vmem:[%s5640_s30 + $0x30] sm:$0xff]  ;;  %v145_v13 = vld [vmem:[%s5640_s30 + $0x38] sm:$0xff] }
  0x3b   : > { %v3825_v11 = vadd.f32 -0.5, %v143_v8  ;;  %v146_v14 = vld [vmem:[%s5640_s30 + $0x40] sm:$0xff]  ;;  %v1162_v15 = vmul.f32 5.0, %v3820_v3  ;;  %v1163_v16 = vmul.f32 5.0, %v3821_v4  ;;  %v3826_v18 = vadd.f32 -0.5, %v144_v12  ;;  %v147_v19 = vld [vmem:[%s5640_s30 + $0x48] sm:$0xff] }
  0x3c   : > { %v1164_v17 = vmul.f32 5.0, %v3822_v5  ;;  %v148_v20 = vld [vmem:[%s5640_s30 + $0x50] sm:$0xff]  ;;  %v1165_v21 = vmul.f32 5.0, %v3823_v9  ;;  %v1166_v22 = vmul.f32 5.0, %v3824_v10  ;;  %v3827_v24 = vadd.f32 -0.5, %v145_v13  ;;  %v149_v25 = vld [vmem:[%s5640_s30 + $0x58] sm:$0xff] }
  0x3d   : > { %v1167_v23 = vmul.f32 5.0, %v3825_v11  ;;  %v150_v26 = vld [vmem:[%s5640_s30 + $0x60] sm:$0xff]  ;;  %4392 = vtanh.f32 %v1162_v15  ;;  %v1168_v27 = vmul.f32 5.0, %v3826_v18  ;;  %v3828_v28 = vadd.f32 -0.5, %v146_v14  ;;  %v151_v30 = vld [vmem:[%s5640_s30 + $0x68] sm:$0xff]  ;;  %v152_v34 = vld [vmem:[%s5640_s30 + $0x70] sm:$0xff] }
  0x3e   : > { %v3829_v29 = vadd.f32 -0.5, %v147_v19  ;;  %4394 = vtanh.f32 %v1163_v16  ;;  %v1169_v31 = vmul.f32 5.0, %v3827_v24  ;;  %v3830_v32 = vadd.f32 -0.5, %v148_v20  ;;  %v153_v35 = vld [vmem:[%s5640_s30 + $0x78] sm:$0xff]  ;;  %v154_v39 = vld [vmem:[%s5640_s30 + $0x80] sm:$0xff]  ;;  %v155_v40 = vld [vmem:[%s5640_s30 + $0x88] sm:$0xff] }
  0x3f   : > { %v3831_v33 = vadd.f32 -0.5, %v149_v25  ;;  %4396 = vtanh.f32 %v1164_v17  ;;  %v1170_v36 = vmul.f32 5.0, %v3828_v28  ;;  %v3832_v38 = vadd.f32 -0.5, %v150_v26  ;;  %v156_v44 = vld [vmem:[%s5640_s30 + $0x90] sm:$0xff]  ;;  %v157_v48 = vld [vmem:[%s5640_s30 + $0x98] sm:$0xff]  ;;  %v158_v52 = vld [vmem:[%s5640_s30 + $0xa0] sm:$0xff] }
  0x40   : > { %v1171_v37 = vmul.f32 5.0, %v3829_v29  ;;  %4398 = vtanh.f32 %v1165_v21  ;;  %v1172_v41 = vmul.f32 5.0, %v3830_v32  ;;  %v3833_v43 = vadd.f32 -0.5, %v151_v30  ;;  %v159_v53 = vld [vmem:[%s5640_s30 + $0xa8] sm:$0xff]  ;;  %v160_v57 = vld [vmem:[%s5640_s30 + $0xb0] sm:$0xff]  ;;  %v161_v58 = vld [vmem:[%s5640_s30 + $0xb8] sm:$0xff] }
  0x41   : > { %v1173_v42 = vmul.f32 5.0, %v3831_v33  ;;  %4400 = vtanh.f32 %v1166_v22  ;;  %v1174_v45 = vmul.f32 5.0, %v3832_v38  ;;  %v3834_v46 = vadd.f32 -0.5, %v152_v34  ;;  %v162_v62 = vld [vmem:[%s5640_s30 + $0xc0] sm:$0xff]  ;;  %v163_v5 = vld [vmem:[%s5640_s30 + $0xc8] sm:$0xff]  ;;  %v164_v10 = vld [vmem:[%s5640_s30 + $0xd0] sm:$0xff] }
  0x42   : > { %v3835_v47 = vadd.f32 -0.5, %v153_v35  ;;  %4402 = vtanh.f32 %v1167_v23  ;;  %v1175_v49 = vmul.f32 5.0, %v3833_v43  ;;  %v3836_v50 = vadd.f32 -0.5, %v154_v39  ;;  %v165_v23 = vld [vmem:[%s5640_s30 + $0xd8] sm:$0xff]  ;;  %v166_v28 = vld [vmem:[%s5640_s30 + $0xe0] sm:$0xff]  ;;  %s3723_s10 = scalar_lea.sflag [#allocation4], %s5634_s23 }
  0x43   : > { %v3837_v51 = vadd.f32 -0.5, %v155_v40  ;;  %4404 = vtanh.f32 %v1168_v27  ;;  %v1176_v54 = vmul.f32 5.0, %v3834_v46  ;;  %v3838_v56 = vadd.f32 -0.5, %v156_v44  ;;  %v168_v46 = vld [vmem:[%s5640_s30 + $0xf0] sm:$0xff]  ;;  %s5446_s3 = scalar_lea.vmem %s6697_s27, 65536  ;;  %p6751_p11 = scmp.ne.s32.totalorder %s6748_s18, 0 }
  0x44   : > { %v1177_v55 = vmul.f32 5.0, %v3835_v47  ;;  %4406 = vtanh.f32 %v1169_v31  ;;  %v1178_v59 = vmul.f32 5.0, %v3836_v50  ;;  %v3839_v61 = vadd.f32 -0.5, %v157_v48  ;;  %p5447_p6 = scmp.ne.s32.totalorder %s6697_s27, %s5446_s3  ;;  %s5517_s4 = smov [#allocation5]  }
  0x45   : > { %v1179_v60 = vmul.f32 5.0, %v3837_v51  ;;  %4408 = vtanh.f32 %v1170_v36  ;;  %v1180_v63 = vmul.f32 5.0, %v3838_v56  ;;  %v3840_v0 = vadd.f32 -0.5, %v158_v52  ;;  %s5450_s5 = sshll.u32 %s5517_s4, 4  ;;  %s5451_s5 = int_to_ptr.vmem [resolvable:$false] %s5450_s5 }
  0x46   : > { %v3841_v1 = vadd.f32 -0.5, %v159_v53  ;;  %4410 = vtanh.f32 %v1171_v37  ;;  %v1181_v2 = vmul.f32 5.0, %v3839_v61  ;;  %v3842_v3 = vadd.f32 -0.5, %v160_v57  ;;  %p5448_p12 = pnand %p5447_p6, %p6751_p11  ;;  %s5452_s11 = scalar_lea.vmem %s5451_s5, 131072 }
  0x47   : > { %v3843_v4 = vadd.f32 -0.5, %v161_v58  ;;  %v4393_v6 = vpop.eup %4392  ;;  %4412 = vtanh.f32 %v1172_v41  ;;  %v1182_v7 = vmul.f32 5.0, %v3840_v0  ;;  %v3844_v9 = vadd.f32 -0.5, %v162_v62  ;;  %v167_v41 = vld [vmem:[%s5640_s30 + $0xe8] sm:$0xff]  ;;  %v170_v0 = vld [vmem:[%s5640_s30 + $0x100] sm:$0xff]  ;;  %p5453_p8 = scmp.lt.s32.totalorder %s6697_s27, %s5451_s5  ;;  %p5454_p10 = scmp.lt.s32.totalorder %s5452_s11, %s5446_s3 }
  0x48   : > { %v5672_v8 = vmul.f32 5.0, %v3841_v1  ;;  %v4395_v11 = vpop.eup %4394  ;;  %v2186_v12 = vmul.f32 0.5, %v4393_v6  ;;  %4414 = vtanh.f32 %v1173_v42  ;;  %v5675_v13 = vmul.f32 5.0, %v3842_v3  ;;  %p5449_p13 = pneg %p5448_p12 }
  0x49   : > { %v5677_v14 = vmul.f32 5.0, %v3843_v4  ;;  %v4397_v15 = vpop.eup %4396  ;;  %v2187_v16 = vmul.f32 0.5, %v4395_v11  ;;  %4416 = vtanh.f32 %v1174_v45  ;;  %v5679_v17 = vmul.f32 5.0, %v3844_v9  ;;  %p5455_p0 = por %p5454_p10, %p5453_p8 }
  0x4a   : > { %v3845_v18 = vadd.f32 -0.5, %v163_v5  ;;  %v4399_v19 = vpop.eup %4398  ;;  %v2698_v20 = vadd.f32 0.5, %v2186_v12  ;;  %v2188_v21 = vmul.f32 0.5, %v4397_v15  ;;  %4418 = vtanh.f32 %v1175_v49 }
  0x4b   : > { %v3846_v22 = vadd.f32 -0.5, %v164_v10  ;;  %v4401_v24 = vpop.eup %4400  ;;  %v2699_v25 = vadd.f32 0.5, %v2187_v16  ;;  %v2189_v26 = vmul.f32 0.5, %v4399_v19  ;;  %4420 = vtanh.f32 %v1176_v54  ;;  %p5456_p2 = pnand %p5455_p0, %p5449_p13 }
  0x4c   : > { %v5682_v27 = vmul.f32 5.0, %v3845_v18  ;;  %v4403_v29 = vpop.eup %4402  ;;  %3210 = vst [vmem:[%s5687_s17] sm:$0xff] %v2698_v20  ;;  %v2700_v30 = vadd.f32 0.5, %v2188_v21  ;;  %v2190_v31 = vmul.f32 0.5, %v4401_v24  ;;  %4422 = vtanh.f32 %v1177_v55 }
  0x4d   : > { %v5690_v32 = vmul.f32 5.0, %v3846_v22  ;;  %v4405_v33 = vpop.eup %4404  ;;  %3211 = vst [vmem:[%s5687_s17 + $0x8] sm:$0xff] %v2699_v25  ;;  %v2701_v34 = vadd.f32 0.5, %v2189_v26  ;;  %v2191_v35 = vmul.f32 0.5, %v4403_v29  ;;  %4424 = vtanh.f32 %v1178_v59  ;;  %v169_v59 = vld [vmem:[%s5640_s30 + $0xf8] sm:$0xff] }
  0x4e   : > { %v3847_v36 = vadd.f32 -0.5, %v165_v23  ;;  %v4407_v37 = vpop.eup %4406  ;;  %3212 = vst [vmem:[%s5687_s17 + $0x10] sm:$0xff] %v2700_v30  ;;  %v2702_v38 = vadd.f32 0.5, %v2190_v31  ;;  %v2192_v39 = vmul.f32 0.5, %v4405_v33  ;;  %4426 = vtanh.f32 %v1179_v60  ;;  %v173_v31 = vld [vmem:[%s5640_s30 + $0x118] sm:$0xff] }
  0x4f   : > { %v3848_v40 = vadd.f32 -0.5, %v166_v28  ;;  %v4409_v42 = vpop.eup %4408  ;;  %3213 = vst [vmem:[%s5687_s17 + $0x18] sm:$0xff] %v2701_v34  ;;  %v2703_v43 = vadd.f32 0.5, %v2191_v35  ;;  %v2193_v44 = vmul.f32 0.5, %v4407_v37  ;;  %4428 = vtanh.f32 %v1180_v63 }
  0x50   : > { %v1189_v45 = vmul.f32 5.0, %v3847_v36  ;;  %v4411_v47 = vpop.eup %4410  ;;  %3214 = vst [vmem:[%s5687_s17 + $0x20] sm:$0xff] %v2702_v38  ;;  %v2704_v48 = vadd.f32 0.5, %v2192_v39  ;;  %v2194_v49 = vmul.f32 0.5, %v4409_v42  ;;  %4430 = vtanh.f32 %v1181_v2  ;;  %v174_v36 = vld [vmem:[%s5640_s30 + $0x120] sm:$0xff] }
  0x51   : > { %v1190_v50 = vmul.f32 5.0, %v3848_v40  ;;  %v4413_v51 = vpop.eup %4412  ;;  %3215 = vst [vmem:[%s5687_s17 + $0x28] sm:$0xff] %v2703_v43  ;;  %v2705_v52 = vadd.f32 0.5, %v2193_v44  ;;  %v2195_v53 = vmul.f32 0.5, %v4411_v47  ;;  %4432 = vtanh.f32 %v1182_v7 }
  0x52   : > { %v3849_v54 = vadd.f32 -0.5, %v167_v41  ;;  %v4415_v55 = vpop.eup %4414  ;;  %3216 = vst [vmem:[%s5687_s17 + $0x30] sm:$0xff] %v2704_v48  ;;  %v2706_v56 = vadd.f32 0.5, %v2194_v49  ;;  %v2196_v57 = vmul.f32 0.5, %v4413_v51  ;;  %4434 = vtanh.f32 %v5672_v8 }
  0x53   : > { %v3850_v58 = vadd.f32 -0.5, %v168_v46  ;;  %v4417_v60 = vpop.eup %4416  ;;  %3217 = vst [vmem:[%s5687_s17 + $0x38] sm:$0xff] %v2705_v52  ;;  %v2707_v61 = vadd.f32 0.5, %v2195_v53  ;;  %v2197_v62 = vmul.f32 0.5, %v4415_v55  ;;  %4436 = vtanh.f32 %v5675_v13  ;;  %v171_v13 = vld [vmem:[%s5640_s30 + $0x108] sm:$0xff] }
  0x54   : > { %v1191_v63 = vmul.f32 5.0, %v3849_v54  ;;  %v4419_v1 = vpop.eup %4418  ;;  %3218 = vst [vmem:[%s5687_s17 + $0x40] sm:$0xff] %v2706_v56  ;;  %v2708_v2 = vadd.f32 0.5, %v2196_v57  ;;  %v2198_v3 = vmul.f32 0.5, %v4417_v60  ;;  %4438 = vtanh.f32 %v5677_v14  ;;  %v177_v60 = vld [vmem:[%s5640_s30 + $0x138] sm:$0xff] }
  0x55   : > { %v1192_v4 = vmul.f32 5.0, %v3850_v58  ;;  %v4421_v5 = vpop.eup %4420  ;;  %3219 = vst [vmem:[%s5687_s17 + $0x48] sm:$0xff] %v2707_v61  ;;  %v2709_v6 = vadd.f32 0.5, %v2197_v62  ;;  %v2199_v7 = vmul.f32 0.5, %v4419_v1  ;;  %4440 = vtanh.f32 %v5679_v17  ;;  %v172_v17 = vld [vmem:[%s5640_s30 + $0x110] sm:$0xff]  ;;  %v178_v1 = vld [vmem:[%s5640_s30 + $0x140] sm:$0xff] }
  0x56   : > { %v3851_v8 = vadd.f32 -0.5, %v169_v59  ;;  %v4423_v9 = vpop.eup %4422  ;;  %3220 = vst [vmem:[%s5687_s17 + $0x50] sm:$0xff] %v2708_v2  ;;  %v2710_v10 = vadd.f32 0.5, %v2198_v3  ;;  %v2200_v11 = vmul.f32 0.5, %v4421_v5  ;;  %4442 = vtanh.f32 %v5682_v27 }
  0x57   : > { %v3852_v12 = vadd.f32 -0.5, %v170_v0  ;;  %v4425_v14 = vpop.eup %4424  ;;  %3221 = vst [vmem:[%s5687_s17 + $0x58] sm:$0xff] %v2709_v6  ;;  %v2711_v15 = vadd.f32 0.5, %v2199_v7  ;;  %v2201_v16 = vmul.f32 0.5, %v4423_v9  ;;  %4444 = vtanh.f32 %v5690_v32 }
  0x58   : > { %v1193_v18 = vmul.f32 5.0, %v3851_v8  ;;  %v4427_v19 = vpop.eup %4426  ;;  %3222 = vst [vmem:[%s5687_s17 + $0x60] sm:$0xff] %v2710_v10  ;;  %v2712_v20 = vadd.f32 0.5, %v2200_v11  ;;  %v2202_v21 = vmul.f32 0.5, %v4425_v14  ;;  %4446 = vtanh.f32 %v1189_v45  ;;  %v175_v45 = vld [vmem:[%s5640_s30 + $0x128] sm:$0xff] }
  0x59   : > { %v1194_v22 = vmul.f32 5.0, %v3852_v12  ;;  %v4429_v23 = vpop.eup %4428  ;;  %3223 = vst [vmem:[%s5687_s17 + $0x68] sm:$0xff] %v2711_v15  ;;  %v2713_v24 = vadd.f32 0.5, %v2201_v16  ;;  %v2203_v25 = vmul.f32 0.5, %v4427_v19  ;;  %4448 = vtanh.f32 %v1190_v50  ;;  %v176_v50 = vld [vmem:[%s5640_s30 + $0x130] sm:$0xff]  ;;  %v179_v11 = vld [vmem:[%s5640_s30 + $0x148] sm:$0xff] }
  0x5a   : > { %v3853_v26 = vadd.f32 -0.5, %v171_v13  ;;  %v4431_v27 = vpop.eup %4430  ;;  %3224 = vst [vmem:[%s5687_s17 + $0x70] sm:$0xff] %v2712_v20  ;;  %v2714_v28 = vadd.f32 0.5, %v2202_v21  ;;  %v2204_v29 = vmul.f32 0.5, %v4429_v23  ;;  %4450 = vtanh.f32 %v1191_v63  ;;  %v180_v16 = vld [vmem:[%s5640_s30 + $0x150] sm:$0xff] }
  0x5b   : > { %v3854_v30 = vadd.f32 -0.5, %v172_v17  ;;  %v4433_v32 = vpop.eup %4432  ;;  %3225 = vst [vmem:[%s5687_s17 + $0x78] sm:$0xff] %v2713_v24  ;;  %v2715_v33 = vadd.f32 0.5, %v2203_v25  ;;  %v2205_v34 = vmul.f32 0.5, %v4431_v27  ;;  %4452 = vtanh.f32 %v1192_v4 }
  0x5c   : > { %v1195_v35 = vmul.f32 5.0, %v3853_v26  ;;  %v4435_v37 = vpop.eup %4434  ;;  %3226 = vst [vmem:[%s5687_s17 + $0x80] sm:$0xff] %v2714_v28  ;;  %v2716_v38 = vadd.f32 0.5, %v2204_v29  ;;  %v2206_v39 = vmul.f32 0.5, %v4433_v32  ;;  %4454 = vtanh.f32 %v1193_v18  ;;  %v181_v26 = vld [vmem:[%s5640_s30 + $0x158] sm:$0xff] }
  0x5d   : > { %v1196_v40 = vmul.f32 5.0, %v3854_v30  ;;  %v4437_v41 = vpop.eup %4436  ;;  %3227 = vst [vmem:[%s5687_s17 + $0x88] sm:$0xff] %v2715_v33  ;;  %v2717_v42 = vadd.f32 0.5, %v2205_v34  ;;  %v2207_v43 = vmul.f32 0.5, %v4435_v37  ;;  %4456 = vtanh.f32 %v1194_v22 }
  0x5e   : > { %v3855_v44 = vadd.f32 -0.5, %v173_v31  ;;  %v4439_v46 = vpop.eup %4438  ;;  %3228 = vst [vmem:[%s5687_s17 + $0x90] sm:$0xff] %v2716_v38  ;;  %v2718_v47 = vadd.f32 0.5, %v2206_v39  ;;  %v2208_v48 = vmul.f32 0.5, %v4437_v41  ;;  %4458 = vtanh.f32 %v1195_v35  ;;  %v182_v31 = vld [vmem:[%s5640_s30 + $0x160] sm:$0xff] }
  0x5f   : > { %v3856_v49 = vadd.f32 -0.5, %v174_v36  ;;  %v4441_v51 = vpop.eup %4440  ;;  %3229 = vst [vmem:[%s5687_s17 + $0x98] sm:$0xff] %v2717_v42  ;;  %v2719_v52 = vadd.f32 0.5, %v2207_v43  ;;  %v2209_v53 = vmul.f32 0.5, %v4439_v46  ;;  %4460 = vtanh.f32 %v1196_v40  ;;  %v183_v36 = vld [vmem:[%s5640_s30 + $0x168] sm:$0xff]  ;;  %v184_v42 = vld [vmem:[%s5640_s30 + $0x170] sm:$0xff] }
  0x60   : > { %v1197_v54 = vmul.f32 5.0, %v3855_v44  ;;  %v4443_v55 = vpop.eup %4442  ;;  %3230 = vst [vmem:[%s5687_s17 + $0xa0] sm:$0xff] %v2718_v47  ;;  %v2720_v56 = vadd.f32 0.5, %v2208_v48  ;;  %v2210_v57 = vmul.f32 0.5, %v4441_v51  ;;  %v3857_v59 = vadd.f32 -0.5, %v175_v45  ;;  %v185_v46 = vld [vmem:[%s5640_s30 + $0x178] sm:$0xff] }
  0x61   : > { %v1198_v58 = vmul.f32 5.0, %v3856_v49  ;;  %v4445_v61 = vpop.eup %4444  ;;  %3231 = vst [vmem:[%s5687_s17 + $0xa8] sm:$0xff] %v2719_v52  ;;  %v2721_v62 = vadd.f32 0.5, %v2209_v53  ;;  %v2211_v63 = vmul.f32 0.5, %v4443_v55  ;;  %v3858_v0 = vadd.f32 -0.5, %v176_v50  ;;  %v186_v51 = vld [vmem:[%s5640_s30 + $0x180] sm:$0xff] }
  0x62   : > { %4462 = vtanh.f32 %v1197_v54  ;;  %v4447_v2 = vpop.eup %4446  ;;  %3232 = vst [vmem:[%s5687_s17 + $0xb0] sm:$0xff] %v2720_v56  ;;  %v2722_v3 = vadd.f32 0.5, %v2210_v57  ;;  %v2212_v4 = vmul.f32 0.5, %v4445_v61  ;;  %v1199_v5 = vmul.f32 5.0, %v3857_v59 }
  0x63   : > { %4464 = vtanh.f32 %v1198_v58  ;;  %v4449_v6 = vpop.eup %4448  ;;  %3233 = vst [vmem:[%s5687_s17 + $0xb8] sm:$0xff] %v2721_v62  ;;  %v2723_v7 = vadd.f32 0.5, %v2211_v63  ;;  %v2213_v8 = vmul.f32 0.5, %v4447_v2  ;;  %v1200_v9 = vmul.f32 5.0, %v3858_v0  ;;  %v189_v2 = vld [vmem:[%s5640_s30 + $0x198] sm:$0xff] }
  0x64   : > { %v3859_v10 = vadd.f32 -0.5, %v177_v60  ;;  %v4451_v12 = vpop.eup %4450  ;;  %3234 = vst [vmem:[%s5687_s17 + $0xc0] sm:$0xff] %v2722_v3  ;;  %v2724_v13 = vadd.f32 0.5, %v2212_v4  ;;  %v2214_v14 = vmul.f32 0.5, %v4449_v6  ;;  %4466 = vtanh.f32 %v1199_v5  ;;  %v187_v60 = vld [vmem:[%s5640_s30 + $0x188] sm:$0xff] }
  0x65   : > { %v3860_v15 = vadd.f32 -0.5, %v178_v1  ;;  %v4453_v18 = vpop.eup %4452  ;;  %3235 = vst [vmem:[%s5687_s17 + $0xc8] sm:$0xff] %v2723_v7  ;;  %v2725_v17 = vadd.f32 0.5, %v2213_v8  ;;  %v2215_v19 = vmul.f32 0.5, %v4451_v12  ;;  %4468 = vtanh.f32 %v1200_v9  ;;  %v188_v1 = vld [vmem:[%s5640_s30 + $0x190] sm:$0xff] }
  0x66   : > { %v1201_v20 = vmul.f32 5.0, %v3859_v10  ;;  %v4455_v21 = vpop.eup %4454  ;;  %3236 = vst [vmem:[%s5687_s17 + $0xd0] sm:$0xff] %v2724_v13  ;;  %v2726_v22 = vadd.f32 0.5, %v2214_v14  ;;  %v2216_v23 = vmul.f32 0.5, %v4453_v18  ;;  %v3861_v25 = vadd.f32 -0.5, %v179_v11  ;;  %v190_v10 = vld [vmem:[%s5640_s30 + $0x1a0] sm:$0xff] }
  0x67   : > { %v1202_v24 = vmul.f32 5.0, %v3860_v15  ;;  %v4457_v27 = vpop.eup %4456  ;;  %3237 = vst [vmem:[%s5687_s17 + $0xd8] sm:$0xff] %v2725_v17  ;;  %v2727_v28 = vadd.f32 0.5, %v2215_v19  ;;  %v2217_v29 = vmul.f32 0.5, %v4455_v21  ;;  %v3862_v30 = vadd.f32 -0.5, %v180_v16  ;;  %v191_v15 = vld [vmem:[%s5640_s30 + $0x1a8] sm:$0xff] }
  0x68   : > { %4470 = vtanh.f32 %v1201_v20  ;;  %v4459_v32 = vpop.eup %4458  ;;  %3238 = vst [vmem:[%s5687_s17 + $0xe0] sm:$0xff] %v2726_v22  ;;  %v2728_v33 = vadd.f32 0.5, %v2216_v23  ;;  %v2218_v34 = vmul.f32 0.5, %v4457_v27  ;;  %v1203_v35 = vmul.f32 5.0, %v3861_v25  ;;  %v192_v16 = vld [vmem:[%s5640_s30 + $0x1b0] sm:$0xff] }
  0x69   : > { %4472 = vtanh.f32 %v1202_v24  ;;  %v4461_v37 = vpop.eup %4460  ;;  %3239 = vst [vmem:[%s5687_s17 + $0xe8] sm:$0xff] %v2727_v28  ;;  %v2729_v38 = vadd.f32 0.5, %v2217_v29  ;;  %v2219_v39 = vmul.f32 0.5, %v4459_v32  ;;  %v1204_v40 = vmul.f32 5.0, %v3862_v30  ;;  %v193_v29 = vld [vmem:[%s5640_s30 + $0x1b8] sm:$0xff]  ;;  %v194_v30 = vld [vmem:[%s5640_s30 + $0x1c0] sm:$0xff] }
  0x6a   : > { %v3863_v41 = vadd.f32 -0.5, %v181_v26  ;;  %3240 = vst [vmem:[%s5687_s17 + $0xf0] sm:$0xff] %v2728_v33  ;;  %v2730_v43 = vadd.f32 0.5, %v2218_v34  ;;  %v2220_v44 = vmul.f32 0.5, %v4461_v37  ;;  %4474 = vtanh.f32 %v1203_v35  ;;  %v195_v35 = vld [vmem:[%s5640_s30 + $0x1c8] sm:$0xff] }
  0x6b   : > { %v3864_v45 = vadd.f32 -0.5, %v182_v31  ;;  %3241 = vst [vmem:[%s5687_s17 + $0xf8] sm:$0xff] %v2729_v38  ;;  %v2731_v48 = vadd.f32 0.5, %v2219_v39  ;;  %4476 = vtanh.f32 %v1204_v40  ;;  %v3865_v50 = vadd.f32 -0.5, %v183_v36 }
  0x6c   : > { %v4463_v47 = vpop.eup %4462  ;;  %v1205_v49 = vmul.f32 5.0, %v3863_v41  ;;  %3242 = vst [vmem:[%s5687_s17 + $0x100] sm:$0xff] %v2730_v43  ;;  %v2732_v53 = vadd.f32 0.5, %v2220_v44  ;;  %v3866_v56 = vadd.f32 -0.5, %v184_v42  ;;  %v3867_v59 = vadd.f32 -0.5, %v185_v46  ;;  %v196_v43 = vld [vmem:[%s5640_s30 + $0x1d0] sm:$0xff] }
  0x6d   : > { %v4465_v52 = vpop.eup %4464  ;;  %v2221_v54 = vmul.f32 0.5, %v4463_v47  ;;  %v1206_v55 = vmul.f32 5.0, %v3864_v45  ;;  %3243 = vst [vmem:[%s5687_s17 + $0x108] sm:$0xff] %v2731_v48  ;;  %v1207_v58 = vmul.f32 5.0, %v3865_v50  ;;  %v3868_v0 = vadd.f32 -0.5, %v186_v51  ;;  %v197_v48 = vld [vmem:[%s5640_s30 + $0x1d8] sm:$0xff] }
  0x6e   : > { %v2222_v57 = vmul.f32 0.5, %v4465_v52  ;;  %4478 = vtanh.f32 %v1205_v49  ;;  %v4467_v61 = vpop.eup %4466  ;;  %3244 = vst [vmem:[%s5687_s17 + $0x110] sm:$0xff] %v2732_v53  ;;  %v1208_v63 = vmul.f32 5.0, %v3866_v56  ;;  %v1209_v6 = vmul.f32 5.0, %v3867_v59 }
  0x6f   : > { %v2733_v62 = vadd.f32 0.5, %v2221_v54  ;;  %4480 = vtanh.f32 %v1206_v55  ;;  %v4469_v3 = vpop.eup %4468  ;;  %v2223_v5 = vmul.f32 0.5, %v4467_v61  ;;  %v1210_v8 = vmul.f32 5.0, %v3868_v0 }
  0x70   : > { %v2734_v4 = vadd.f32 0.5, %v2222_v57  ;;  %4482 = vtanh.f32 %v1207_v58  ;;  %v2224_v7 = vmul.f32 0.5, %v4469_v3  ;;  %v3869_v9 = vadd.f32 -0.5, %v187_v60 }
  0x71   : > { %3245 = vst [vmem:[%s5687_s17 + $0x118] sm:$0xff] %v2733_v62  ;;  %4484 = vtanh.f32 %v1208_v63  ;;  %v2735_v12 = vadd.f32 0.5, %v2223_v5  ;;  %v3870_v13 = vadd.f32 -0.5, %v188_v1  ;;  %v3871_v14 = vadd.f32 -0.5, %v189_v2  ;;  %v198_v62 = vld [vmem:[%s5640_s30 + $0x1e0] sm:$0xff]  ;;  %v199_v63 = vld [vmem:[%s5640_s30 + $0x1e8] sm:$0xff] }
  0x72   : > { %v4471_v11 = vpop.eup %4470  ;;  %3246 = vst [vmem:[%s5687_s17 + $0x120] sm:$0xff] %v2734_v4  ;;  %4486 = vtanh.f32 %v1209_v6  ;;  %v2736_v17 = vadd.f32 0.5, %v2224_v7  ;;  %v1211_v20 = vmul.f32 5.0, %v3869_v9  ;;  %v3872_v24 = vadd.f32 -0.5, %v190_v10  ;;  %v200_v4 = vld [vmem:[%s5640_s30 + $0x1f0] sm:$0xff] }
  0x73   : > { %v4473_v18 = vpop.eup %4472  ;;  %v2225_v19 = vmul.f32 0.5, %v4471_v11  ;;  %4488 = vtanh.f32 %v1210_v8  ;;  %3247 = vst [vmem:[%s5687_s17 + $0x128] sm:$0xff] %v2735_v12  ;;  %v1212_v22 = vmul.f32 5.0, %v3870_v13  ;;  %v1213_v23 = vmul.f32 5.0, %v3871_v14  ;;  %v201_v8 = vld [vmem:[%s5640_s30 + $0x1f8] sm:$0xff]  ;;  %v202_v13 = vld [vmem:[%s5640_s30 + $0x200] sm:$0xff] }
  0x74   : > { %v2226_v21 = vmul.f32 0.5, %v4473_v18  ;;  %v4475_v25 = vpop.eup %4474  ;;  %3248 = vst [vmem:[%s5687_s17 + $0x130] sm:$0xff] %v2736_v17  ;;  %4490 = vtanh.f32 %v1211_v20  ;;  %v3873_v27 = vadd.f32 -0.5, %v191_v15  ;;  %v3874_v28 = vadd.f32 -0.5, %v192_v16 }
  0x75   : > { %v2737_v26 = vadd.f32 0.5, %v2225_v19  ;;  %v4477_v31 = vpop.eup %4476  ;;  %v2227_v33 = vmul.f32 0.5, %v4475_v25  ;;  %4492 = vtanh.f32 %v1212_v22  ;;  %v1214_v34 = vmul.f32 5.0, %v3872_v24 }
  0x76   : > { %v2738_v32 = vadd.f32 0.5, %v2226_v21  ;;  %v2228_v36 = vmul.f32 0.5, %v4477_v31  ;;  %4494 = vtanh.f32 %v1213_v23  ;;  %v1215_v37 = vmul.f32 5.0, %v3873_v27 }
  0x77   : > { %3249 = vst [vmem:[%s5687_s17 + $0x138] sm:$0xff] %v2737_v26  ;;  %v1216_v38 = vmul.f32 5.0, %v3874_v28  ;;  %v2739_v40 = vadd.f32 0.5, %v2227_v33  ;;  %4496 = vtanh.f32 %v1214_v34  ;;  %v3875_v41 = vadd.f32 -0.5, %v193_v29  ;;  %v203_v28 = vld [vmem:[%s5640_s30 + $0x208] sm:$0xff]  ;;  %v204_v33 = vld [vmem:[%s5640_s30 + $0x210] sm:$0xff] }
  0x78   : > { %v4479_v39 = vpop.eup %4478  ;;  %3250 = vst [vmem:[%s5687_s17 + $0x140] sm:$0xff] %v2738_v32  ;;  %v3876_v42 = vadd.f32 -0.5, %v194_v30  ;;  %v2740_v45 = vadd.f32 0.5, %v2228_v36  ;;  %4498 = vtanh.f32 %v1215_v37  ;;  %v3877_v47 = vadd.f32 -0.5, %v195_v35  ;;  %v205_v34 = vld [vmem:[%s5640_s30 + $0x218] sm:$0xff] }
  0x79   : > { %v4481_v44 = vpop.eup %4480  ;;  %v2229_v46 = vmul.f32 0.5, %v4479_v39  ;;  %3251 = vst [vmem:[%s5687_s17 + $0x148] sm:$0xff] %v2739_v40  ;;  %4500 = vtanh.f32 %v1216_v38  ;;  %v1217_v51 = vmul.f32 5.0, %v3875_v41  ;;  %v3878_v57 = vadd.f32 -0.5, %v196_v43 }
  0x7a   : > { %v4483_v49 = vpop.eup %4482  ;;  %v2230_v50 = vmul.f32 0.5, %v4481_v44  ;;  %v1218_v52 = vmul.f32 5.0, %v3876_v42  ;;  %3252 = vst [vmem:[%s5687_s17 + $0x150] sm:$0xff] %v2740_v45  ;;  %v1219_v56 = vmul.f32 5.0, %v3877_v47  ;;  %v3879_v61 = vadd.f32 -0.5, %v197_v48  ;;  %v206_v42 = vld [vmem:[%s5640_s30 + $0x220] sm:$0xff] }
  0x7b   : > { %v4485_v53 = vpop.eup %4484  ;;  %v2741_v54 = vadd.f32 0.5, %v2229_v46  ;;  %v2231_v55 = vmul.f32 0.5, %v4483_v49  ;;  %4502 = vtanh.f32 %v1217_v51  ;;  %v1220_v3 = vmul.f32 5.0, %v3878_v57  ;;  %v207_v47 = vld [vmem:[%s5640_s30 + $0x228] sm:$0xff] }
  0x7c   : > { %v4487_v58 = vpop.eup %4486  ;;  %v2742_v59 = vadd.f32 0.5, %v2230_v50  ;;  %v2232_v60 = vmul.f32 0.5, %v4485_v53  ;;  %4504 = vtanh.f32 %v1218_v52  ;;  %v1221_v7 = vmul.f32 5.0, %v3879_v61  ;;  %v208_v61 = vld [vmem:[%s5640_s30 + $0x230] sm:$0xff] }
  0x7d   : > { %v4489_v0 = vpop.eup %4488  ;;  %3253 = vst [vmem:[%s5687_s17 + $0x158] sm:$0xff] %v2741_v54  ;;  %v2743_v1 = vadd.f32 0.5, %v2231_v55  ;;  %v2233_v2 = vmul.f32 0.5, %v4487_v58  ;;  %4506 = vtanh.f32 %v1219_v56  ;;  %v3880_v11 = vadd.f32 -0.5, %v198_v62  ;;  %v209_v62 = vld [vmem:[%s5640_s30 + $0x238] sm:$0xff] }
  0x7e   : > { %3254 = vst [vmem:[%s5687_s17 + $0x160] sm:$0xff] %v2742_v59  ;;  %v2744_v5 = vadd.f32 0.5, %v2232_v60  ;;  %v2234_v6 = vmul.f32 0.5, %v4489_v0  ;;  %v4491_v9 = vpop.eup %4490  ;;  %4508 = vtanh.f32 %v1220_v3  ;;  %v3881_v12 = vadd.f32 -0.5, %v199_v63  ;;  %v210_v3 = vld [vmem:[%s5640_s30 + $0x240] sm:$0xff] }
  0x7f   : > { %3255 = vst [vmem:[%s5687_s17 + $0x168] sm:$0xff] %v2743_v1  ;;  %v2745_v10 = vadd.f32 0.5, %v2233_v2  ;;  %v4493_v14 = vpop.eup %4492  ;;  %v2235_v16 = vmul.f32 0.5, %v4491_v9  ;;  %4510 = vtanh.f32 %v1221_v7  ;;  %v3882_v18 = vadd.f32 -0.5, %v200_v4  ;;  %v211_v4 = vld [vmem:[%s5640_s30 + $0x248] sm:$0xff] }
  0x80   : > { %3256 = vst [vmem:[%s5687_s17 + $0x170] sm:$0xff] %v2744_v5  ;;  %v2746_v15 = vadd.f32 0.5, %v2234_v6  ;;  %v4495_v17 = vpop.eup %4494  ;;  %v2236_v19 = vmul.f32 0.5, %v4493_v14  ;;  %v1222_v20 = vmul.f32 5.0, %v3880_v11  ;;  %v1223_v21 = vmul.f32 5.0, %v3881_v12  ;;  %v213_v12 = vld [vmem:[%s5640_s30 + $0x258] sm:$0xff] }
  0x81   : > { %3257 = vst [vmem:[%s5687_s17 + $0x178] sm:$0xff] %v2745_v10  ;;  %v3883_v22 = vadd.f32 -0.5, %v201_v8  ;;  %v4497_v23 = vpop.eup %4496  ;;  %v2747_v24 = vadd.f32 0.5, %v2235_v16  ;;  %v2237_v25 = vmul.f32 0.5, %v4495_v17  ;;  %v1224_v26 = vmul.f32 5.0, %v3882_v18  ;;  %v212_v8 = vld [vmem:[%s5640_s30 + $0x250] sm:$0xff] }
  0x82   : > { %3258 = vst [vmem:[%s5687_s17 + $0x180] sm:$0xff] %v2746_v15  ;;  %v3884_v27 = vadd.f32 -0.5, %v202_v13  ;;  %v4499_v29 = vpop.eup %4498  ;;  %v2748_v30 = vadd.f32 0.5, %v2236_v19  ;;  %v2238_v31 = vmul.f32 0.5, %v4497_v23  ;;  %4512 = vtanh.f32 %v1222_v20 }
  0x83   : > { %v1225_v32 = vmul.f32 5.0, %v3883_v22  ;;  %v4501_v35 = vpop.eup %4500  ;;  %3259 = vst [vmem:[%s5687_s17 + $0x188] sm:$0xff] %v2747_v24  ;;  %v2749_v36 = vadd.f32 0.5, %v2237_v25  ;;  %v2239_v37 = vmul.f32 0.5, %v4499_v29  ;;  %4514 = vtanh.f32 %v1223_v21 }
  0x84   : > { %v1226_v38 = vmul.f32 5.0, %v3884_v27  ;;  %3260 = vst [vmem:[%s5687_s17 + $0x190] sm:$0xff] %v2748_v30  ;;  %v2750_v39 = vadd.f32 0.5, %v2238_v31  ;;  %v2240_v40 = vmul.f32 0.5, %v4501_v35  ;;  %4516 = vtanh.f32 %v1224_v26  ;;  %v214_v27 = vld [vmem:[%s5640_s30 + $0x260] sm:$0xff] }
  0x85   : > { %v3885_v41 = vadd.f32 -0.5, %v203_v28  ;;  %v4503_v43 = vpop.eup %4502  ;;  %3261 = vst [vmem:[%s5687_s17 + $0x198] sm:$0xff] %v2749_v36  ;;  %v2751_v44 = vadd.f32 0.5, %v2239_v37  ;;  %4518 = vtanh.f32 %v1225_v32  ;;  %v3886_v45 = vadd.f32 -0.5, %v204_v33  ;;  %v215_v32 = vld [vmem:[%s5640_s30 + $0x268] sm:$0xff]  ;;  %v216_v33 = vld [vmem:[%s5640_s30 + $0x270] sm:$0xff] }
  0x86   : > { %v3887_v46 = vadd.f32 -0.5, %v205_v34  ;;  %v4505_v48 = vpop.eup %4504  ;;  %3262 = vst [vmem:[%s5687_s17 + $0x1a0] sm:$0xff] %v2750_v39  ;;  %v2752_v49 = vadd.f32 0.5, %v2240_v40  ;;  %v2241_v50 = vmul.f32 0.5, %v4503_v43  ;;  %4520 = vtanh.f32 %v1226_v38 }
  0x87   : > { %v1227_v51 = vmul.f32 5.0, %v3885_v41  ;;  %v4507_v52 = vpop.eup %4506  ;;  %3263 = vst [vmem:[%s5687_s17 + $0x1a8] sm:$0xff] %v2751_v44  ;;  %v2242_v53 = vmul.f32 0.5, %v4505_v48  ;;  %v1228_v54 = vmul.f32 5.0, %v3886_v45  ;;  %v3888_v56 = vadd.f32 -0.5, %v206_v42  ;;  %v217_v45 = vld [vmem:[%s5640_s30 + $0x278] sm:$0xff] }
  0x88   : > { %v1229_v55 = vmul.f32 5.0, %v3887_v46  ;;  %v4509_v57 = vpop.eup %4508  ;;  %3264 = vst [vmem:[%s5687_s17 + $0x1b0] sm:$0xff] %v2752_v49  ;;  %v2753_v58 = vadd.f32 0.5, %v2241_v50  ;;  %v2243_v59 = vmul.f32 0.5, %v4507_v52  ;;  %v3889_v60 = vadd.f32 -0.5, %v207_v47  ;;  %v218_v50 = vld [vmem:[%s5640_s30 + $0x280] sm:$0xff] }
  0x89   : > { %4522 = vtanh.f32 %v1227_v51  ;;  %v4511_v63 = vpop.eup %4510  ;;  %v2754_v0 = vadd.f32 0.5, %v2242_v53  ;;  %v2244_v1 = vmul.f32 0.5, %v4509_v57  ;;  %v1230_v2 = vmul.f32 5.0, %v3888_v56 }
  0x8a   : > { %4524 = vtanh.f32 %v1228_v54  ;;  %3265 = vst [vmem:[%s5687_s17 + $0x1b8] sm:$0xff] %v2753_v58  ;;  %v2755_v5 = vadd.f32 0.5, %v2243_v59  ;;  %v2245_v6 = vmul.f32 0.5, %v4511_v63  ;;  %v1231_v7 = vmul.f32 5.0, %v3889_v60  ;;  %v219_v59 = vld [vmem:[%s5640_s30 + $0x288] sm:$0xff]  ;;  %v220_v60 = vld [vmem:[%s5640_s30 + $0x290] sm:$0xff] }
  0x8b   : > { %4526 = vtanh.f32 %v1229_v55  ;;  %3266 = vst [vmem:[%s5687_s17 + $0x1c0] sm:$0xff] %v2754_v0  ;;  %v2756_v9 = vadd.f32 0.5, %v2244_v1  ;;  %v3890_v10 = vadd.f32 -0.5, %v208_v61  ;;  %v3891_v11 = vadd.f32 -0.5, %v209_v62  ;;  %v221_v1 = vld [vmem:[%s5640_s30 + $0x298] sm:$0xff] }
  0x8c   : > { %4528 = vtanh.f32 %v1230_v2  ;;  %v4513_v13 = vpop.eup %4512  ;;  %3267 = vst [vmem:[%s5687_s17 + $0x1c8] sm:$0xff] %v2755_v5  ;;  %v2757_v14 = vadd.f32 0.5, %v2245_v6  ;;  %v3892_v15 = vadd.f32 -0.5, %v210_v3  ;;  %v3893_v16 = vadd.f32 -0.5, %v211_v4  ;;  %v222_v2 = vld [vmem:[%s5640_s30 + $0x2a0] sm:$0xff] }
  0x8d   : > { %4530 = vtanh.f32 %v1231_v7  ;;  %v4515_v18 = vpop.eup %4514  ;;  %3268 = vst [vmem:[%s5687_s17 + $0x1d0] sm:$0xff] %v2756_v9  ;;  %v2246_v17 = vmul.f32 0.5, %v4513_v13  ;;  %v1232_v19 = vmul.f32 5.0, %v3890_v10  ;;  %v1233_v20 = vmul.f32 5.0, %v3891_v11  ;;  %v223_v10 = vld [vmem:[%s5640_s30 + $0x2a8] sm:$0xff] }
  0x8e   : > { %v3894_v21 = vadd.f32 -0.5, %v212_v8  ;;  %v4517_v22 = vpop.eup %4516  ;;  %3269 = vst [vmem:[%s5687_s17 + $0x1d8] sm:$0xff] %v2757_v14  ;;  %v2247_v23 = vmul.f32 0.5, %v4515_v18  ;;  %v1234_v24 = vmul.f32 5.0, %v3892_v15  ;;  %v1235_v25 = vmul.f32 5.0, %v3893_v16  ;;  %v224_v15 = vld [vmem:[%s5640_s30 + $0x2b0] sm:$0xff] }
  0x8f   : > { %v3895_v26 = vadd.f32 -0.5, %v213_v12  ;;  %v4519_v28 = vpop.eup %4518  ;;  %v2758_v29 = vadd.f32 0.5, %v2246_v17  ;;  %v2248_v30 = vmul.f32 0.5, %v4517_v22  ;;  %4532 = vtanh.f32 %v1232_v19 }
  0x90   : > { %v1236_v31 = vmul.f32 5.0, %v3894_v21  ;;  %v4521_v34 = vpop.eup %4520  ;;  %v2759_v35 = vadd.f32 0.5, %v2247_v23  ;;  %v2249_v36 = vmul.f32 0.5, %v4519_v28  ;;  %4534 = vtanh.f32 %v1233_v20 }
  0x91   : > { %v1237_v37 = vmul.f32 5.0, %v3895_v26  ;;  %3270 = vst [vmem:[%s5687_s17 + $0x1e0] sm:$0xff] %v2758_v29  ;;  %v2760_v38 = vadd.f32 0.5, %v2248_v30  ;;  %v2250_v39 = vmul.f32 0.5, %v4521_v34  ;;  %4536 = vtanh.f32 %v1234_v24  ;;  %v225_v29 = vld [vmem:[%s5640_s30 + $0x2b8] sm:$0xff]  ;;  %v226_v34 = vld [vmem:[%s5640_s30 + $0x2c0] sm:$0xff] }
  0x92   : > { %v3896_v40 = vadd.f32 -0.5, %v214_v27  ;;  %3271 = vst [vmem:[%s5687_s17 + $0x1e8] sm:$0xff] %v2759_v35  ;;  %v2761_v42 = vadd.f32 0.5, %v2249_v36  ;;  %4538 = vtanh.f32 %v1235_v25  ;;  %v3897_v43 = vadd.f32 -0.5, %v215_v32 }
  0x93   : > { %v4523_v41 = vpop.eup %4522  ;;  %v3898_v44 = vadd.f32 -0.5, %v216_v33  ;;  %3272 = vst [vmem:[%s5687_s17 + $0x1f0] sm:$0xff] %v2760_v38  ;;  %v2762_v47 = vadd.f32 0.5, %v2250_v39  ;;  %4540 = vtanh.f32 %v1236_v31  ;;  %v3899_v58 = vadd.f32 -0.5, %v217_v45 }
  0x94   : > { %v4525_v46 = vpop.eup %4524  ;;  %v2251_v48 = vmul.f32 0.5, %v4523_v41  ;;  %v1238_v49 = vmul.f32 5.0, %v3896_v40  ;;  %3273 = vst [vmem:[%s5687_s17 + $0x1f8] sm:$0xff] %v2761_v42  ;;  %4542 = vtanh.f32 %v1237_v37  ;;  %v1239_v53 = vmul.f32 5.0, %v3897_v43  ;;  %v227_v43 = vld [vmem:[%s5640_s30 + $0x2c8] sm:$0xff] }
  0x95   : > { %v4527_v51 = vpop.eup %4526  ;;  %v2252_v52 = vmul.f32 0.5, %v4525_v46  ;;  %v1240_v54 = vmul.f32 5.0, %v3898_v44  ;;  %3274 = vst [vmem:[%s5687_s17 + $0x200] sm:$0xff] %v2762_v47  ;;  %v3900_v0 = vadd.f32 -0.5, %v218_v50  ;;  %v1241_v5 = vmul.f32 5.0, %v3899_v58  ;;  %v230_v58 = vld [vmem:[%s5640_s30 + $0x2e0] sm:$0xff] }
  0x96   : > { %v4529_v55 = vpop.eup %4528  ;;  %v2763_v56 = vadd.f32 0.5, %v2251_v48  ;;  %v2253_v57 = vmul.f32 0.5, %v4527_v51  ;;  %4544 = vtanh.f32 %v1238_v49  ;;  %v3901_v8 = vadd.f32 -0.5, %v219_v59  ;;  %v228_v48 = vld [vmem:[%s5640_s30 + $0x2d0] sm:$0xff]  ;;  %v229_v49 = vld [vmem:[%s5640_s30 + $0x2d8] sm:$0xff] }
  0x97   : > { %v4531_v61 = vpop.eup %4530  ;;  %v2764_v62 = vadd.f32 0.5, %v2252_v52  ;;  %v2254_v63 = vmul.f32 0.5, %v4529_v55  ;;  %4546 = vtanh.f32 %v1239_v53  ;;  %v1242_v7 = vmul.f32 5.0, %v3900_v0  ;;  %v232_v0 = vld [vmem:[%s5640_s30 + $0x2f0] sm:$0xff] }
  0x98   : > { %3275 = vst [vmem:[%s5687_s17 + $0x208] sm:$0xff] %v2763_v56  ;;  %v2765_v3 = vadd.f32 0.5, %v2253_v57  ;;  %v2255_v4 = vmul.f32 0.5, %v4531_v61  ;;  %4548 = vtanh.f32 %v1240_v54  ;;  %v3902_v9 = vadd.f32 -0.5, %v220_v60 }
  0x99   : > { %3276 = vst [vmem:[%s5687_s17 + $0x210] sm:$0xff] %v2764_v62  ;;  %v2766_v6 = vadd.f32 0.5, %v2254_v63  ;;  %v4533_v11 = vpop.eup %4532  ;;  %4550 = vtanh.f32 %v1241_v5  ;;  %v3903_v13 = vadd.f32 -0.5, %v221_v1  ;;  %v3904_v14 = vadd.f32 -0.5, %v222_v2  ;;  %v231_v63 = vld [vmem:[%s5640_s30 + $0x2e8] sm:$0xff] }
  0x9a   : > { %3277 = vst [vmem:[%s5687_s17 + $0x218] sm:$0xff] %v2765_v3  ;;  %v2767_v12 = vadd.f32 0.5, %v2255_v4  ;;  %v4535_v16 = vpop.eup %4534  ;;  %v2256_v18 = vmul.f32 0.5, %v4533_v11  ;;  %4552 = vtanh.f32 %v1242_v7  ;;  %v1243_v17 = vmul.f32 5.0, %v3901_v8 }
  0x9b   : > { %3278 = vst [vmem:[%s5687_s17 + $0x220] sm:$0xff] %v2766_v6  ;;  %v1244_v19 = vmul.f32 5.0, %v3902_v9  ;;  %v4537_v20 = vpop.eup %4536  ;;  %v2257_v21 = vmul.f32 0.5, %v4535_v16  ;;  %v1245_v22 = vmul.f32 5.0, %v3903_v13  ;;  %v1246_v23 = vmul.f32 5.0, %v3904_v14  ;;  %v233_v13 = vld [vmem:[%s5640_s30 + $0x2f8] sm:$0xff] }
  0x9c   : > { %3279 = vst [vmem:[%s5687_s17 + $0x228] sm:$0xff] %v2767_v12  ;;  %v3905_v24 = vadd.f32 -0.5, %v223_v10  ;;  %v4539_v25 = vpop.eup %4538  ;;  %v2768_v26 = vadd.f32 0.5, %v2256_v18  ;;  %v2258_v27 = vmul.f32 0.5, %v4537_v20  ;;  %4554 = vtanh.f32 %v1243_v17  ;;  %v234_v17 = vld [vmem:[%s5640_s30 + $0x300] sm:$0xff] }
  0x9d   : > { %v3906_v28 = vadd.f32 -0.5, %v224_v15  ;;  %v4541_v30 = vpop.eup %4540  ;;  %v2769_v31 = vadd.f32 0.5, %v2257_v21  ;;  %v2259_v32 = vmul.f32 0.5, %v4539_v25  ;;  %4556 = vtanh.f32 %v1244_v19 }
  0x9e   : > { %v1247_v33 = vmul.f32 5.0, %v3905_v24  ;;  %v4543_v35 = vpop.eup %4542  ;;  %3280 = vst [vmem:[%s5687_s17 + $0x230] sm:$0xff] %v2768_v26  ;;  %v2770_v36 = vadd.f32 0.5, %v2258_v27  ;;  %v2260_v37 = vmul.f32 0.5, %v4541_v30  ;;  %4558 = vtanh.f32 %v1245_v22  ;;  %v235_v27 = vld [vmem:[%s5640_s30 + $0x308] sm:$0xff] }
  0x9f   : > { %v1248_v38 = vmul.f32 5.0, %v3906_v28  ;;  %3281 = vst [vmem:[%s5687_s17 + $0x238] sm:$0xff] %v2769_v31  ;;  %v2771_v40 = vadd.f32 0.5, %v2259_v32  ;;  %v2261_v41 = vmul.f32 0.5, %v4543_v35  ;;  %4560 = vtanh.f32 %v1246_v23  ;;  %v236_v32 = vld [vmem:[%s5640_s30 + $0x310] sm:$0xff] }
  0xa0   : > { %v4545_v39 = vpop.eup %4544  ;;  %v3907_v42 = vadd.f32 -0.5, %v225_v29  ;;  %3282 = vst [vmem:[%s5687_s17 + $0x240] sm:$0xff] %v2770_v36  ;;  %v2772_v45 = vadd.f32 0.5, %v2260_v37  ;;  %4562 = vtanh.f32 %v1247_v33  ;;  %v3908_v47 = vadd.f32 -0.5, %v226_v34  ;;  %v237_v33 = vld [vmem:[%s5640_s30 + $0x318] sm:$0xff] }
  0xa1   : > { %v4547_v44 = vpop.eup %4546  ;;  %v2262_v46 = vmul.f32 0.5, %v4545_v39  ;;  %3283 = vst [vmem:[%s5687_s17 + $0x248] sm:$0xff] %v2771_v40  ;;  %v2773_v51 = vadd.f32 0.5, %v2261_v41  ;;  %4564 = vtanh.f32 %v1248_v38  ;;  %v3909_v57 = vadd.f32 -0.5, %v227_v43 }
  0xa2   : > { %v4549_v50 = vpop.eup %4548  ;;  %v2263_v52 = vmul.f32 0.5, %v4547_v44  ;;  %v1249_v53 = vmul.f32 5.0, %v3907_v42  ;;  %3284 = vst [vmem:[%s5687_s17 + $0x250] sm:$0xff] %v2772_v45  ;;  %v1250_v56 = vmul.f32 5.0, %v3908_v47  ;;  %v3910_v61 = vadd.f32 -0.5, %v228_v48  ;;  %v238_v42 = vld [vmem:[%s5640_s30 + $0x320] sm:$0xff] }
  0xa3   : > { %v2774_v54 = vadd.f32 0.5, %v2262_v46  ;;  %v2264_v55 = vmul.f32 0.5, %v4549_v50  ;;  %v4551_v59 = vpop.eup %4550  ;;  %3285 = vst [vmem:[%s5687_s17 + $0x258] sm:$0xff] %v2773_v51  ;;  %v3911_v62 = vadd.f32 -0.5, %v229_v49  ;;  %v1251_v4 = vmul.f32 5.0, %v3909_v57  ;;  %v239_v47 = vld [vmem:[%s5640_s30 + $0x328] sm:$0xff] }
  0xa4   : > { %v2775_v60 = vadd.f32 0.5, %v2263_v52  ;;  %4566 = vtanh.f32 %v1249_v53  ;;  %v4553_v1 = vpop.eup %4552  ;;  %v2265_v3 = vmul.f32 0.5, %v4551_v59  ;;  %v1252_v6 = vmul.f32 5.0, %v3910_v61  ;;  %v240_v48 = vld [vmem:[%s5640_s30 + $0x330] sm:$0xff]  ;;  %v241_v61 = vld [vmem:[%s5640_s30 + $0x338] sm:$0xff] }
  0xa5   : > { %3286 = vst [vmem:[%s5687_s17 + $0x260] sm:$0xff] %v2774_v54  ;;  %v2776_v2 = vadd.f32 0.5, %v2264_v55  ;;  %4568 = vtanh.f32 %v1250_v56  ;;  %v2266_v5 = vmul.f32 0.5, %v4553_v1  ;;  %v1253_v7 = vmul.f32 5.0, %v3911_v62 }
  0xa6   : > { %3287 = vst [vmem:[%s5687_s17 + $0x268] sm:$0xff] %v2775_v60  ;;  %v3912_v8 = vadd.f32 -0.5, %v230_v58  ;;  %v4555_v9 = vpop.eup %4554  ;;  %v2777_v10 = vadd.f32 0.5, %v2265_v3  ;;  %4570 = vtanh.f32 %v1251_v4  ;;  %v3913_v11 = vadd.f32 -0.5, %v231_v63 }
  0xa7   : > { %3288 = vst [vmem:[%s5687_s17 + $0x270] sm:$0xff] %v2776_v2  ;;  %v3914_v12 = vadd.f32 -0.5, %v232_v0  ;;  %v4557_v14 = vpop.eup %4556  ;;  %v2778_v15 = vadd.f32 0.5, %v2266_v5  ;;  %v2267_v16 = vmul.f32 0.5, %v4555_v9  ;;  %4572 = vtanh.f32 %v1252_v6  ;;  %v242_v2 = vld [vmem:[%s5640_s30 + $0x340] sm:$0xff] }
  0xa8   : > { %v1254_v18 = vmul.f32 5.0, %v3912_v8  ;;  %v4559_v19 = vpop.eup %4558  ;;  %3289 = vst [vmem:[%s5687_s17 + $0x278] sm:$0xff] %v2777_v10  ;;  %v2268_v20 = vmul.f32 0.5, %v4557_v14  ;;  %4574 = vtanh.f32 %v1253_v7  ;;  %v1255_v21 = vmul.f32 5.0, %v3913_v11  ;;  %v243_v11 = vld [vmem:[%s5640_s30 + $0x348] sm:$0xff] }
  0xa9   : > { %v1256_v22 = vmul.f32 5.0, %v3914_v12  ;;  %v4561_v23 = vpop.eup %4560  ;;  %3290 = vst [vmem:[%s5687_s17 + $0x280] sm:$0xff] %v2778_v15  ;;  %v2779_v24 = vadd.f32 0.5, %v2267_v16  ;;  %v2269_v25 = vmul.f32 0.5, %v4559_v19  ;;  %v3915_v26 = vadd.f32 -0.5, %v233_v13  ;;  %v244_v16 = vld [vmem:[%s5640_s30 + $0x350] sm:$0xff] }
  0xaa   : > { %4576 = vtanh.f32 %v1254_v18  ;;  %v4563_v28 = vpop.eup %4562  ;;  %v2780_v29 = vadd.f32 0.5, %v2268_v20  ;;  %v2270_v30 = vmul.f32 0.5, %v4561_v23  ;;  %v3916_v31 = vadd.f32 -0.5, %v234_v17  ;;  %v245_v18 = vld [vmem:[%s5640_s30 + $0x358] sm:$0xff] }
  0xab   : > { %4578 = vtanh.f32 %v1255_v21  ;;  %v4565_v34 = vpop.eup %4564  ;;  %3291 = vst [vmem:[%s5687_s17 + $0x288] sm:$0xff] %v2779_v24  ;;  %v2781_v35 = vadd.f32 0.5, %v2269_v25  ;;  %v2271_v36 = vmul.f32 0.5, %v4563_v28  ;;  %v1257_v37 = vmul.f32 5.0, %v3915_v26  ;;  %v246_v26 = vld [vmem:[%s5640_s30 + $0x360] sm:$0xff] }
  0xac   : > { %4580 = vtanh.f32 %v1256_v22  ;;  %3292 = vst [vmem:[%s5687_s17 + $0x290] sm:$0xff] %v2780_v29  ;;  %v2782_v38 = vadd.f32 0.5, %v2270_v30  ;;  %v2272_v39 = vmul.f32 0.5, %v4565_v34  ;;  %v1258_v40 = vmul.f32 5.0, %v3916_v31  ;;  %v247_v31 = vld [vmem:[%s5640_s30 + $0x368] sm:$0xff] }
  0xad   : > { %v3917_v41 = vadd.f32 -0.5, %v235_v27  ;;  %3293 = vst [vmem:[%s5687_s17 + $0x298] sm:$0xff] %v2781_v35  ;;  %v2783_v44 = vadd.f32 0.5, %v2271_v36  ;;  %4582 = vtanh.f32 %v1257_v37  ;;  %v3918_v45 = vadd.f32 -0.5, %v236_v32  ;;  %v248_v32 = vld [vmem:[%s5640_s30 + $0x370] sm:$0xff] }
  0xae   : > { %v4567_v43 = vpop.eup %4566  ;;  %v3919_v46 = vadd.f32 -0.5, %v237_v33  ;;  %3294 = vst [vmem:[%s5687_s17 + $0x2a0] sm:$0xff] %v2782_v38  ;;  %v2784_v50 = vadd.f32 0.5, %v2272_v39  ;;  %4584 = vtanh.f32 %v1258_v40  ;;  %v3920_v56 = vadd.f32 -0.5, %v238_v42 }
  0xaf   : > { %v4569_v49 = vpop.eup %4568  ;;  %v2273_v51 = vmul.f32 0.5, %v4567_v43  ;;  %v1259_v52 = vmul.f32 5.0, %v3917_v41  ;;  %3295 = vst [vmem:[%s5687_s17 + $0x2a8] sm:$0xff] %v2783_v44  ;;  %v1260_v54 = vmul.f32 5.0, %v3918_v45  ;;  %v3921_v59 = vadd.f32 -0.5, %v239_v47  ;;  %v249_v45 = vld [vmem:[%s5640_s30 + $0x378] sm:$0xff] }
  0xb0   : > { %v2274_v53 = vmul.f32 0.5, %v4569_v49  ;;  %v1261_v55 = vmul.f32 5.0, %v3919_v46  ;;  %v4571_v57 = vpop.eup %4570  ;;  %3296 = vst [vmem:[%s5687_s17 + $0x2b0] sm:$0xff] %v2784_v50  ;;  %v3922_v60 = vadd.f32 -0.5, %v240_v48  ;;  %v1262_v1 = vmul.f32 5.0, %v3920_v56  ;;  %v250_v50 = vld [vmem:[%s5640_s30 + $0x380] sm:$0xff] }
  0xb1   : > { %v2785_v58 = vadd.f32 0.5, %v2273_v51  ;;  %4586 = vtanh.f32 %v1259_v52  ;;  %v4573_v62 = vpop.eup %4572  ;;  %v2275_v0 = vmul.f32 0.5, %v4571_v57  ;;  %v1263_v5 = vmul.f32 5.0, %v3921_v59  ;;  %v251_v59 = vld [vmem:[%s5640_s30 + $0x388] sm:$0xff] }
  0xb2   : > { %v2786_v63 = vadd.f32 0.5, %v2274_v53  ;;  %4588 = vtanh.f32 %v1260_v54  ;;  %v4575_v3 = vpop.eup %4574  ;;  %v2276_v4 = vmul.f32 0.5, %v4573_v62  ;;  %v1264_v6 = vmul.f32 5.0, %v3922_v60 }
  0xb3   : > { %3297 = vst [vmem:[%s5687_s17 + $0x2b8] sm:$0xff] %v2785_v58  ;;  %4590 = vtanh.f32 %v1261_v55  ;;  %v2787_v8 = vadd.f32 0.5, %v2275_v0  ;;  %v2277_v9 = vmul.f32 0.5, %v4575_v3  ;;  %v3923_v10 = vadd.f32 -0.5, %v241_v61  ;;  %v252_v0 = vld [vmem:[%s5640_s30 + $0x390] sm:$0xff] }
  0xb4   : > { %v4577_v7 = vpop.eup %4576  ;;  %3298 = vst [vmem:[%s5687_s17 + $0x2c0] sm:$0xff] %v2786_v63  ;;  %4592 = vtanh.f32 %v1262_v1  ;;  %v2788_v13 = vadd.f32 0.5, %v2276_v4  ;;  %v3924_v15 = vadd.f32 -0.5, %v242_v2  ;;  %v3925_v25 = vadd.f32 -0.5, %v243_v11  ;;  %v253_v1 = vld [vmem:[%s5640_s30 + $0x398] sm:$0xff] }
  0xb5   : > { %v4579_v12 = vpop.eup %4578  ;;  %v2278_v14 = vmul.f32 0.5, %v4577_v7  ;;  %4594 = vtanh.f32 %v1263_v5  ;;  %3299 = vst [vmem:[%s5687_s17 + $0x2c8] sm:$0xff] %v2787_v8  ;;  %v2789_v19 = vadd.f32 0.5, %v2277_v9  ;;  %v1265_v21 = vmul.f32 5.0, %v3923_v10  ;;  %v254_v10 = vld [vmem:[%s5640_s30 + $0x3a0] sm:$0xff] }
  0xb6   : > { %v4581_v17 = vpop.eup %4580  ;;  %v2279_v20 = vmul.f32 0.5, %v4579_v12  ;;  %4596 = vtanh.f32 %v1264_v6  ;;  %3300 = vst [vmem:[%s5687_s17 + $0x2d0] sm:$0xff] %v2788_v13  ;;  %v1266_v24 = vmul.f32 5.0, %v3924_v15  ;;  %v3926_v29 = vadd.f32 -0.5, %v244_v16  ;;  %v255_v15 = vld [vmem:[%s5640_s30 + $0x3a8] sm:$0xff]  ;;  %v256_v16 = vld [vmem:[%s5640_s30 + $0x3b0] sm:$0xff] }
  0xb7   : > { %v2790_v22 = vadd.f32 0.5, %v2278_v14  ;;  %v2280_v23 = vmul.f32 0.5, %v4581_v17  ;;  %v4583_v27 = vpop.eup %4582  ;;  %3301 = vst [vmem:[%s5687_s17 + $0x2d8] sm:$0xff] %v2789_v19  ;;  %4598 = vtanh.f32 %v1265_v21  ;;  %v3927_v30 = vadd.f32 -0.5, %v245_v18 }
  0xb8   : > { %v2791_v28 = vadd.f32 0.5, %v2279_v20  ;;  %v4585_v33 = vpop.eup %4584  ;;  %v2281_v35 = vmul.f32 0.5, %v4583_v27  ;;  %4600 = vtanh.f32 %v1266_v24  ;;  %v1267_v36 = vmul.f32 5.0, %v3925_v25 }
  0xb9   : > { %3302 = vst [vmem:[%s5687_s17 + $0x2e0] sm:$0xff] %v2790_v22  ;;  %v2792_v34 = vadd.f32 0.5, %v2280_v23  ;;  %v2282_v37 = vmul.f32 0.5, %v4585_v33  ;;  %v1268_v38 = vmul.f32 5.0, %v3926_v29  ;;  %v1269_v39 = vmul.f32 5.0, %v3927_v30  ;;  %v257_v29 = vld [vmem:[%s5640_s30 + $0x3b8] sm:$0xff] }
  0xba   : > { %3303 = vst [vmem:[%s5687_s17 + $0x2e8] sm:$0xff] %v2791_v28  ;;  %v3928_v40 = vadd.f32 -0.5, %v246_v26  ;;  %v2793_v42 = vadd.f32 0.5, %v2281_v35  ;;  %4602 = vtanh.f32 %v1267_v36  ;;  %v3929_v43 = vadd.f32 -0.5, %v247_v31 }
  0xbb   : > { %v4587_v41 = vpop.eup %4586  ;;  %3304 = vst [vmem:[%s5687_s17 + $0x2f0] sm:$0xff] %v2792_v34  ;;  %v3930_v44 = vadd.f32 -0.5, %v248_v32  ;;  %v2794_v47 = vadd.f32 0.5, %v2282_v37  ;;  %4604 = vtanh.f32 %v1268_v38  ;;  %v3931_v58 = vadd.f32 -0.5, %v249_v45  ;;  %v258_v34 = vld [vmem:[%s5640_s30 + $0x3c0] sm:$0xff] }
  0xbc   : > { %v4589_v46 = vpop.eup %4588  ;;  %v2283_v48 = vmul.f32 0.5, %v4587_v41  ;;  %v1270_v49 = vmul.f32 5.0, %v3928_v40  ;;  %3305 = vst [vmem:[%s5687_s17 + $0x2f8] sm:$0xff] %v2793_v42  ;;  %4606 = vtanh.f32 %v1269_v39  ;;  %v1271_v53 = vmul.f32 5.0, %v3929_v43  ;;  %v259_v43 = vld [vmem:[%s5640_s30 + $0x3c8] sm:$0xff] }
  0xbd   : > { %v4591_v51 = vpop.eup %4590  ;;  %v2284_v52 = vmul.f32 0.5, %v4589_v46  ;;  %v1272_v54 = vmul.f32 5.0, %v3930_v44  ;;  %3306 = vst [vmem:[%s5687_s17 + $0x300] sm:$0xff] %v2794_v47  ;;  %v3932_v63 = vadd.f32 -0.5, %v250_v50  ;;  %v1273_v5 = vmul.f32 5.0, %v3931_v58  ;;  %v262_v58 = vld [vmem:[%s5640_s30 + $0x3e0] sm:$0xff] }
  0xbe   : > { %v4593_v55 = vpop.eup %4592  ;;  %v2795_v56 = vadd.f32 0.5, %v2283_v48  ;;  %v2285_v57 = vmul.f32 0.5, %v4591_v51  ;;  %4608 = vtanh.f32 %v1270_v49  ;;  %v3933_v9 = vadd.f32 -0.5, %v251_v59  ;;  %v260_v48 = vld [vmem:[%s5640_s30 + $0x3d0] sm:$0xff]  ;;  %v261_v49 = vld [vmem:[%s5640_s30 + $0x3d8] sm:$0xff] }
  0xbf   : > { %v4595_v60 = vpop.eup %4594  ;;  %v2796_v61 = vadd.f32 0.5, %v2284_v52  ;;  %v2286_v62 = vmul.f32 0.5, %v4593_v55  ;;  %4610 = vtanh.f32 %v1271_v53  ;;  %v1274_v8 = vmul.f32 5.0, %v3932_v63  ;;  %v263_v63 = vld [vmem:[%s5640_s30 + $0x3e8] sm:$0xff] }
  0xc0   : > { %v4597_v2 = vpop.eup %4596  ;;  %3307 = vst [vmem:[%s5687_s17 + $0x308] sm:$0xff] %v2795_v56  ;;  %v2797_v3 = vadd.f32 0.5, %v2285_v57  ;;  %v2287_v4 = vmul.f32 0.5, %v4595_v60  ;;  %4612 = vtanh.f32 %v1272_v54  ;;  %v3934_v13 = vadd.f32 -0.5, %v252_v0  ;;  %v264_v0 = vld [vmem:[%s5640_s30 + $0x3f0] sm:$0xff] }
  0xc1   : > { %3308 = vst [vmem:[%s5687_s17 + $0x310] sm:$0xff] %v2796_v61  ;;  %v2798_v6 = vadd.f32 0.5, %v2286_v62  ;;  %v2288_v7 = vmul.f32 0.5, %v4597_v2  ;;  %v4599_v11 = vpop.eup %4598  ;;  %4614 = vtanh.f32 %v1273_v5  ;;  %v3935_v14 = vadd.f32 -0.5, %v253_v1 }
  0xc2   : > { %3309 = vst [vmem:[%s5687_s17 + $0x318] sm:$0xff] %v2797_v3  ;;  %v2799_v12 = vadd.f32 0.5, %v2287_v4  ;;  %v4601_v18 = vpop.eup %4600  ;;  %v2289_v19 = vmul.f32 0.5, %v4599_v11  ;;  %4616 = vtanh.f32 %v1274_v8  ;;  %v1275_v20 = vmul.f32 5.0, %v3933_v9 }
  0xc3   : > { %3310 = vst [vmem:[%s5687_s17 + $0x320] sm:$0xff] %v2798_v6  ;;  %v2800_v17 = vadd.f32 0.5, %v2288_v7  ;;  %v2290_v21 = vmul.f32 0.5, %v4601_v18  ;;  %v1276_v22 = vmul.f32 5.0, %v3934_v13  ;;  %v1277_v23 = vmul.f32 5.0, %v3935_v14  ;;  %v265_v13 = vld [vmem:[%s5640_s30 + $0x3f8] sm:$0xff] }
  0xc4   : > { %3311 = vst [vmem:[%s5687_s17 + $0x328] sm:$0xff] %v2799_v12  ;;  %v3936_v24 = vadd.f32 -0.5, %v254_v10  ;;  %v4603_v25 = vpop.eup %4602  ;;  %v2801_v26 = vadd.f32 0.5, %v2289_v19  ;;  %4618 = vtanh.f32 %v1275_v20  ;;  %v3937_v27 = vadd.f32 -0.5, %v255_v15 }
  0xc5   : > { %3312 = vst [vmem:[%s5687_s17 + $0x330] sm:$0xff] %v2800_v17  ;;  %v3938_v28 = vadd.f32 -0.5, %v256_v16  ;;  %v4605_v30 = vpop.eup %4604  ;;  %v2802_v31 = vadd.f32 0.5, %v2290_v21  ;;  %v2291_v32 = vmul.f32 0.5, %v4603_v25  ;;  %4620 = vtanh.f32 %v1276_v22  ;;  %v266_v17 = vld [vmem:[%s5640_s30 + $0x400] sm:$0xff] }
  0xc6   : > { %v1278_v33 = vmul.f32 5.0, %v3936_v24  ;;  %v4607_v35 = vpop.eup %4606  ;;  %3313 = vst [vmem:[%s5687_s17 + $0x338] sm:$0xff] %v2801_v26  ;;  %v2292_v36 = vmul.f32 0.5, %v4605_v30  ;;  %4622 = vtanh.f32 %v1277_v23  ;;  %v1279_v37 = vmul.f32 5.0, %v3937_v27  ;;  %v267_v27 = vld [vmem:[%s5640_s30 + $0x408] sm:$0xff] }
  0xc7   : > { %v1280_v38 = vmul.f32 5.0, %v3938_v28  ;;  %3314 = vst [vmem:[%s5687_s17 + $0x340] sm:$0xff] %v2802_v31  ;;  %v2803_v40 = vadd.f32 0.5, %v2291_v32  ;;  %v2293_v41 = vmul.f32 0.5, %v4607_v35  ;;  %v3939_v42 = vadd.f32 -0.5, %v257_v29  ;;  %v268_v32 = vld [vmem:[%s5640_s30 + $0x410] sm:$0xff] }
  0xc8   : > { %v4609_v39 = vpop.eup %4608  ;;  %4624 = vtanh.f32 %v1278_v33  ;;  %v2804_v45 = vadd.f32 0.5, %v2292_v36  ;;  %v3940_v47 = vadd.f32 -0.5, %v258_v34  ;;  %v3941_v57 = vadd.f32 -0.5, %v259_v43  ;;  %v269_v33 = vld [vmem:[%s5640_s30 + $0x418] sm:$0xff] }
  0xc9   : > { %v4611_v44 = vpop.eup %4610  ;;  %v2294_v46 = vmul.f32 0.5, %v4609_v39  ;;  %4626 = vtanh.f32 %v1279_v37  ;;  %3315 = vst [vmem:[%s5687_s17 + $0x348] sm:$0xff] %v2803_v40  ;;  %v2805_v51 = vadd.f32 0.5, %v2293_v41  ;;  %v1281_v53 = vmul.f32 5.0, %v3939_v42  ;;  %v270_v42 = vld [vmem:[%s5640_s30 + $0x420] sm:$0xff] }
  0xca   : > { %v4613_v50 = vpop.eup %4612  ;;  %v2295_v52 = vmul.f32 0.5, %v4611_v44  ;;  %4628 = vtanh.f32 %v1280_v38  ;;  %3316 = vst [vmem:[%s5687_s17 + $0x350] sm:$0xff] %v2804_v45  ;;  %v1282_v56 = vmul.f32 5.0, %v3940_v47  ;;  %v3942_v61 = vadd.f32 -0.5, %v260_v48  ;;  %v271_v47 = vld [vmem:[%s5640_s30 + $0x428] sm:$0xff]  ;;  %v272_v48 = vld [vmem:[%s5640_s30 + $0x430] sm:$0xff] }
  0xcb   : > { %v2806_v54 = vadd.f32 0.5, %v2294_v46  ;;  %v2296_v55 = vmul.f32 0.5, %v4613_v50  ;;  %v4615_v59 = vpop.eup %4614  ;;  %3317 = vst [vmem:[%s5687_s17 + $0x358] sm:$0xff] %v2805_v51  ;;  %4630 = vtanh.f32 %v1281_v53  ;;  %v3943_v62 = vadd.f32 -0.5, %v261_v49 }
  0xcc   : > { %v2807_v60 = vadd.f32 0.5, %v2295_v52  ;;  %v4617_v1 = vpop.eup %4616  ;;  %v2297_v3 = vmul.f32 0.5, %v4615_v59  ;;  %4632 = vtanh.f32 %v1282_v56  ;;  %v1283_v4 = vmul.f32 5.0, %v3941_v57 }
  0xcd   : > { %3318 = vst [vmem:[%s5687_s17 + $0x360] sm:$0xff] %v2806_v54  ;;  %v2808_v2 = vadd.f32 0.5, %v2296_v55  ;;  %v2298_v5 = vmul.f32 0.5, %v4617_v1  ;;  %v1284_v6 = vmul.f32 5.0, %v3942_v61  ;;  %v1285_v7 = vmul.f32 5.0, %v3943_v62  ;;  %v273_v61 = vld [vmem:[%s5640_s30 + $0x438] sm:$0xff] }
  0xce   : > { %3319 = vst [vmem:[%s5687_s17 + $0x368] sm:$0xff] %v2807_v60  ;;  %v3944_v8 = vadd.f32 -0.5, %v262_v58  ;;  %v4619_v9 = vpop.eup %4618  ;;  %v2809_v10 = vadd.f32 0.5, %v2297_v3  ;;  %4634 = vtanh.f32 %v1283_v4  ;;  %v3945_v11 = vadd.f32 -0.5, %v263_v63 }
  0xcf   : > { %3320 = vst [vmem:[%s5687_s17 + $0x370] sm:$0xff] %v2808_v2  ;;  %v3946_v12 = vadd.f32 -0.5, %v264_v0  ;;  %v4621_v14 = vpop.eup %4620  ;;  %v2810_v15 = vadd.f32 0.5, %v2298_v5  ;;  %v2299_v16 = vmul.f32 0.5, %v4619_v9  ;;  %4636 = vtanh.f32 %v1284_v6  ;;  %v274_v2 = vld [vmem:[%s5640_s30 + $0x440] sm:$0xff] }
  0xd0   : > { %v1286_v18 = vmul.f32 5.0, %v3944_v8  ;;  %v4623_v19 = vpop.eup %4622  ;;  %3321 = vst [vmem:[%s5687_s17 + $0x378] sm:$0xff] %v2809_v10  ;;  %v2300_v20 = vmul.f32 0.5, %v4621_v14  ;;  %4638 = vtanh.f32 %v1285_v7  ;;  %v1287_v21 = vmul.f32 5.0, %v3945_v11  ;;  %v275_v11 = vld [vmem:[%s5640_s30 + $0x448] sm:$0xff] }
  0xd1   : > { %v1288_v22 = vmul.f32 5.0, %v3946_v12  ;;  %3322 = vst [vmem:[%s5687_s17 + $0x380] sm:$0xff] %v2810_v15  ;;  %v2811_v24 = vadd.f32 0.5, %v2299_v16  ;;  %v2301_v25 = vmul.f32 0.5, %v4623_v19  ;;  %v3947_v26 = vadd.f32 -0.5, %v265_v13  ;;  %v276_v16 = vld [vmem:[%s5640_s30 + $0x450] sm:$0xff] }
  0xd2   : > { %v4625_v23 = vpop.eup %4624  ;;  %4640 = vtanh.f32 %v1286_v18  ;;  %v2812_v29 = vadd.f32 0.5, %v2300_v20  ;;  %v3948_v31 = vadd.f32 -0.5, %v266_v17  ;;  %v3949_v41 = vadd.f32 -0.5, %v267_v27  ;;  %v277_v18 = vld [vmem:[%s5640_s30 + $0x458] sm:$0xff] }
  0xd3   : > { %v4627_v28 = vpop.eup %4626  ;;  %v2302_v30 = vmul.f32 0.5, %v4625_v23  ;;  %4642 = vtanh.f32 %v1287_v21  ;;  %3323 = vst [vmem:[%s5687_s17 + $0x388] sm:$0xff] %v2811_v24  ;;  %v2813_v35 = vadd.f32 0.5, %v2301_v25  ;;  %v1289_v37 = vmul.f32 5.0, %v3947_v26  ;;  %v278_v26 = vld [vmem:[%s5640_s30 + $0x460] sm:$0xff] }
  0xd4   : > { %v4629_v34 = vpop.eup %4628  ;;  %v2303_v36 = vmul.f32 0.5, %v4627_v28  ;;  %4644 = vtanh.f32 %v1288_v22  ;;  %3324 = vst [vmem:[%s5687_s17 + $0x390] sm:$0xff] %v2812_v29  ;;  %v1290_v40 = vmul.f32 5.0, %v3948_v31  ;;  %v3950_v45 = vadd.f32 -0.5, %v268_v32  ;;  %v279_v31 = vld [vmem:[%s5640_s30 + $0x468] sm:$0xff]  ;;  %v280_v32 = vld [vmem:[%s5640_s30 + $0x470] sm:$0xff] }
  0xd5   : > { %v2814_v38 = vadd.f32 0.5, %v2302_v30  ;;  %v2304_v39 = vmul.f32 0.5, %v4629_v34  ;;  %v4631_v43 = vpop.eup %4630  ;;  %3325 = vst [vmem:[%s5687_s17 + $0x398] sm:$0xff] %v2813_v35  ;;  %4646 = vtanh.f32 %v1289_v37  ;;  %v3951_v46 = vadd.f32 -0.5, %v269_v33 }
  0xd6   : > { %v2815_v44 = vadd.f32 0.5, %v2303_v36  ;;  %v4633_v49 = vpop.eup %4632  ;;  %v2305_v51 = vmul.f32 0.5, %v4631_v43  ;;  %4648 = vtanh.f32 %v1290_v40  ;;  %v1291_v52 = vmul.f32 5.0, %v3949_v41 }
  0xd7   : > { %3326 = vst [vmem:[%s5687_s17 + $0x3a0] sm:$0xff] %v2814_v38  ;;  %v2816_v50 = vadd.f32 0.5, %v2304_v39  ;;  %v2306_v53 = vmul.f32 0.5, %v4633_v49  ;;  %v1292_v54 = vmul.f32 5.0, %v3950_v45  ;;  %v1293_v55 = vmul.f32 5.0, %v3951_v46  ;;  %v281_v45 = vld [vmem:[%s5640_s30 + $0x478] sm:$0xff] }
  0xd8   : > { %3327 = vst [vmem:[%s5687_s17 + $0x3a8] sm:$0xff] %v2815_v44  ;;  %v3952_v56 = vadd.f32 -0.5, %v270_v42  ;;  %v4635_v57 = vpop.eup %4634  ;;  %v2817_v58 = vadd.f32 0.5, %v2305_v51  ;;  %4650 = vtanh.f32 %v1291_v52  ;;  %v3953_v59 = vadd.f32 -0.5, %v271_v47 }
  0xd9   : > { %3328 = vst [vmem:[%s5687_s17 + $0x3b0] sm:$0xff] %v2816_v50  ;;  %v3954_v60 = vadd.f32 -0.5, %v272_v48  ;;  %v4637_v62 = vpop.eup %4636  ;;  %v2818_v63 = vadd.f32 0.5, %v2306_v53  ;;  %v2307_v0 = vmul.f32 0.5, %v4635_v57  ;;  %4652 = vtanh.f32 %v1292_v54  ;;  %v282_v50 = vld [vmem:[%s5640_s30 + $0x480] sm:$0xff] }
  0xda   : > { %v1294_v1 = vmul.f32 5.0, %v3952_v56  ;;  %v4639_v3 = vpop.eup %4638  ;;  %3329 = vst [vmem:[%s5687_s17 + $0x3b8] sm:$0xff] %v2817_v58  ;;  %v2308_v4 = vmul.f32 0.5, %v4637_v62  ;;  %4654 = vtanh.f32 %v1293_v55  ;;  %v1295_v5 = vmul.f32 5.0, %v3953_v59  ;;  %v283_v59 = vld [vmem:[%s5640_s30 + $0x488] sm:$0xff] }
  0xdb   : > { %v1296_v6 = vmul.f32 5.0, %v3954_v60  ;;  %3330 = vst [vmem:[%s5687_s17 + $0x3c0] sm:$0xff] %v2818_v63  ;;  %v2819_v8 = vadd.f32 0.5, %v2307_v0  ;;  %v2309_v9 = vmul.f32 0.5, %v4639_v3  ;;  %v3955_v10 = vadd.f32 -0.5, %v273_v61  ;;  %v284_v0 = vld [vmem:[%s5640_s30 + $0x490] sm:$0xff] }
  0xdc   : > { %v4641_v7 = vpop.eup %4640  ;;  %4656 = vtanh.f32 %v1294_v1  ;;  %v2820_v13 = vadd.f32 0.5, %v2308_v4  ;;  %v3956_v15 = vadd.f32 -0.5, %v274_v2  ;;  %v3957_v25 = vadd.f32 -0.5, %v275_v11  ;;  %v285_v1 = vld [vmem:[%s5640_s30 + $0x498] sm:$0xff] }
  0xdd   : > { %v4643_v12 = vpop.eup %4642  ;;  %v2310_v14 = vmul.f32 0.5, %v4641_v7  ;;  %4658 = vtanh.f32 %v1295_v5  ;;  %3331 = vst [vmem:[%s5687_s17 + $0x3c8] sm:$0xff] %v2819_v8  ;;  %v2821_v19 = vadd.f32 0.5, %v2309_v9  ;;  %v1297_v21 = vmul.f32 5.0, %v3955_v10  ;;  %v286_v10 = vld [vmem:[%s5640_s30 + $0x4a0] sm:$0xff] }
  0xde   : > { %v4645_v17 = vpop.eup %4644  ;;  %v2311_v20 = vmul.f32 0.5, %v4643_v12  ;;  %4660 = vtanh.f32 %v1296_v6  ;;  %3332 = vst [vmem:[%s5687_s17 + $0x3d0] sm:$0xff] %v2820_v13  ;;  %v1298_v24 = vmul.f32 5.0, %v3956_v15  ;;  %v3958_v29 = vadd.f32 -0.5, %v276_v16  ;;  %v287_v15 = vld [vmem:[%s5640_s30 + $0x4a8] sm:$0xff]  ;;  %v288_v16 = vld [vmem:[%s5640_s30 + $0x4b0] sm:$0xff] }
  0xdf   : > { %v2822_v22 = vadd.f32 0.5, %v2310_v14  ;;  %v2312_v23 = vmul.f32 0.5, %v4645_v17  ;;  %v4647_v27 = vpop.eup %4646  ;;  %3333 = vst [vmem:[%s5687_s17 + $0x3d8] sm:$0xff] %v2821_v19  ;;  %4662 = vtanh.f32 %v1297_v21  ;;  %v3959_v30 = vadd.f32 -0.5, %v277_v18 }
  0xe0   : > { %v2823_v28 = vadd.f32 0.5, %v2311_v20  ;;  %v4649_v33 = vpop.eup %4648  ;;  %v2313_v35 = vmul.f32 0.5, %v4647_v27  ;;  %4664 = vtanh.f32 %v1298_v24  ;;  %v1299_v36 = vmul.f32 5.0, %v3957_v25 }
  0xe1   : > { %3334 = vst [vmem:[%s5687_s17 + $0x3e0] sm:$0xff] %v2822_v22  ;;  %v2824_v34 = vadd.f32 0.5, %v2312_v23  ;;  %v2314_v37 = vmul.f32 0.5, %v4649_v33  ;;  %v1300_v38 = vmul.f32 5.0, %v3958_v29  ;;  %v1301_v39 = vmul.f32 5.0, %v3959_v30  ;;  %v289_v29 = vld [vmem:[%s5640_s30 + $0x4b8] sm:$0xff] }
  0xe2   : > { %3335 = vst [vmem:[%s5687_s17 + $0x3e8] sm:$0xff] %v2823_v28  ;;  %v3960_v40 = vadd.f32 -0.5, %v278_v26  ;;  %v4651_v41 = vpop.eup %4650  ;;  %v2825_v42 = vadd.f32 0.5, %v2313_v35  ;;  %4666 = vtanh.f32 %v1299_v36  ;;  %v3961_v43 = vadd.f32 -0.5, %v279_v31 }
  0xe3   : > { %3336 = vst [vmem:[%s5687_s17 + $0x3f0] sm:$0xff] %v2824_v34  ;;  %v3962_v44 = vadd.f32 -0.5, %v280_v32  ;;  %v4653_v46 = vpop.eup %4652  ;;  %v2826_v47 = vadd.f32 0.5, %v2314_v37  ;;  %v2315_v48 = vmul.f32 0.5, %v4651_v41  ;;  %4668 = vtanh.f32 %v1300_v38  ;;  %v290_v34 = vld [vmem:[%s5640_s30 + $0x4c0] sm:$0xff] }
  0xe4   : > { %v1302_v49 = vmul.f32 5.0, %v3960_v40  ;;  %v4655_v51 = vpop.eup %4654  ;;  %3337 = vst [vmem:[%s5687_s17 + $0x3f8] sm:$0xff] %v2825_v42  ;;  %v2316_v52 = vmul.f32 0.5, %v4653_v46  ;;  %4670 = vtanh.f32 %v1301_v39  ;;  %v1303_v53 = vmul.f32 5.0, %v3961_v43  ;;  %v291_v43 = vld [vmem:[%s5640_s30 + $0x4c8] sm:$0xff] }
  0xe5   : > { %v1304_v54 = vmul.f32 5.0, %v3962_v44  ;;  %3338 = vst [vmem:[%s5687_s17 + $0x400] sm:$0xff] %v2826_v47  ;;  %v2827_v56 = vadd.f32 0.5, %v2315_v48  ;;  %v2317_v57 = vmul.f32 0.5, %v4655_v51  ;;  %v3963_v58 = vadd.f32 -0.5, %v281_v45  ;;  %v292_v48 = vld [vmem:[%s5640_s30 + $0x4d0] sm:$0xff] }
  0xe6   : > { %v4657_v55 = vpop.eup %4656  ;;  %4672 = vtanh.f32 %v1302_v49  ;;  %v2828_v61 = vadd.f32 0.5, %v2316_v52  ;;  %v3964_v63 = vadd.f32 -0.5, %v282_v50  ;;  %v3965_v9 = vadd.f32 -0.5, %v283_v59  ;;  %v293_v49 = vld [vmem:[%s5640_s30 + $0x4d8] sm:$0xff] }
  0xe7   : > { %v4659_v60 = vpop.eup %4658  ;;  %v2318_v62 = vmul.f32 0.5, %v4657_v55  ;;  %4674 = vtanh.f32 %v1303_v53  ;;  %3339 = vst [vmem:[%s5687_s17 + $0x408] sm:$0xff] %v2827_v56  ;;  %v2829_v3 = vadd.f32 0.5, %v2317_v57  ;;  %v1305_v5 = vmul.f32 5.0, %v3963_v58  ;;  %v294_v58 = vld [vmem:[%s5640_s30 + $0x4e0] sm:$0xff] }
  0xe8   : > { %v4661_v2 = vpop.eup %4660  ;;  %v2319_v4 = vmul.f32 0.5, %v4659_v60  ;;  %4676 = vtanh.f32 %v1304_v54  ;;  %3340 = vst [vmem:[%s5687_s17 + $0x410] sm:$0xff] %v2828_v61  ;;  %v1306_v8 = vmul.f32 5.0, %v3964_v63  ;;  %v3966_v13 = vadd.f32 -0.5, %v284_v0  ;;  %v295_v63 = vld [vmem:[%s5640_s30 + $0x4e8] sm:$0xff]  ;;  %v296_v0 = vld [vmem:[%s5640_s30 + $0x4f0] sm:$0xff] }
  0xe9   : > { %v2830_v6 = vadd.f32 0.5, %v2318_v62  ;;  %v2320_v7 = vmul.f32 0.5, %v4661_v2  ;;  %v4663_v11 = vpop.eup %4662  ;;  %3341 = vst [vmem:[%s5687_s17 + $0x418] sm:$0xff] %v2829_v3  ;;  %4678 = vtanh.f32 %v1305_v5  ;;  %v3967_v14 = vadd.f32 -0.5, %v285_v1 }
  0xea   : > { %v2831_v12 = vadd.f32 0.5, %v2319_v4  ;;  %v4665_v18 = vpop.eup %4664  ;;  %v2321_v19 = vmul.f32 0.5, %v4663_v11  ;;  %4680 = vtanh.f32 %v1306_v8  ;;  %v1307_v20 = vmul.f32 5.0, %v3965_v9 }
  0xeb   : > { %3342 = vst [vmem:[%s5687_s17 + $0x420] sm:$0xff] %v2830_v6  ;;  %v2832_v17 = vadd.f32 0.5, %v2320_v7  ;;  %v2322_v21 = vmul.f32 0.5, %v4665_v18  ;;  %v1308_v22 = vmul.f32 5.0, %v3966_v13  ;;  %v1309_v23 = vmul.f32 5.0, %v3967_v14  ;;  %v297_v13 = vld [vmem:[%s5640_s30 + $0x4f8] sm:$0xff] }
  0xec   : > { %3343 = vst [vmem:[%s5687_s17 + $0x428] sm:$0xff] %v2831_v12  ;;  %v3968_v24 = vadd.f32 -0.5, %v286_v10  ;;  %v4667_v25 = vpop.eup %4666  ;;  %v2833_v26 = vadd.f32 0.5, %v2321_v19  ;;  %4682 = vtanh.f32 %v1307_v20  ;;  %v3969_v27 = vadd.f32 -0.5, %v287_v15 }
  0xed   : > { %3344 = vst [vmem:[%s5687_s17 + $0x430] sm:$0xff] %v2832_v17  ;;  %v3970_v28 = vadd.f32 -0.5, %v288_v16  ;;  %v4669_v30 = vpop.eup %4668  ;;  %v2834_v31 = vadd.f32 0.5, %v2322_v21  ;;  %v2323_v32 = vmul.f32 0.5, %v4667_v25  ;;  %4684 = vtanh.f32 %v1308_v22  ;;  %v298_v17 = vld [vmem:[%s5640_s30 + $0x500] sm:$0xff] }
  0xee   : > { %v1310_v33 = vmul.f32 5.0, %v3968_v24  ;;  %v4671_v35 = vpop.eup %4670  ;;  %3345 = vst [vmem:[%s5687_s17 + $0x438] sm:$0xff] %v2833_v26  ;;  %v2324_v36 = vmul.f32 0.5, %v4669_v30  ;;  %4686 = vtanh.f32 %v1309_v23  ;;  %v1311_v37 = vmul.f32 5.0, %v3969_v27  ;;  %v299_v27 = vld [vmem:[%s5640_s30 + $0x508] sm:$0xff] }
  0xef   : > { %v1312_v38 = vmul.f32 5.0, %v3970_v28  ;;  %3346 = vst [vmem:[%s5687_s17 + $0x440] sm:$0xff] %v2834_v31  ;;  %v2835_v40 = vadd.f32 0.5, %v2323_v32  ;;  %v2325_v41 = vmul.f32 0.5, %v4671_v35  ;;  %v3971_v42 = vadd.f32 -0.5, %v289_v29  ;;  %v300_v32 = vld [vmem:[%s5640_s30 + $0x510] sm:$0xff] }
  0xf0   : > { %v4673_v39 = vpop.eup %4672  ;;  %4688 = vtanh.f32 %v1310_v33  ;;  %v2836_v45 = vadd.f32 0.5, %v2324_v36  ;;  %v3972_v47 = vadd.f32 -0.5, %v290_v34  ;;  %v3973_v57 = vadd.f32 -0.5, %v291_v43  ;;  %v301_v33 = vld [vmem:[%s5640_s30 + $0x518] sm:$0xff] }
  0xf1   : > { %v4675_v44 = vpop.eup %4674  ;;  %v2326_v46 = vmul.f32 0.5, %v4673_v39  ;;  %4690 = vtanh.f32 %v1311_v37  ;;  %3347 = vst [vmem:[%s5687_s17 + $0x448] sm:$0xff] %v2835_v40  ;;  %v2837_v51 = vadd.f32 0.5, %v2325_v41  ;;  %v1313_v53 = vmul.f32 5.0, %v3971_v42  ;;  %v302_v42 = vld [vmem:[%s5640_s30 + $0x520] sm:$0xff] }
  0xf2   : > { %v4677_v50 = vpop.eup %4676  ;;  %v2327_v52 = vmul.f32 0.5, %v4675_v44  ;;  %4692 = vtanh.f32 %v1312_v38  ;;  %3348 = vst [vmem:[%s5687_s17 + $0x450] sm:$0xff] %v2836_v45  ;;  %v1314_v56 = vmul.f32 5.0, %v3972_v47  ;;  %v3974_v61 = vadd.f32 -0.5, %v292_v48  ;;  %v303_v47 = vld [vmem:[%s5640_s30 + $0x528] sm:$0xff]  ;;  %v304_v48 = vld [vmem:[%s5640_s30 + $0x530] sm:$0xff] }
  0xf3   : > { %v2838_v54 = vadd.f32 0.5, %v2326_v46  ;;  %v2328_v55 = vmul.f32 0.5, %v4677_v50  ;;  %v4679_v59 = vpop.eup %4678  ;;  %3349 = vst [vmem:[%s5687_s17 + $0x458] sm:$0xff] %v2837_v51  ;;  %4694 = vtanh.f32 %v1313_v53  ;;  %v3975_v62 = vadd.f32 -0.5, %v293_v49 }
  0xf4   : > { %v2839_v60 = vadd.f32 0.5, %v2327_v52  ;;  %v4681_v1 = vpop.eup %4680  ;;  %v2329_v3 = vmul.f32 0.5, %v4679_v59  ;;  %4696 = vtanh.f32 %v1314_v56  ;;  %v1315_v4 = vmul.f32 5.0, %v3973_v57 }
  0xf5   : > { %3350 = vst [vmem:[%s5687_s17 + $0x460] sm:$0xff] %v2838_v54  ;;  %v2840_v2 = vadd.f32 0.5, %v2328_v55  ;;  %v2330_v5 = vmul.f32 0.5, %v4681_v1  ;;  %v1316_v6 = vmul.f32 5.0, %v3974_v61  ;;  %v1317_v7 = vmul.f32 5.0, %v3975_v62  ;;  %v305_v61 = vld [vmem:[%s5640_s30 + $0x538] sm:$0xff] }
  0xf6   : > { %3351 = vst [vmem:[%s5687_s17 + $0x468] sm:$0xff] %v2839_v60  ;;  %v3976_v8 = vadd.f32 -0.5, %v294_v58  ;;  %v4683_v9 = vpop.eup %4682  ;;  %v2841_v10 = vadd.f32 0.5, %v2329_v3  ;;  %4698 = vtanh.f32 %v1315_v4  ;;  %v3977_v11 = vadd.f32 -0.5, %v295_v63 }
  0xf7   : > { %3352 = vst [vmem:[%s5687_s17 + $0x470] sm:$0xff] %v2840_v2  ;;  %v3978_v12 = vadd.f32 -0.5, %v296_v0  ;;  %v4685_v14 = vpop.eup %4684  ;;  %v2842_v15 = vadd.f32 0.5, %v2330_v5  ;;  %v2331_v16 = vmul.f32 0.5, %v4683_v9  ;;  %4700 = vtanh.f32 %v1316_v6  ;;  %v306_v2 = vld [vmem:[%s5640_s30 + $0x540] sm:$0xff] }
  0xf8   : > { %v1318_v18 = vmul.f32 5.0, %v3976_v8  ;;  %v4687_v19 = vpop.eup %4686  ;;  %3353 = vst [vmem:[%s5687_s17 + $0x478] sm:$0xff] %v2841_v10  ;;  %v2332_v20 = vmul.f32 0.5, %v4685_v14  ;;  %4702 = vtanh.f32 %v1317_v7  ;;  %v1319_v21 = vmul.f32 5.0, %v3977_v11  ;;  %v307_v11 = vld [vmem:[%s5640_s30 + $0x548] sm:$0xff] }
  0xf9   : > { %v1320_v22 = vmul.f32 5.0, %v3978_v12  ;;  %3354 = vst [vmem:[%s5687_s17 + $0x480] sm:$0xff] %v2842_v15  ;;  %v2843_v24 = vadd.f32 0.5, %v2331_v16  ;;  %v2333_v25 = vmul.f32 0.5, %v4687_v19  ;;  %v3979_v26 = vadd.f32 -0.5, %v297_v13  ;;  %v308_v16 = vld [vmem:[%s5640_s30 + $0x550] sm:$0xff] }
  0xfa   : > { %v4689_v23 = vpop.eup %4688  ;;  %4704 = vtanh.f32 %v1318_v18  ;;  %v2844_v29 = vadd.f32 0.5, %v2332_v20  ;;  %v3980_v31 = vadd.f32 -0.5, %v298_v17  ;;  %v3981_v41 = vadd.f32 -0.5, %v299_v27  ;;  %v309_v18 = vld [vmem:[%s5640_s30 + $0x558] sm:$0xff] }
  0xfb   : > { %v4691_v28 = vpop.eup %4690  ;;  %v2334_v30 = vmul.f32 0.5, %v4689_v23  ;;  %4706 = vtanh.f32 %v1319_v21  ;;  %3355 = vst [vmem:[%s5687_s17 + $0x488] sm:$0xff] %v2843_v24  ;;  %v2845_v35 = vadd.f32 0.5, %v2333_v25  ;;  %v1321_v37 = vmul.f32 5.0, %v3979_v26  ;;  %v310_v26 = vld [vmem:[%s5640_s30 + $0x560] sm:$0xff] }
  0xfc   : > { %v4693_v34 = vpop.eup %4692  ;;  %v2335_v36 = vmul.f32 0.5, %v4691_v28  ;;  %4708 = vtanh.f32 %v1320_v22  ;;  %3356 = vst [vmem:[%s5687_s17 + $0x490] sm:$0xff] %v2844_v29  ;;  %v1322_v40 = vmul.f32 5.0, %v3980_v31  ;;  %v3982_v45 = vadd.f32 -0.5, %v300_v32  ;;  %v311_v31 = vld [vmem:[%s5640_s30 + $0x568] sm:$0xff]  ;;  %v312_v32 = vld [vmem:[%s5640_s30 + $0x570] sm:$0xff] }
  0xfd   : > { %v2846_v38 = vadd.f32 0.5, %v2334_v30  ;;  %v2336_v39 = vmul.f32 0.5, %v4693_v34  ;;  %v4695_v43 = vpop.eup %4694  ;;  %3357 = vst [vmem:[%s5687_s17 + $0x498] sm:$0xff] %v2845_v35  ;;  %4710 = vtanh.f32 %v1321_v37  ;;  %v3983_v46 = vadd.f32 -0.5, %v301_v33 }
  0xfe   : > { %v2847_v44 = vadd.f32 0.5, %v2335_v36  ;;  %v4697_v49 = vpop.eup %4696  ;;  %v2337_v51 = vmul.f32 0.5, %v4695_v43  ;;  %4712 = vtanh.f32 %v1322_v40  ;;  %v1323_v52 = vmul.f32 5.0, %v3981_v41 }
  0xff   : > { %3358 = vst [vmem:[%s5687_s17 + $0x4a0] sm:$0xff] %v2846_v38  ;;  %v2848_v50 = vadd.f32 0.5, %v2336_v39  ;;  %v2338_v53 = vmul.f32 0.5, %v4697_v49  ;;  %v1324_v54 = vmul.f32 5.0, %v3982_v45  ;;  %v1325_v55 = vmul.f32 5.0, %v3983_v46  ;;  %v313_v45 = vld [vmem:[%s5640_s30 + $0x578] sm:$0xff] }
 0x100   : > { %3359 = vst [vmem:[%s5687_s17 + $0x4a8] sm:$0xff] %v2847_v44  ;;  %v3984_v56 = vadd.f32 -0.5, %v302_v42  ;;  %v4699_v57 = vpop.eup %4698  ;;  %v2849_v58 = vadd.f32 0.5, %v2337_v51  ;;  %4714 = vtanh.f32 %v1323_v52  ;;  %v3985_v59 = vadd.f32 -0.5, %v303_v47 }
 0x101   : > { %3360 = vst [vmem:[%s5687_s17 + $0x4b0] sm:$0xff] %v2848_v50  ;;  %v3986_v60 = vadd.f32 -0.5, %v304_v48  ;;  %v4701_v62 = vpop.eup %4700  ;;  %v2850_v63 = vadd.f32 0.5, %v2338_v53  ;;  %v2339_v0 = vmul.f32 0.5, %v4699_v57  ;;  %4716 = vtanh.f32 %v1324_v54  ;;  %v314_v50 = vld [vmem:[%s5640_s30 + $0x580] sm:$0xff] }
 0x102   : > { %v1326_v1 = vmul.f32 5.0, %v3984_v56  ;;  %v4703_v3 = vpop.eup %4702  ;;  %3361 = vst [vmem:[%s5687_s17 + $0x4b8] sm:$0xff] %v2849_v58  ;;  %v2340_v4 = vmul.f32 0.5, %v4701_v62  ;;  %4718 = vtanh.f32 %v1325_v55  ;;  %v1327_v5 = vmul.f32 5.0, %v3985_v59  ;;  %v315_v59 = vld [vmem:[%s5640_s30 + $0x588] sm:$0xff] }
 0x103   : > { %v1328_v6 = vmul.f32 5.0, %v3986_v60  ;;  %3362 = vst [vmem:[%s5687_s17 + $0x4c0] sm:$0xff] %v2850_v63  ;;  %v2851_v8 = vadd.f32 0.5, %v2339_v0  ;;  %v2341_v9 = vmul.f32 0.5, %v4703_v3  ;;  %v3987_v10 = vadd.f32 -0.5, %v305_v61  ;;  %v316_v0 = vld [vmem:[%s5640_s30 + $0x590] sm:$0xff] }
 0x104   : > { %v4705_v7 = vpop.eup %4704  ;;  %4720 = vtanh.f32 %v1326_v1  ;;  %v2852_v13 = vadd.f32 0.5, %v2340_v4  ;;  %v3988_v15 = vadd.f32 -0.5, %v306_v2  ;;  %v3989_v25 = vadd.f32 -0.5, %v307_v11  ;;  %v317_v1 = vld [vmem:[%s5640_s30 + $0x598] sm:$0xff] }
 0x105   : > { %v4707_v12 = vpop.eup %4706  ;;  %v2342_v14 = vmul.f32 0.5, %v4705_v7  ;;  %4722 = vtanh.f32 %v1327_v5  ;;  %3363 = vst [vmem:[%s5687_s17 + $0x4c8] sm:$0xff] %v2851_v8  ;;  %v2853_v19 = vadd.f32 0.5, %v2341_v9  ;;  %v1329_v21 = vmul.f32 5.0, %v3987_v10  ;;  %v318_v10 = vld [vmem:[%s5640_s30 + $0x5a0] sm:$0xff] }
 0x106   : > { %v4709_v17 = vpop.eup %4708  ;;  %v2343_v20 = vmul.f32 0.5, %v4707_v12  ;;  %4724 = vtanh.f32 %v1328_v6  ;;  %3364 = vst [vmem:[%s5687_s17 + $0x4d0] sm:$0xff] %v2852_v13  ;;  %v1330_v24 = vmul.f32 5.0, %v3988_v15  ;;  %v3990_v29 = vadd.f32 -0.5, %v308_v16  ;;  %v319_v15 = vld [vmem:[%s5640_s30 + $0x5a8] sm:$0xff]  ;;  %v320_v16 = vld [vmem:[%s5640_s30 + $0x5b0] sm:$0xff] }
 0x107   : > { %v2854_v22 = vadd.f32 0.5, %v2342_v14  ;;  %v2344_v23 = vmul.f32 0.5, %v4709_v17  ;;  %v4711_v27 = vpop.eup %4710  ;;  %3365 = vst [vmem:[%s5687_s17 + $0x4d8] sm:$0xff] %v2853_v19  ;;  %4726 = vtanh.f32 %v1329_v21  ;;  %v3991_v30 = vadd.f32 -0.5, %v309_v18 }
 0x108   : > { %v2855_v28 = vadd.f32 0.5, %v2343_v20  ;;  %v4713_v33 = vpop.eup %4712  ;;  %v2345_v35 = vmul.f32 0.5, %v4711_v27  ;;  %4728 = vtanh.f32 %v1330_v24  ;;  %v1331_v36 = vmul.f32 5.0, %v3989_v25 }
 0x109   : > { %3366 = vst [vmem:[%s5687_s17 + $0x4e0] sm:$0xff] %v2854_v22  ;;  %v2856_v34 = vadd.f32 0.5, %v2344_v23  ;;  %v2346_v37 = vmul.f32 0.5, %v4713_v33  ;;  %v1332_v38 = vmul.f32 5.0, %v3990_v29  ;;  %v1333_v39 = vmul.f32 5.0, %v3991_v30  ;;  %v321_v29 = vld [vmem:[%s5640_s30 + $0x5b8] sm:$0xff] }
 0x10a   : > { %3367 = vst [vmem:[%s5687_s17 + $0x4e8] sm:$0xff] %v2855_v28  ;;  %v3992_v40 = vadd.f32 -0.5, %v310_v26  ;;  %v4715_v41 = vpop.eup %4714  ;;  %v2857_v42 = vadd.f32 0.5, %v2345_v35  ;;  %4730 = vtanh.f32 %v1331_v36  ;;  %v3993_v43 = vadd.f32 -0.5, %v311_v31 }
 0x10b   : > { %3368 = vst [vmem:[%s5687_s17 + $0x4f0] sm:$0xff] %v2856_v34  ;;  %v3994_v44 = vadd.f32 -0.5, %v312_v32  ;;  %v4717_v46 = vpop.eup %4716  ;;  %v2858_v47 = vadd.f32 0.5, %v2346_v37  ;;  %v2347_v48 = vmul.f32 0.5, %v4715_v41  ;;  %4732 = vtanh.f32 %v1332_v38  ;;  %v322_v34 = vld [vmem:[%s5640_s30 + $0x5c0] sm:$0xff] }
 0x10c   : > { %v1334_v49 = vmul.f32 5.0, %v3992_v40  ;;  %v4719_v51 = vpop.eup %4718  ;;  %3369 = vst [vmem:[%s5687_s17 + $0x4f8] sm:$0xff] %v2857_v42  ;;  %v2348_v52 = vmul.f32 0.5, %v4717_v46  ;;  %4734 = vtanh.f32 %v1333_v39  ;;  %v1335_v53 = vmul.f32 5.0, %v3993_v43  ;;  %v323_v43 = vld [vmem:[%s5640_s30 + $0x5c8] sm:$0xff] }
 0x10d   : > { %v1336_v54 = vmul.f32 5.0, %v3994_v44  ;;  %3370 = vst [vmem:[%s5687_s17 + $0x500] sm:$0xff] %v2858_v47  ;;  %v2859_v56 = vadd.f32 0.5, %v2347_v48  ;;  %v2349_v57 = vmul.f32 0.5, %v4719_v51  ;;  %v3995_v58 = vadd.f32 -0.5, %v313_v45  ;;  %v324_v48 = vld [vmem:[%s5640_s30 + $0x5d0] sm:$0xff] }
 0x10e   : > { %v4721_v55 = vpop.eup %4720  ;;  %4736 = vtanh.f32 %v1334_v49  ;;  %v2860_v61 = vadd.f32 0.5, %v2348_v52  ;;  %v3996_v63 = vadd.f32 -0.5, %v314_v50  ;;  %v3997_v9 = vadd.f32 -0.5, %v315_v59  ;;  %v325_v49 = vld [vmem:[%s5640_s30 + $0x5d8] sm:$0xff] }
 0x10f   : > { %v4723_v60 = vpop.eup %4722  ;;  %v2350_v62 = vmul.f32 0.5, %v4721_v55  ;;  %4738 = vtanh.f32 %v1335_v53  ;;  %3371 = vst [vmem:[%s5687_s17 + $0x508] sm:$0xff] %v2859_v56  ;;  %v2861_v3 = vadd.f32 0.5, %v2349_v57  ;;  %v1337_v5 = vmul.f32 5.0, %v3995_v58  ;;  %v326_v58 = vld [vmem:[%s5640_s30 + $0x5e0] sm:$0xff] }
 0x110   : > { %v4725_v2 = vpop.eup %4724  ;;  %v2351_v4 = vmul.f32 0.5, %v4723_v60  ;;  %4740 = vtanh.f32 %v1336_v54  ;;  %3372 = vst [vmem:[%s5687_s17 + $0x510] sm:$0xff] %v2860_v61  ;;  %v1338_v8 = vmul.f32 5.0, %v3996_v63  ;;  %v3998_v13 = vadd.f32 -0.5, %v316_v0  ;;  %v327_v63 = vld [vmem:[%s5640_s30 + $0x5e8] sm:$0xff]  ;;  %v328_v0 = vld [vmem:[%s5640_s30 + $0x5f0] sm:$0xff] }
 0x111   : > { %v2862_v6 = vadd.f32 0.5, %v2350_v62  ;;  %v2352_v7 = vmul.f32 0.5, %v4725_v2  ;;  %v4727_v11 = vpop.eup %4726  ;;  %3373 = vst [vmem:[%s5687_s17 + $0x518] sm:$0xff] %v2861_v3  ;;  %4742 = vtanh.f32 %v1337_v5  ;;  %v3999_v14 = vadd.f32 -0.5, %v317_v1 }
 0x112   : > { %v2863_v12 = vadd.f32 0.5, %v2351_v4  ;;  %v4729_v18 = vpop.eup %4728  ;;  %v2353_v19 = vmul.f32 0.5, %v4727_v11  ;;  %4744 = vtanh.f32 %v1338_v8  ;;  %v1339_v20 = vmul.f32 5.0, %v3997_v9 }
 0x113   : > { %3374 = vst [vmem:[%s5687_s17 + $0x520] sm:$0xff] %v2862_v6  ;;  %v2864_v17 = vadd.f32 0.5, %v2352_v7  ;;  %v2354_v21 = vmul.f32 0.5, %v4729_v18  ;;  %v1340_v22 = vmul.f32 5.0, %v3998_v13  ;;  %v1341_v23 = vmul.f32 5.0, %v3999_v14  ;;  %v329_v13 = vld [vmem:[%s5640_s30 + $0x5f8] sm:$0xff] }
 0x114   : > { %3375 = vst [vmem:[%s5687_s17 + $0x528] sm:$0xff] %v2863_v12  ;;  %v4000_v24 = vadd.f32 -0.5, %v318_v10  ;;  %v4731_v25 = vpop.eup %4730  ;;  %v2865_v26 = vadd.f32 0.5, %v2353_v19  ;;  %4746 = vtanh.f32 %v1339_v20  ;;  %v4001_v27 = vadd.f32 -0.5, %v319_v15 }
 0x115   : > { %3376 = vst [vmem:[%s5687_s17 + $0x530] sm:$0xff] %v2864_v17  ;;  %v4002_v28 = vadd.f32 -0.5, %v320_v16  ;;  %v4733_v30 = vpop.eup %4732  ;;  %v2866_v31 = vadd.f32 0.5, %v2354_v21  ;;  %v2355_v32 = vmul.f32 0.5, %v4731_v25  ;;  %4748 = vtanh.f32 %v1340_v22  ;;  %v330_v17 = vld [vmem:[%s5640_s30 + $0x600] sm:$0xff] }
 0x116   : > { %v1342_v33 = vmul.f32 5.0, %v4000_v24  ;;  %v4735_v35 = vpop.eup %4734  ;;  %3377 = vst [vmem:[%s5687_s17 + $0x538] sm:$0xff] %v2865_v26  ;;  %v2356_v36 = vmul.f32 0.5, %v4733_v30  ;;  %4750 = vtanh.f32 %v1341_v23  ;;  %v1343_v37 = vmul.f32 5.0, %v4001_v27  ;;  %v331_v27 = vld [vmem:[%s5640_s30 + $0x608] sm:$0xff] }
 0x117   : > { %v1344_v38 = vmul.f32 5.0, %v4002_v28  ;;  %3378 = vst [vmem:[%s5687_s17 + $0x540] sm:$0xff] %v2866_v31  ;;  %v2867_v40 = vadd.f32 0.5, %v2355_v32  ;;  %v2357_v41 = vmul.f32 0.5, %v4735_v35  ;;  %v4003_v42 = vadd.f32 -0.5, %v321_v29  ;;  %v332_v32 = vld [vmem:[%s5640_s30 + $0x610] sm:$0xff] }
 0x118   : > { %v4737_v39 = vpop.eup %4736  ;;  %4752 = vtanh.f32 %v1342_v33  ;;  %v2868_v45 = vadd.f32 0.5, %v2356_v36  ;;  %v4004_v47 = vadd.f32 -0.5, %v322_v34  ;;  %v4005_v57 = vadd.f32 -0.5, %v323_v43  ;;  %v333_v33 = vld [vmem:[%s5640_s30 + $0x618] sm:$0xff] }
 0x119   : > { %v4739_v44 = vpop.eup %4738  ;;  %v2358_v46 = vmul.f32 0.5, %v4737_v39  ;;  %4754 = vtanh.f32 %v1343_v37  ;;  %3379 = vst [vmem:[%s5687_s17 + $0x548] sm:$0xff] %v2867_v40  ;;  %v2869_v51 = vadd.f32 0.5, %v2357_v41  ;;  %v1345_v53 = vmul.f32 5.0, %v4003_v42  ;;  %v334_v42 = vld [vmem:[%s5640_s30 + $0x620] sm:$0xff] }
 0x11a   : > { %v4741_v50 = vpop.eup %4740  ;;  %v2359_v52 = vmul.f32 0.5, %v4739_v44  ;;  %4756 = vtanh.f32 %v1344_v38  ;;  %3380 = vst [vmem:[%s5687_s17 + $0x550] sm:$0xff] %v2868_v45  ;;  %v1346_v56 = vmul.f32 5.0, %v4004_v47  ;;  %v4006_v61 = vadd.f32 -0.5, %v324_v48  ;;  %v335_v47 = vld [vmem:[%s5640_s30 + $0x628] sm:$0xff]  ;;  %v336_v48 = vld [vmem:[%s5640_s30 + $0x630] sm:$0xff] }
 0x11b   : > { %v2870_v54 = vadd.f32 0.5, %v2358_v46  ;;  %v2360_v55 = vmul.f32 0.5, %v4741_v50  ;;  %v4743_v59 = vpop.eup %4742  ;;  %3381 = vst [vmem:[%s5687_s17 + $0x558] sm:$0xff] %v2869_v51  ;;  %4758 = vtanh.f32 %v1345_v53  ;;  %v4007_v62 = vadd.f32 -0.5, %v325_v49 }
 0x11c   : > { %v2871_v60 = vadd.f32 0.5, %v2359_v52  ;;  %v4745_v1 = vpop.eup %4744  ;;  %v2361_v3 = vmul.f32 0.5, %v4743_v59  ;;  %4760 = vtanh.f32 %v1346_v56  ;;  %v1347_v4 = vmul.f32 5.0, %v4005_v57 }
 0x11d   : > { %3382 = vst [vmem:[%s5687_s17 + $0x560] sm:$0xff] %v2870_v54  ;;  %v2872_v2 = vadd.f32 0.5, %v2360_v55  ;;  %v2362_v5 = vmul.f32 0.5, %v4745_v1  ;;  %v1348_v6 = vmul.f32 5.0, %v4006_v61  ;;  %v1349_v7 = vmul.f32 5.0, %v4007_v62  ;;  %v337_v61 = vld [vmem:[%s5640_s30 + $0x638] sm:$0xff] }
 0x11e   : > { %3383 = vst [vmem:[%s5687_s17 + $0x568] sm:$0xff] %v2871_v60  ;;  %v4008_v8 = vadd.f32 -0.5, %v326_v58  ;;  %v4747_v9 = vpop.eup %4746  ;;  %v2873_v10 = vadd.f32 0.5, %v2361_v3  ;;  %4762 = vtanh.f32 %v1347_v4  ;;  %v4009_v11 = vadd.f32 -0.5, %v327_v63 }
 0x11f   : > { %3384 = vst [vmem:[%s5687_s17 + $0x570] sm:$0xff] %v2872_v2  ;;  %v4010_v12 = vadd.f32 -0.5, %v328_v0  ;;  %v4749_v14 = vpop.eup %4748  ;;  %v2874_v15 = vadd.f32 0.5, %v2362_v5  ;;  %v2363_v16 = vmul.f32 0.5, %v4747_v9  ;;  %4764 = vtanh.f32 %v1348_v6  ;;  %v338_v2 = vld [vmem:[%s5640_s30 + $0x640] sm:$0xff] }
 0x120   : > { %v1350_v18 = vmul.f32 5.0, %v4008_v8  ;;  %v4751_v19 = vpop.eup %4750  ;;  %3385 = vst [vmem:[%s5687_s17 + $0x578] sm:$0xff] %v2873_v10  ;;  %v2364_v20 = vmul.f32 0.5, %v4749_v14  ;;  %4766 = vtanh.f32 %v1349_v7  ;;  %v1351_v21 = vmul.f32 5.0, %v4009_v11  ;;  %v339_v11 = vld [vmem:[%s5640_s30 + $0x648] sm:$0xff] }
 0x121   : > { %v1352_v22 = vmul.f32 5.0, %v4010_v12  ;;  %3386 = vst [vmem:[%s5687_s17 + $0x580] sm:$0xff] %v2874_v15  ;;  %v2875_v24 = vadd.f32 0.5, %v2363_v16  ;;  %v2365_v25 = vmul.f32 0.5, %v4751_v19  ;;  %v4011_v26 = vadd.f32 -0.5, %v329_v13  ;;  %v340_v16 = vld [vmem:[%s5640_s30 + $0x650] sm:$0xff] }
 0x122   : > { %v4753_v23 = vpop.eup %4752  ;;  %4768 = vtanh.f32 %v1350_v18  ;;  %v2876_v29 = vadd.f32 0.5, %v2364_v20  ;;  %v4012_v31 = vadd.f32 -0.5, %v330_v17  ;;  %v4013_v41 = vadd.f32 -0.5, %v331_v27  ;;  %v341_v18 = vld [vmem:[%s5640_s30 + $0x658] sm:$0xff] }
 0x123   : > { %v4755_v28 = vpop.eup %4754  ;;  %v2366_v30 = vmul.f32 0.5, %v4753_v23  ;;  %4770 = vtanh.f32 %v1351_v21  ;;  %3387 = vst [vmem:[%s5687_s17 + $0x588] sm:$0xff] %v2875_v24  ;;  %v2877_v35 = vadd.f32 0.5, %v2365_v25  ;;  %v1353_v37 = vmul.f32 5.0, %v4011_v26  ;;  %v342_v26 = vld [vmem:[%s5640_s30 + $0x660] sm:$0xff] }
 0x124   : > { %v4757_v34 = vpop.eup %4756  ;;  %v2367_v36 = vmul.f32 0.5, %v4755_v28  ;;  %4772 = vtanh.f32 %v1352_v22  ;;  %3388 = vst [vmem:[%s5687_s17 + $0x590] sm:$0xff] %v2876_v29  ;;  %v1354_v40 = vmul.f32 5.0, %v4012_v31  ;;  %v4014_v45 = vadd.f32 -0.5, %v332_v32  ;;  %v343_v31 = vld [vmem:[%s5640_s30 + $0x668] sm:$0xff]  ;;  %v344_v32 = vld [vmem:[%s5640_s30 + $0x670] sm:$0xff] }
 0x125   : > { %v2878_v38 = vadd.f32 0.5, %v2366_v30  ;;  %v2368_v39 = vmul.f32 0.5, %v4757_v34  ;;  %v4759_v43 = vpop.eup %4758  ;;  %3389 = vst [vmem:[%s5687_s17 + $0x598] sm:$0xff] %v2877_v35  ;;  %4774 = vtanh.f32 %v1353_v37  ;;  %v4015_v46 = vadd.f32 -0.5, %v333_v33 }
 0x126   : > { %v2879_v44 = vadd.f32 0.5, %v2367_v36  ;;  %v4761_v49 = vpop.eup %4760  ;;  %v2369_v51 = vmul.f32 0.5, %v4759_v43  ;;  %4776 = vtanh.f32 %v1354_v40  ;;  %v1355_v52 = vmul.f32 5.0, %v4013_v41 }
 0x127   : > { %3390 = vst [vmem:[%s5687_s17 + $0x5a0] sm:$0xff] %v2878_v38  ;;  %v2880_v50 = vadd.f32 0.5, %v2368_v39  ;;  %v2370_v53 = vmul.f32 0.5, %v4761_v49  ;;  %v1356_v54 = vmul.f32 5.0, %v4014_v45  ;;  %v1357_v55 = vmul.f32 5.0, %v4015_v46  ;;  %v345_v45 = vld [vmem:[%s5640_s30 + $0x678] sm:$0xff] }
 0x128   : > { %3391 = vst [vmem:[%s5687_s17 + $0x5a8] sm:$0xff] %v2879_v44  ;;  %v4016_v56 = vadd.f32 -0.5, %v334_v42  ;;  %v4763_v57 = vpop.eup %4762  ;;  %v2881_v58 = vadd.f32 0.5, %v2369_v51  ;;  %4778 = vtanh.f32 %v1355_v52  ;;  %v4017_v59 = vadd.f32 -0.5, %v335_v47 }
 0x129   : > { %3392 = vst [vmem:[%s5687_s17 + $0x5b0] sm:$0xff] %v2880_v50  ;;  %v4018_v60 = vadd.f32 -0.5, %v336_v48  ;;  %v4765_v62 = vpop.eup %4764  ;;  %v2882_v63 = vadd.f32 0.5, %v2370_v53  ;;  %v2371_v0 = vmul.f32 0.5, %v4763_v57  ;;  %4780 = vtanh.f32 %v1356_v54  ;;  %v346_v50 = vld [vmem:[%s5640_s30 + $0x680] sm:$0xff] }
 0x12a   : > { %v1358_v1 = vmul.f32 5.0, %v4016_v56  ;;  %v4767_v3 = vpop.eup %4766  ;;  %3393 = vst [vmem:[%s5687_s17 + $0x5b8] sm:$0xff] %v2881_v58  ;;  %v2372_v4 = vmul.f32 0.5, %v4765_v62  ;;  %4782 = vtanh.f32 %v1357_v55  ;;  %v1359_v5 = vmul.f32 5.0, %v4017_v59  ;;  %v347_v59 = vld [vmem:[%s5640_s30 + $0x688] sm:$0xff] }
 0x12b   : > { %v1360_v6 = vmul.f32 5.0, %v4018_v60  ;;  %3394 = vst [vmem:[%s5687_s17 + $0x5c0] sm:$0xff] %v2882_v63  ;;  %v2883_v8 = vadd.f32 0.5, %v2371_v0  ;;  %v2373_v9 = vmul.f32 0.5, %v4767_v3  ;;  %v4019_v10 = vadd.f32 -0.5, %v337_v61  ;;  %v348_v0 = vld [vmem:[%s5640_s30 + $0x690] sm:$0xff] }
 0x12c   : > { %v4769_v7 = vpop.eup %4768  ;;  %4784 = vtanh.f32 %v1358_v1  ;;  %v2884_v13 = vadd.f32 0.5, %v2372_v4  ;;  %v4020_v15 = vadd.f32 -0.5, %v338_v2  ;;  %v4021_v25 = vadd.f32 -0.5, %v339_v11  ;;  %v349_v1 = vld [vmem:[%s5640_s30 + $0x698] sm:$0xff] }
 0x12d   : > { %v4771_v12 = vpop.eup %4770  ;;  %v2374_v14 = vmul.f32 0.5, %v4769_v7  ;;  %4786 = vtanh.f32 %v1359_v5  ;;  %3395 = vst [vmem:[%s5687_s17 + $0x5c8] sm:$0xff] %v2883_v8  ;;  %v2885_v19 = vadd.f32 0.5, %v2373_v9  ;;  %v1361_v21 = vmul.f32 5.0, %v4019_v10  ;;  %v350_v10 = vld [vmem:[%s5640_s30 + $0x6a0] sm:$0xff] }
 0x12e   : > { %v4773_v17 = vpop.eup %4772  ;;  %v2375_v20 = vmul.f32 0.5, %v4771_v12  ;;  %4788 = vtanh.f32 %v1360_v6  ;;  %3396 = vst [vmem:[%s5687_s17 + $0x5d0] sm:$0xff] %v2884_v13  ;;  %v1362_v24 = vmul.f32 5.0, %v4020_v15  ;;  %v4022_v29 = vadd.f32 -0.5, %v340_v16  ;;  %v351_v15 = vld [vmem:[%s5640_s30 + $0x6a8] sm:$0xff]  ;;  %v352_v16 = vld [vmem:[%s5640_s30 + $0x6b0] sm:$0xff] }
 0x12f   : > { %v2886_v22 = vadd.f32 0.5, %v2374_v14  ;;  %v2376_v23 = vmul.f32 0.5, %v4773_v17  ;;  %v4775_v27 = vpop.eup %4774  ;;  %3397 = vst [vmem:[%s5687_s17 + $0x5d8] sm:$0xff] %v2885_v19  ;;  %4790 = vtanh.f32 %v1361_v21  ;;  %v4023_v30 = vadd.f32 -0.5, %v341_v18 }
 0x130   : > { %v2887_v28 = vadd.f32 0.5, %v2375_v20  ;;  %v4777_v33 = vpop.eup %4776  ;;  %v2377_v35 = vmul.f32 0.5, %v4775_v27  ;;  %4792 = vtanh.f32 %v1362_v24  ;;  %v1363_v36 = vmul.f32 5.0, %v4021_v25 }
 0x131   : > { %3398 = vst [vmem:[%s5687_s17 + $0x5e0] sm:$0xff] %v2886_v22  ;;  %v2888_v34 = vadd.f32 0.5, %v2376_v23  ;;  %v2378_v37 = vmul.f32 0.5, %v4777_v33  ;;  %v1364_v38 = vmul.f32 5.0, %v4022_v29  ;;  %v1365_v39 = vmul.f32 5.0, %v4023_v30  ;;  %v353_v29 = vld [vmem:[%s5640_s30 + $0x6b8] sm:$0xff] }
 0x132   : > { %3399 = vst [vmem:[%s5687_s17 + $0x5e8] sm:$0xff] %v2887_v28  ;;  %v4024_v40 = vadd.f32 -0.5, %v342_v26  ;;  %v4779_v41 = vpop.eup %4778  ;;  %v2889_v42 = vadd.f32 0.5, %v2377_v35  ;;  %4794 = vtanh.f32 %v1363_v36  ;;  %v4025_v43 = vadd.f32 -0.5, %v343_v31 }
 0x133   : > { %3400 = vst [vmem:[%s5687_s17 + $0x5f0] sm:$0xff] %v2888_v34  ;;  %v4026_v44 = vadd.f32 -0.5, %v344_v32  ;;  %v4781_v46 = vpop.eup %4780  ;;  %v2890_v47 = vadd.f32 0.5, %v2378_v37  ;;  %v2379_v48 = vmul.f32 0.5, %v4779_v41  ;;  %4796 = vtanh.f32 %v1364_v38  ;;  %v354_v34 = vld [vmem:[%s5640_s30 + $0x6c0] sm:$0xff] }
 0x134   : > { %v1366_v49 = vmul.f32 5.0, %v4024_v40  ;;  %v4783_v51 = vpop.eup %4782  ;;  %3401 = vst [vmem:[%s5687_s17 + $0x5f8] sm:$0xff] %v2889_v42  ;;  %v2380_v52 = vmul.f32 0.5, %v4781_v46  ;;  %4798 = vtanh.f32 %v1365_v39  ;;  %v1367_v53 = vmul.f32 5.0, %v4025_v43  ;;  %v355_v43 = vld [vmem:[%s5640_s30 + $0x6c8] sm:$0xff] }
 0x135   : > { %v1368_v54 = vmul.f32 5.0, %v4026_v44  ;;  %3402 = vst [vmem:[%s5687_s17 + $0x600] sm:$0xff] %v2890_v47  ;;  %v2891_v56 = vadd.f32 0.5, %v2379_v48  ;;  %v2381_v57 = vmul.f32 0.5, %v4783_v51  ;;  %v4027_v58 = vadd.f32 -0.5, %v345_v45  ;;  %v356_v48 = vld [vmem:[%s5640_s30 + $0x6d0] sm:$0xff] }
 0x136   : > { %v4785_v55 = vpop.eup %4784  ;;  %4800 = vtanh.f32 %v1366_v49  ;;  %v2892_v61 = vadd.f32 0.5, %v2380_v52  ;;  %v4028_v63 = vadd.f32 -0.5, %v346_v50  ;;  %v4029_v9 = vadd.f32 -0.5, %v347_v59  ;;  %v357_v49 = vld [vmem:[%s5640_s30 + $0x6d8] sm:$0xff] }
 0x137   : > { %v4787_v60 = vpop.eup %4786  ;;  %v2382_v62 = vmul.f32 0.5, %v4785_v55  ;;  %4802 = vtanh.f32 %v1367_v53  ;;  %3403 = vst [vmem:[%s5687_s17 + $0x608] sm:$0xff] %v2891_v56  ;;  %v2893_v3 = vadd.f32 0.5, %v2381_v57  ;;  %v1369_v5 = vmul.f32 5.0, %v4027_v58  ;;  %v358_v58 = vld [vmem:[%s5640_s30 + $0x6e0] sm:$0xff] }
 0x138   : > { %v4789_v2 = vpop.eup %4788  ;;  %v2383_v4 = vmul.f32 0.5, %v4787_v60  ;;  %4804 = vtanh.f32 %v1368_v54  ;;  %3404 = vst [vmem:[%s5687_s17 + $0x610] sm:$0xff] %v2892_v61  ;;  %v1370_v8 = vmul.f32 5.0, %v4028_v63  ;;  %v4030_v13 = vadd.f32 -0.5, %v348_v0  ;;  %v359_v63 = vld [vmem:[%s5640_s30 + $0x6e8] sm:$0xff]  ;;  %v360_v0 = vld [vmem:[%s5640_s30 + $0x6f0] sm:$0xff] }
 0x139   : > { %v2894_v6 = vadd.f32 0.5, %v2382_v62  ;;  %v2384_v7 = vmul.f32 0.5, %v4789_v2  ;;  %v4791_v11 = vpop.eup %4790  ;;  %3405 = vst [vmem:[%s5687_s17 + $0x618] sm:$0xff] %v2893_v3  ;;  %4806 = vtanh.f32 %v1369_v5  ;;  %v4031_v14 = vadd.f32 -0.5, %v349_v1 }
 0x13a   : > { %v2895_v12 = vadd.f32 0.5, %v2383_v4  ;;  %v4793_v18 = vpop.eup %4792  ;;  %v2385_v19 = vmul.f32 0.5, %v4791_v11  ;;  %4808 = vtanh.f32 %v1370_v8  ;;  %v1371_v20 = vmul.f32 5.0, %v4029_v9 }
 0x13b   : > { %3406 = vst [vmem:[%s5687_s17 + $0x620] sm:$0xff] %v2894_v6  ;;  %v2896_v17 = vadd.f32 0.5, %v2384_v7  ;;  %v2386_v21 = vmul.f32 0.5, %v4793_v18  ;;  %v1372_v22 = vmul.f32 5.0, %v4030_v13  ;;  %v1373_v23 = vmul.f32 5.0, %v4031_v14  ;;  %v361_v13 = vld [vmem:[%s5640_s30 + $0x6f8] sm:$0xff] }
 0x13c   : > { %3407 = vst [vmem:[%s5687_s17 + $0x628] sm:$0xff] %v2895_v12  ;;  %v4032_v24 = vadd.f32 -0.5, %v350_v10  ;;  %v4795_v25 = vpop.eup %4794  ;;  %v2897_v26 = vadd.f32 0.5, %v2385_v19  ;;  %4810 = vtanh.f32 %v1371_v20  ;;  %v4033_v27 = vadd.f32 -0.5, %v351_v15 }
 0x13d   : > { %3408 = vst [vmem:[%s5687_s17 + $0x630] sm:$0xff] %v2896_v17  ;;  %v4034_v28 = vadd.f32 -0.5, %v352_v16  ;;  %v4797_v30 = vpop.eup %4796  ;;  %v2898_v31 = vadd.f32 0.5, %v2386_v21  ;;  %v2387_v32 = vmul.f32 0.5, %v4795_v25  ;;  %4812 = vtanh.f32 %v1372_v22  ;;  %v362_v17 = vld [vmem:[%s5640_s30 + $0x700] sm:$0xff] }
 0x13e   : > { %v1374_v33 = vmul.f32 5.0, %v4032_v24  ;;  %v4799_v35 = vpop.eup %4798  ;;  %3409 = vst [vmem:[%s5687_s17 + $0x638] sm:$0xff] %v2897_v26  ;;  %v2388_v36 = vmul.f32 0.5, %v4797_v30  ;;  %4814 = vtanh.f32 %v1373_v23  ;;  %v1375_v37 = vmul.f32 5.0, %v4033_v27  ;;  %v363_v27 = vld [vmem:[%s5640_s30 + $0x708] sm:$0xff] }
 0x13f   : > { %v1376_v38 = vmul.f32 5.0, %v4034_v28  ;;  %3410 = vst [vmem:[%s5687_s17 + $0x640] sm:$0xff] %v2898_v31  ;;  %v2899_v40 = vadd.f32 0.5, %v2387_v32  ;;  %v2389_v41 = vmul.f32 0.5, %v4799_v35  ;;  %v4035_v42 = vadd.f32 -0.5, %v353_v29  ;;  %v364_v32 = vld [vmem:[%s5640_s30 + $0x710] sm:$0xff] }
 0x140   : > { %v4801_v39 = vpop.eup %4800  ;;  %4816 = vtanh.f32 %v1374_v33  ;;  %v2900_v45 = vadd.f32 0.5, %v2388_v36  ;;  %v4036_v47 = vadd.f32 -0.5, %v354_v34  ;;  %v4037_v57 = vadd.f32 -0.5, %v355_v43  ;;  %v365_v33 = vld [vmem:[%s5640_s30 + $0x718] sm:$0xff] }
 0x141   : > { %v4803_v44 = vpop.eup %4802  ;;  %v2390_v46 = vmul.f32 0.5, %v4801_v39  ;;  %4818 = vtanh.f32 %v1375_v37  ;;  %3411 = vst [vmem:[%s5687_s17 + $0x648] sm:$0xff] %v2899_v40  ;;  %v2901_v51 = vadd.f32 0.5, %v2389_v41  ;;  %v1377_v53 = vmul.f32 5.0, %v4035_v42  ;;  %v366_v42 = vld [vmem:[%s5640_s30 + $0x720] sm:$0xff] }
 0x142   : > { %v4805_v50 = vpop.eup %4804  ;;  %v2391_v52 = vmul.f32 0.5, %v4803_v44  ;;  %4820 = vtanh.f32 %v1376_v38  ;;  %3412 = vst [vmem:[%s5687_s17 + $0x650] sm:$0xff] %v2900_v45  ;;  %v1378_v56 = vmul.f32 5.0, %v4036_v47  ;;  %v4038_v61 = vadd.f32 -0.5, %v356_v48  ;;  %v367_v47 = vld [vmem:[%s5640_s30 + $0x728] sm:$0xff]  ;;  %v368_v48 = vld [vmem:[%s5640_s30 + $0x730] sm:$0xff] }
 0x143   : > { %v2902_v54 = vadd.f32 0.5, %v2390_v46  ;;  %v2392_v55 = vmul.f32 0.5, %v4805_v50  ;;  %v4807_v59 = vpop.eup %4806  ;;  %3413 = vst [vmem:[%s5687_s17 + $0x658] sm:$0xff] %v2901_v51  ;;  %4822 = vtanh.f32 %v1377_v53  ;;  %v4039_v62 = vadd.f32 -0.5, %v357_v49 }
 0x144   : > { %v2903_v60 = vadd.f32 0.5, %v2391_v52  ;;  %v4809_v1 = vpop.eup %4808  ;;  %v2393_v3 = vmul.f32 0.5, %v4807_v59  ;;  %4824 = vtanh.f32 %v1378_v56  ;;  %v1379_v4 = vmul.f32 5.0, %v4037_v57 }
 0x145   : > { %3414 = vst [vmem:[%s5687_s17 + $0x660] sm:$0xff] %v2902_v54  ;;  %v2904_v2 = vadd.f32 0.5, %v2392_v55  ;;  %v2394_v5 = vmul.f32 0.5, %v4809_v1  ;;  %v1380_v6 = vmul.f32 5.0, %v4038_v61  ;;  %v1381_v7 = vmul.f32 5.0, %v4039_v62  ;;  %v369_v61 = vld [vmem:[%s5640_s30 + $0x738] sm:$0xff] }
 0x146   : > { %3415 = vst [vmem:[%s5687_s17 + $0x668] sm:$0xff] %v2903_v60  ;;  %v4040_v8 = vadd.f32 -0.5, %v358_v58  ;;  %v4811_v9 = vpop.eup %4810  ;;  %v2905_v10 = vadd.f32 0.5, %v2393_v3  ;;  %4826 = vtanh.f32 %v1379_v4  ;;  %v4041_v11 = vadd.f32 -0.5, %v359_v63 }
 0x147   : > { %3416 = vst [vmem:[%s5687_s17 + $0x670] sm:$0xff] %v2904_v2  ;;  %v4042_v12 = vadd.f32 -0.5, %v360_v0  ;;  %v4813_v14 = vpop.eup %4812  ;;  %v2906_v15 = vadd.f32 0.5, %v2394_v5  ;;  %v2395_v16 = vmul.f32 0.5, %v4811_v9  ;;  %4828 = vtanh.f32 %v1380_v6  ;;  %v370_v2 = vld [vmem:[%s5640_s30 + $0x740] sm:$0xff] }
 0x148   : > { %v1382_v18 = vmul.f32 5.0, %v4040_v8  ;;  %v4815_v19 = vpop.eup %4814  ;;  %3417 = vst [vmem:[%s5687_s17 + $0x678] sm:$0xff] %v2905_v10  ;;  %v2396_v20 = vmul.f32 0.5, %v4813_v14  ;;  %4830 = vtanh.f32 %v1381_v7  ;;  %v1383_v21 = vmul.f32 5.0, %v4041_v11  ;;  %v371_v11 = vld [vmem:[%s5640_s30 + $0x748] sm:$0xff] }
 0x149   : > { %v1384_v22 = vmul.f32 5.0, %v4042_v12  ;;  %3418 = vst [vmem:[%s5687_s17 + $0x680] sm:$0xff] %v2906_v15  ;;  %v2907_v24 = vadd.f32 0.5, %v2395_v16  ;;  %v2397_v25 = vmul.f32 0.5, %v4815_v19  ;;  %v4043_v26 = vadd.f32 -0.5, %v361_v13  ;;  %v372_v16 = vld [vmem:[%s5640_s30 + $0x750] sm:$0xff] }
 0x14a   : > { %v4817_v23 = vpop.eup %4816  ;;  %4832 = vtanh.f32 %v1382_v18  ;;  %v2908_v29 = vadd.f32 0.5, %v2396_v20  ;;  %v4044_v31 = vadd.f32 -0.5, %v362_v17  ;;  %v4045_v41 = vadd.f32 -0.5, %v363_v27  ;;  %v373_v18 = vld [vmem:[%s5640_s30 + $0x758] sm:$0xff] }
 0x14b   : > { %v4819_v28 = vpop.eup %4818  ;;  %v2398_v30 = vmul.f32 0.5, %v4817_v23  ;;  %4834 = vtanh.f32 %v1383_v21  ;;  %3419 = vst [vmem:[%s5687_s17 + $0x688] sm:$0xff] %v2907_v24  ;;  %v2909_v35 = vadd.f32 0.5, %v2397_v25  ;;  %v1385_v37 = vmul.f32 5.0, %v4043_v26  ;;  %v374_v26 = vld [vmem:[%s5640_s30 + $0x760] sm:$0xff] }
 0x14c   : > { %v4821_v34 = vpop.eup %4820  ;;  %v2399_v36 = vmul.f32 0.5, %v4819_v28  ;;  %4836 = vtanh.f32 %v1384_v22  ;;  %3420 = vst [vmem:[%s5687_s17 + $0x690] sm:$0xff] %v2908_v29  ;;  %v1386_v40 = vmul.f32 5.0, %v4044_v31  ;;  %v4046_v45 = vadd.f32 -0.5, %v364_v32  ;;  %v375_v31 = vld [vmem:[%s5640_s30 + $0x768] sm:$0xff]  ;;  %v376_v32 = vld [vmem:[%s5640_s30 + $0x770] sm:$0xff] }
 0x14d   : > { %v2910_v38 = vadd.f32 0.5, %v2398_v30  ;;  %v2400_v39 = vmul.f32 0.5, %v4821_v34  ;;  %v4823_v43 = vpop.eup %4822  ;;  %3421 = vst [vmem:[%s5687_s17 + $0x698] sm:$0xff] %v2909_v35  ;;  %4838 = vtanh.f32 %v1385_v37  ;;  %v4047_v46 = vadd.f32 -0.5, %v365_v33 }
 0x14e   : > { %v2911_v44 = vadd.f32 0.5, %v2399_v36  ;;  %v4825_v49 = vpop.eup %4824  ;;  %v2401_v51 = vmul.f32 0.5, %v4823_v43  ;;  %4840 = vtanh.f32 %v1386_v40  ;;  %v1387_v52 = vmul.f32 5.0, %v4045_v41 }
 0x14f   : > { %3422 = vst [vmem:[%s5687_s17 + $0x6a0] sm:$0xff] %v2910_v38  ;;  %v2912_v50 = vadd.f32 0.5, %v2400_v39  ;;  %v2402_v53 = vmul.f32 0.5, %v4825_v49  ;;  %v1388_v54 = vmul.f32 5.0, %v4046_v45  ;;  %v1389_v55 = vmul.f32 5.0, %v4047_v46  ;;  %v377_v45 = vld [vmem:[%s5640_s30 + $0x778] sm:$0xff] }
 0x150   : > { %3423 = vst [vmem:[%s5687_s17 + $0x6a8] sm:$0xff] %v2911_v44  ;;  %v4048_v56 = vadd.f32 -0.5, %v366_v42  ;;  %v4827_v57 = vpop.eup %4826  ;;  %v2913_v58 = vadd.f32 0.5, %v2401_v51  ;;  %4842 = vtanh.f32 %v1387_v52  ;;  %v4049_v59 = vadd.f32 -0.5, %v367_v47 }
 0x151   : > { %3424 = vst [vmem:[%s5687_s17 + $0x6b0] sm:$0xff] %v2912_v50  ;;  %v4050_v60 = vadd.f32 -0.5, %v368_v48  ;;  %v4829_v62 = vpop.eup %4828  ;;  %v2914_v63 = vadd.f32 0.5, %v2402_v53  ;;  %v2403_v0 = vmul.f32 0.5, %v4827_v57  ;;  %4844 = vtanh.f32 %v1388_v54  ;;  %v378_v50 = vld [vmem:[%s5640_s30 + $0x780] sm:$0xff] }
 0x152   : > { %v1390_v1 = vmul.f32 5.0, %v4048_v56  ;;  %v4831_v3 = vpop.eup %4830  ;;  %3425 = vst [vmem:[%s5687_s17 + $0x6b8] sm:$0xff] %v2913_v58  ;;  %v2404_v4 = vmul.f32 0.5, %v4829_v62  ;;  %4846 = vtanh.f32 %v1389_v55  ;;  %v1391_v5 = vmul.f32 5.0, %v4049_v59  ;;  %v379_v59 = vld [vmem:[%s5640_s30 + $0x788] sm:$0xff] }
 0x153   : > { %v1392_v6 = vmul.f32 5.0, %v4050_v60  ;;  %3426 = vst [vmem:[%s5687_s17 + $0x6c0] sm:$0xff] %v2914_v63  ;;  %v2915_v8 = vadd.f32 0.5, %v2403_v0  ;;  %v2405_v9 = vmul.f32 0.5, %v4831_v3  ;;  %v4051_v10 = vadd.f32 -0.5, %v369_v61  ;;  %v380_v0 = vld [vmem:[%s5640_s30 + $0x790] sm:$0xff] }
 0x154   : > { %v4833_v7 = vpop.eup %4832  ;;  %4848 = vtanh.f32 %v1390_v1  ;;  %v2916_v13 = vadd.f32 0.5, %v2404_v4  ;;  %v4052_v15 = vadd.f32 -0.5, %v370_v2  ;;  %v4053_v25 = vadd.f32 -0.5, %v371_v11  ;;  %v381_v1 = vld [vmem:[%s5640_s30 + $0x798] sm:$0xff] }
 0x155   : > { %v4835_v12 = vpop.eup %4834  ;;  %v2406_v14 = vmul.f32 0.5, %v4833_v7  ;;  %4850 = vtanh.f32 %v1391_v5  ;;  %3427 = vst [vmem:[%s5687_s17 + $0x6c8] sm:$0xff] %v2915_v8  ;;  %v2917_v19 = vadd.f32 0.5, %v2405_v9  ;;  %v1393_v21 = vmul.f32 5.0, %v4051_v10  ;;  %v382_v10 = vld [vmem:[%s5640_s30 + $0x7a0] sm:$0xff] }
 0x156   : > { %v4837_v17 = vpop.eup %4836  ;;  %v2407_v20 = vmul.f32 0.5, %v4835_v12  ;;  %4852 = vtanh.f32 %v1392_v6  ;;  %3428 = vst [vmem:[%s5687_s17 + $0x6d0] sm:$0xff] %v2916_v13  ;;  %v1394_v24 = vmul.f32 5.0, %v4052_v15  ;;  %v4054_v29 = vadd.f32 -0.5, %v372_v16  ;;  %v383_v15 = vld [vmem:[%s5640_s30 + $0x7a8] sm:$0xff]  ;;  %v384_v16 = vld [vmem:[%s5640_s30 + $0x7b0] sm:$0xff] }
 0x157   : > { %v2918_v22 = vadd.f32 0.5, %v2406_v14  ;;  %v2408_v23 = vmul.f32 0.5, %v4837_v17  ;;  %v4839_v27 = vpop.eup %4838  ;;  %3429 = vst [vmem:[%s5687_s17 + $0x6d8] sm:$0xff] %v2917_v19  ;;  %4854 = vtanh.f32 %v1393_v21  ;;  %v4055_v30 = vadd.f32 -0.5, %v373_v18 }
 0x158   : > { %v2919_v28 = vadd.f32 0.5, %v2407_v20  ;;  %v4841_v33 = vpop.eup %4840  ;;  %v2409_v35 = vmul.f32 0.5, %v4839_v27  ;;  %4856 = vtanh.f32 %v1394_v24  ;;  %v1395_v36 = vmul.f32 5.0, %v4053_v25 }
 0x159   : > { %3430 = vst [vmem:[%s5687_s17 + $0x6e0] sm:$0xff] %v2918_v22  ;;  %v2920_v34 = vadd.f32 0.5, %v2408_v23  ;;  %v2410_v37 = vmul.f32 0.5, %v4841_v33  ;;  %v1396_v38 = vmul.f32 5.0, %v4054_v29  ;;  %v1397_v39 = vmul.f32 5.0, %v4055_v30  ;;  %v385_v29 = vld [vmem:[%s5640_s30 + $0x7b8] sm:$0xff] }
 0x15a   : > { %3431 = vst [vmem:[%s5687_s17 + $0x6e8] sm:$0xff] %v2919_v28  ;;  %v4056_v40 = vadd.f32 -0.5, %v374_v26  ;;  %v4843_v41 = vpop.eup %4842  ;;  %v2921_v42 = vadd.f32 0.5, %v2409_v35  ;;  %4858 = vtanh.f32 %v1395_v36  ;;  %v4057_v43 = vadd.f32 -0.5, %v375_v31 }
 0x15b   : > { %3432 = vst [vmem:[%s5687_s17 + $0x6f0] sm:$0xff] %v2920_v34  ;;  %v4058_v44 = vadd.f32 -0.5, %v376_v32  ;;  %v4845_v46 = vpop.eup %4844  ;;  %v2922_v47 = vadd.f32 0.5, %v2410_v37  ;;  %v2411_v48 = vmul.f32 0.5, %v4843_v41  ;;  %4860 = vtanh.f32 %v1396_v38  ;;  %v386_v34 = vld [vmem:[%s5640_s30 + $0x7c0] sm:$0xff] }
 0x15c   : > { %v1398_v49 = vmul.f32 5.0, %v4056_v40  ;;  %v4847_v51 = vpop.eup %4846  ;;  %3433 = vst [vmem:[%s5687_s17 + $0x6f8] sm:$0xff] %v2921_v42  ;;  %v2412_v52 = vmul.f32 0.5, %v4845_v46  ;;  %4862 = vtanh.f32 %v1397_v39  ;;  %v1399_v53 = vmul.f32 5.0, %v4057_v43  ;;  %v387_v43 = vld [vmem:[%s5640_s30 + $0x7c8] sm:$0xff] }
 0x15d   : > { %v1400_v54 = vmul.f32 5.0, %v4058_v44  ;;  %3434 = vst [vmem:[%s5687_s17 + $0x700] sm:$0xff] %v2922_v47  ;;  %v2923_v56 = vadd.f32 0.5, %v2411_v48  ;;  %v2413_v57 = vmul.f32 0.5, %v4847_v51  ;;  %v4059_v58 = vadd.f32 -0.5, %v377_v45  ;;  %v388_v48 = vld [vmem:[%s5640_s30 + $0x7d0] sm:$0xff] }
 0x15e   : > { %v4849_v55 = vpop.eup %4848  ;;  %4864 = vtanh.f32 %v1398_v49  ;;  %v2924_v61 = vadd.f32 0.5, %v2412_v52  ;;  %v4060_v63 = vadd.f32 -0.5, %v378_v50  ;;  %v4061_v9 = vadd.f32 -0.5, %v379_v59  ;;  %v389_v49 = vld [vmem:[%s5640_s30 + $0x7d8] sm:$0xff] }
 0x15f   : > { %v4851_v60 = vpop.eup %4850  ;;  %v2414_v62 = vmul.f32 0.5, %v4849_v55  ;;  %4866 = vtanh.f32 %v1399_v53  ;;  %3435 = vst [vmem:[%s5687_s17 + $0x708] sm:$0xff] %v2923_v56  ;;  %v2925_v3 = vadd.f32 0.5, %v2413_v57  ;;  %v1401_v5 = vmul.f32 5.0, %v4059_v58  ;;  %v390_v58 = vld [vmem:[%s5640_s30 + $0x7e0] sm:$0xff] }
 0x160   : > { %v4853_v2 = vpop.eup %4852  ;;  %v2415_v4 = vmul.f32 0.5, %v4851_v60  ;;  %4868 = vtanh.f32 %v1400_v54  ;;  %3436 = vst [vmem:[%s5687_s17 + $0x710] sm:$0xff] %v2924_v61  ;;  %v1402_v8 = vmul.f32 5.0, %v4060_v63  ;;  %v4062_v13 = vadd.f32 -0.5, %v380_v0  ;;  %v391_v63 = vld [vmem:[%s5640_s30 + $0x7e8] sm:$0xff]  ;;  %v392_v0 = vld [vmem:[%s5640_s30 + $0x7f0] sm:$0xff] }
 0x161   : > { %v2926_v6 = vadd.f32 0.5, %v2414_v62  ;;  %v2416_v7 = vmul.f32 0.5, %v4853_v2  ;;  %v4855_v11 = vpop.eup %4854  ;;  %3437 = vst [vmem:[%s5687_s17 + $0x718] sm:$0xff] %v2925_v3  ;;  %4870 = vtanh.f32 %v1401_v5  ;;  %v4063_v14 = vadd.f32 -0.5, %v381_v1 }
 0x162   : > { %v2927_v12 = vadd.f32 0.5, %v2415_v4  ;;  %v4857_v18 = vpop.eup %4856  ;;  %v2417_v19 = vmul.f32 0.5, %v4855_v11  ;;  %4872 = vtanh.f32 %v1402_v8  ;;  %v1403_v20 = vmul.f32 5.0, %v4061_v9 }
 0x163   : > { %3438 = vst [vmem:[%s5687_s17 + $0x720] sm:$0xff] %v2926_v6  ;;  %v2928_v17 = vadd.f32 0.5, %v2416_v7  ;;  %v2418_v21 = vmul.f32 0.5, %v4857_v18  ;;  %v1404_v22 = vmul.f32 5.0, %v4062_v13  ;;  %v1405_v23 = vmul.f32 5.0, %v4063_v14  ;;  %v393_v13 = vld [vmem:[%s5640_s30 + $0x7f8] sm:$0xff] }
 0x164   : > { %3439 = vst [vmem:[%s5687_s17 + $0x728] sm:$0xff] %v2927_v12  ;;  %v4064_v24 = vadd.f32 -0.5, %v382_v10  ;;  %v4859_v25 = vpop.eup %4858  ;;  %v2929_v26 = vadd.f32 0.5, %v2417_v19  ;;  %4874 = vtanh.f32 %v1403_v20  ;;  %v4065_v27 = vadd.f32 -0.5, %v383_v15 }
 0x165   : > { %3440 = vst [vmem:[%s5687_s17 + $0x730] sm:$0xff] %v2928_v17  ;;  %v4066_v28 = vadd.f32 -0.5, %v384_v16  ;;  %v4861_v30 = vpop.eup %4860  ;;  %v2930_v31 = vadd.f32 0.5, %v2418_v21  ;;  %v2419_v32 = vmul.f32 0.5, %v4859_v25  ;;  %4876 = vtanh.f32 %v1404_v22  ;;  %v394_v17 = vld [vmem:[%s5640_s30 + $0x800] sm:$0xff] }
 0x166   : > { %v1406_v33 = vmul.f32 5.0, %v4064_v24  ;;  %v4863_v35 = vpop.eup %4862  ;;  %3441 = vst [vmem:[%s5687_s17 + $0x738] sm:$0xff] %v2929_v26  ;;  %v2420_v36 = vmul.f32 0.5, %v4861_v30  ;;  %4878 = vtanh.f32 %v1405_v23  ;;  %v1407_v37 = vmul.f32 5.0, %v4065_v27  ;;  %v395_v27 = vld [vmem:[%s5640_s30 + $0x808] sm:$0xff] }
 0x167   : > { %v1408_v38 = vmul.f32 5.0, %v4066_v28  ;;  %3442 = vst [vmem:[%s5687_s17 + $0x740] sm:$0xff] %v2930_v31  ;;  %v2931_v40 = vadd.f32 0.5, %v2419_v32  ;;  %v2421_v41 = vmul.f32 0.5, %v4863_v35  ;;  %v4067_v42 = vadd.f32 -0.5, %v385_v29  ;;  %v396_v32 = vld [vmem:[%s5640_s30 + $0x810] sm:$0xff] }
 0x168   : > { %v4865_v39 = vpop.eup %4864  ;;  %4880 = vtanh.f32 %v1406_v33  ;;  %v2932_v45 = vadd.f32 0.5, %v2420_v36  ;;  %v4068_v47 = vadd.f32 -0.5, %v386_v34  ;;  %v4069_v57 = vadd.f32 -0.5, %v387_v43  ;;  %v397_v33 = vld [vmem:[%s5640_s30 + $0x818] sm:$0xff] }
 0x169   : > { %v4867_v44 = vpop.eup %4866  ;;  %v2422_v46 = vmul.f32 0.5, %v4865_v39  ;;  %4882 = vtanh.f32 %v1407_v37  ;;  %3443 = vst [vmem:[%s5687_s17 + $0x748] sm:$0xff] %v2931_v40  ;;  %v2933_v51 = vadd.f32 0.5, %v2421_v41  ;;  %v1409_v53 = vmul.f32 5.0, %v4067_v42  ;;  %v398_v42 = vld [vmem:[%s5640_s30 + $0x820] sm:$0xff] }
 0x16a   : > { %v4869_v50 = vpop.eup %4868  ;;  %v2423_v52 = vmul.f32 0.5, %v4867_v44  ;;  %4884 = vtanh.f32 %v1408_v38  ;;  %3444 = vst [vmem:[%s5687_s17 + $0x750] sm:$0xff] %v2932_v45  ;;  %v1410_v56 = vmul.f32 5.0, %v4068_v47  ;;  %v4070_v61 = vadd.f32 -0.5, %v388_v48  ;;  %v399_v47 = vld [vmem:[%s5640_s30 + $0x828] sm:$0xff]  ;;  %v400_v48 = vld [vmem:[%s5640_s30 + $0x830] sm:$0xff] }
 0x16b   : > { %v2934_v54 = vadd.f32 0.5, %v2422_v46  ;;  %v2424_v55 = vmul.f32 0.5, %v4869_v50  ;;  %v4871_v59 = vpop.eup %4870  ;;  %3445 = vst [vmem:[%s5687_s17 + $0x758] sm:$0xff] %v2933_v51  ;;  %4886 = vtanh.f32 %v1409_v53  ;;  %v4071_v62 = vadd.f32 -0.5, %v389_v49 }
 0x16c   : > { %v2935_v60 = vadd.f32 0.5, %v2423_v52  ;;  %v4873_v1 = vpop.eup %4872  ;;  %v2425_v3 = vmul.f32 0.5, %v4871_v59  ;;  %4888 = vtanh.f32 %v1410_v56  ;;  %v1411_v4 = vmul.f32 5.0, %v4069_v57 }
 0x16d   : > { %3446 = vst [vmem:[%s5687_s17 + $0x760] sm:$0xff] %v2934_v54  ;;  %v2936_v2 = vadd.f32 0.5, %v2424_v55  ;;  %v2426_v5 = vmul.f32 0.5, %v4873_v1  ;;  %v1412_v6 = vmul.f32 5.0, %v4070_v61  ;;  %v1413_v7 = vmul.f32 5.0, %v4071_v62  ;;  %v401_v61 = vld [vmem:[%s5640_s30 + $0x838] sm:$0xff] }
 0x16e   : > { %3447 = vst [vmem:[%s5687_s17 + $0x768] sm:$0xff] %v2935_v60  ;;  %v4072_v8 = vadd.f32 -0.5, %v390_v58  ;;  %v4875_v9 = vpop.eup %4874  ;;  %v2937_v10 = vadd.f32 0.5, %v2425_v3  ;;  %4890 = vtanh.f32 %v1411_v4  ;;  %v4073_v11 = vadd.f32 -0.5, %v391_v63 }
 0x16f   : > { %3448 = vst [vmem:[%s5687_s17 + $0x770] sm:$0xff] %v2936_v2  ;;  %v4074_v12 = vadd.f32 -0.5, %v392_v0  ;;  %v4877_v14 = vpop.eup %4876  ;;  %v2938_v15 = vadd.f32 0.5, %v2426_v5  ;;  %v2427_v16 = vmul.f32 0.5, %v4875_v9  ;;  %4892 = vtanh.f32 %v1412_v6  ;;  %v402_v2 = vld [vmem:[%s5640_s30 + $0x840] sm:$0xff] }
 0x170   : > { %v1414_v18 = vmul.f32 5.0, %v4072_v8  ;;  %v4879_v19 = vpop.eup %4878  ;;  %3449 = vst [vmem:[%s5687_s17 + $0x778] sm:$0xff] %v2937_v10  ;;  %v2428_v20 = vmul.f32 0.5, %v4877_v14  ;;  %4894 = vtanh.f32 %v1413_v7  ;;  %v1415_v21 = vmul.f32 5.0, %v4073_v11  ;;  %v403_v11 = vld [vmem:[%s5640_s30 + $0x848] sm:$0xff] }
 0x171   : > { %v1416_v22 = vmul.f32 5.0, %v4074_v12  ;;  %3450 = vst [vmem:[%s5687_s17 + $0x780] sm:$0xff] %v2938_v15  ;;  %v2939_v24 = vadd.f32 0.5, %v2427_v16  ;;  %v2429_v25 = vmul.f32 0.5, %v4879_v19  ;;  %v4075_v26 = vadd.f32 -0.5, %v393_v13  ;;  %v404_v16 = vld [vmem:[%s5640_s30 + $0x850] sm:$0xff] }
 0x172   : > { %v4881_v23 = vpop.eup %4880  ;;  %4896 = vtanh.f32 %v1414_v18  ;;  %v2940_v29 = vadd.f32 0.5, %v2428_v20  ;;  %v4076_v31 = vadd.f32 -0.5, %v394_v17  ;;  %v4077_v41 = vadd.f32 -0.5, %v395_v27  ;;  %v405_v18 = vld [vmem:[%s5640_s30 + $0x858] sm:$0xff] }
 0x173   : > { %v4883_v28 = vpop.eup %4882  ;;  %v2430_v30 = vmul.f32 0.5, %v4881_v23  ;;  %4898 = vtanh.f32 %v1415_v21  ;;  %3451 = vst [vmem:[%s5687_s17 + $0x788] sm:$0xff] %v2939_v24  ;;  %v2941_v35 = vadd.f32 0.5, %v2429_v25  ;;  %v1417_v37 = vmul.f32 5.0, %v4075_v26  ;;  %v406_v26 = vld [vmem:[%s5640_s30 + $0x860] sm:$0xff] }
 0x174   : > { %v4885_v34 = vpop.eup %4884  ;;  %v2431_v36 = vmul.f32 0.5, %v4883_v28  ;;  %4900 = vtanh.f32 %v1416_v22  ;;  %3452 = vst [vmem:[%s5687_s17 + $0x790] sm:$0xff] %v2940_v29  ;;  %v1418_v40 = vmul.f32 5.0, %v4076_v31  ;;  %v4078_v45 = vadd.f32 -0.5, %v396_v32  ;;  %v407_v31 = vld [vmem:[%s5640_s30 + $0x868] sm:$0xff]  ;;  %v408_v32 = vld [vmem:[%s5640_s30 + $0x870] sm:$0xff] }
 0x175   : > { %v2942_v38 = vadd.f32 0.5, %v2430_v30  ;;  %v2432_v39 = vmul.f32 0.5, %v4885_v34  ;;  %v4887_v43 = vpop.eup %4886  ;;  %3453 = vst [vmem:[%s5687_s17 + $0x798] sm:$0xff] %v2941_v35  ;;  %4902 = vtanh.f32 %v1417_v37  ;;  %v4079_v46 = vadd.f32 -0.5, %v397_v33 }
 0x176   : > { %v2943_v44 = vadd.f32 0.5, %v2431_v36  ;;  %v4889_v49 = vpop.eup %4888  ;;  %v2433_v51 = vmul.f32 0.5, %v4887_v43  ;;  %4904 = vtanh.f32 %v1418_v40  ;;  %v1419_v52 = vmul.f32 5.0, %v4077_v41 }
 0x177   : > { %3454 = vst [vmem:[%s5687_s17 + $0x7a0] sm:$0xff] %v2942_v38  ;;  %v2944_v50 = vadd.f32 0.5, %v2432_v39  ;;  %v2434_v53 = vmul.f32 0.5, %v4889_v49  ;;  %v1420_v54 = vmul.f32 5.0, %v4078_v45  ;;  %v1421_v55 = vmul.f32 5.0, %v4079_v46  ;;  %v409_v45 = vld [vmem:[%s5640_s30 + $0x878] sm:$0xff] }
 0x178   : > { %3455 = vst [vmem:[%s5687_s17 + $0x7a8] sm:$0xff] %v2943_v44  ;;  %v4080_v56 = vadd.f32 -0.5, %v398_v42  ;;  %v4891_v57 = vpop.eup %4890  ;;  %v2945_v58 = vadd.f32 0.5, %v2433_v51  ;;  %4906 = vtanh.f32 %v1419_v52  ;;  %v4081_v59 = vadd.f32 -0.5, %v399_v47 }
 0x179   : > { %3456 = vst [vmem:[%s5687_s17 + $0x7b0] sm:$0xff] %v2944_v50  ;;  %v4082_v60 = vadd.f32 -0.5, %v400_v48  ;;  %v4893_v62 = vpop.eup %4892  ;;  %v2946_v63 = vadd.f32 0.5, %v2434_v53  ;;  %v2435_v0 = vmul.f32 0.5, %v4891_v57  ;;  %4908 = vtanh.f32 %v1420_v54  ;;  %v410_v50 = vld [vmem:[%s5640_s30 + $0x880] sm:$0xff] }
 0x17a   : > { %v1422_v1 = vmul.f32 5.0, %v4080_v56  ;;  %v4895_v3 = vpop.eup %4894  ;;  %3457 = vst [vmem:[%s5687_s17 + $0x7b8] sm:$0xff] %v2945_v58  ;;  %v2436_v4 = vmul.f32 0.5, %v4893_v62  ;;  %4910 = vtanh.f32 %v1421_v55  ;;  %v1423_v5 = vmul.f32 5.0, %v4081_v59  ;;  %v411_v59 = vld [vmem:[%s5640_s30 + $0x888] sm:$0xff] }
 0x17b   : > { %v1424_v6 = vmul.f32 5.0, %v4082_v60  ;;  %3458 = vst [vmem:[%s5687_s17 + $0x7c0] sm:$0xff] %v2946_v63  ;;  %v2947_v8 = vadd.f32 0.5, %v2435_v0  ;;  %v2437_v9 = vmul.f32 0.5, %v4895_v3  ;;  %v4083_v10 = vadd.f32 -0.5, %v401_v61  ;;  %v412_v0 = vld [vmem:[%s5640_s30 + $0x890] sm:$0xff] }
 0x17c   : > { %v4897_v7 = vpop.eup %4896  ;;  %4912 = vtanh.f32 %v1422_v1  ;;  %v2948_v13 = vadd.f32 0.5, %v2436_v4  ;;  %v4084_v15 = vadd.f32 -0.5, %v402_v2  ;;  %v4085_v25 = vadd.f32 -0.5, %v403_v11  ;;  %v413_v1 = vld [vmem:[%s5640_s30 + $0x898] sm:$0xff] }
 0x17d   : > { %v4899_v12 = vpop.eup %4898  ;;  %v2438_v14 = vmul.f32 0.5, %v4897_v7  ;;  %4914 = vtanh.f32 %v1423_v5  ;;  %3459 = vst [vmem:[%s5687_s17 + $0x7c8] sm:$0xff] %v2947_v8  ;;  %v2949_v19 = vadd.f32 0.5, %v2437_v9  ;;  %v1425_v21 = vmul.f32 5.0, %v4083_v10  ;;  %v414_v10 = vld [vmem:[%s5640_s30 + $0x8a0] sm:$0xff] }
 0x17e   : > { %v4901_v17 = vpop.eup %4900  ;;  %v2439_v20 = vmul.f32 0.5, %v4899_v12  ;;  %4916 = vtanh.f32 %v1424_v6  ;;  %3460 = vst [vmem:[%s5687_s17 + $0x7d0] sm:$0xff] %v2948_v13  ;;  %v1426_v24 = vmul.f32 5.0, %v4084_v15  ;;  %v4086_v29 = vadd.f32 -0.5, %v404_v16  ;;  %v415_v15 = vld [vmem:[%s5640_s30 + $0x8a8] sm:$0xff]  ;;  %v416_v16 = vld [vmem:[%s5640_s30 + $0x8b0] sm:$0xff] }
 0x17f   : > { %v2950_v22 = vadd.f32 0.5, %v2438_v14  ;;  %v2440_v23 = vmul.f32 0.5, %v4901_v17  ;;  %v4903_v27 = vpop.eup %4902  ;;  %3461 = vst [vmem:[%s5687_s17 + $0x7d8] sm:$0xff] %v2949_v19  ;;  %4918 = vtanh.f32 %v1425_v21  ;;  %v4087_v30 = vadd.f32 -0.5, %v405_v18 }
 0x180   : > { %v2951_v28 = vadd.f32 0.5, %v2439_v20  ;;  %v4905_v33 = vpop.eup %4904  ;;  %v2441_v35 = vmul.f32 0.5, %v4903_v27  ;;  %4920 = vtanh.f32 %v1426_v24  ;;  %v1427_v36 = vmul.f32 5.0, %v4085_v25 }
 0x181   : > { %3462 = vst [vmem:[%s5687_s17 + $0x7e0] sm:$0xff] %v2950_v22  ;;  %v2952_v34 = vadd.f32 0.5, %v2440_v23  ;;  %v2442_v37 = vmul.f32 0.5, %v4905_v33  ;;  %v1428_v38 = vmul.f32 5.0, %v4086_v29  ;;  %v1429_v39 = vmul.f32 5.0, %v4087_v30  ;;  %v417_v29 = vld [vmem:[%s5640_s30 + $0x8b8] sm:$0xff] }
 0x182   : > { %3463 = vst [vmem:[%s5687_s17 + $0x7e8] sm:$0xff] %v2951_v28  ;;  %v4088_v40 = vadd.f32 -0.5, %v406_v26  ;;  %v4907_v41 = vpop.eup %4906  ;;  %v2953_v42 = vadd.f32 0.5, %v2441_v35  ;;  %4922 = vtanh.f32 %v1427_v36  ;;  %v4089_v43 = vadd.f32 -0.5, %v407_v31 }
 0x183   : > { %3464 = vst [vmem:[%s5687_s17 + $0x7f0] sm:$0xff] %v2952_v34  ;;  %v4090_v44 = vadd.f32 -0.5, %v408_v32  ;;  %v4909_v46 = vpop.eup %4908  ;;  %v2954_v47 = vadd.f32 0.5, %v2442_v37  ;;  %v2443_v48 = vmul.f32 0.5, %v4907_v41  ;;  %4924 = vtanh.f32 %v1428_v38  ;;  %v418_v34 = vld [vmem:[%s5640_s30 + $0x8c0] sm:$0xff] }
 0x184   : > { %v1430_v49 = vmul.f32 5.0, %v4088_v40  ;;  %v4911_v51 = vpop.eup %4910  ;;  %3465 = vst [vmem:[%s5687_s17 + $0x7f8] sm:$0xff] %v2953_v42  ;;  %v2444_v52 = vmul.f32 0.5, %v4909_v46  ;;  %4926 = vtanh.f32 %v1429_v39  ;;  %v1431_v53 = vmul.f32 5.0, %v4089_v43  ;;  %v419_v43 = vld [vmem:[%s5640_s30 + $0x8c8] sm:$0xff] }
 0x185   : > { %v1432_v54 = vmul.f32 5.0, %v4090_v44  ;;  %3466 = vst [vmem:[%s5687_s17 + $0x800] sm:$0xff] %v2954_v47  ;;  %v2955_v56 = vadd.f32 0.5, %v2443_v48  ;;  %v2445_v57 = vmul.f32 0.5, %v4911_v51  ;;  %v4091_v58 = vadd.f32 -0.5, %v409_v45  ;;  %v420_v48 = vld [vmem:[%s5640_s30 + $0x8d0] sm:$0xff] }
 0x186   : > { %v4913_v55 = vpop.eup %4912  ;;  %4928 = vtanh.f32 %v1430_v49  ;;  %v2956_v61 = vadd.f32 0.5, %v2444_v52  ;;  %v4092_v63 = vadd.f32 -0.5, %v410_v50  ;;  %v4093_v9 = vadd.f32 -0.5, %v411_v59  ;;  %v421_v49 = vld [vmem:[%s5640_s30 + $0x8d8] sm:$0xff] }
 0x187   : > { %v4915_v60 = vpop.eup %4914  ;;  %v2446_v62 = vmul.f32 0.5, %v4913_v55  ;;  %4930 = vtanh.f32 %v1431_v53  ;;  %3467 = vst [vmem:[%s5687_s17 + $0x808] sm:$0xff] %v2955_v56  ;;  %v2957_v3 = vadd.f32 0.5, %v2445_v57  ;;  %v1433_v5 = vmul.f32 5.0, %v4091_v58  ;;  %v422_v58 = vld [vmem:[%s5640_s30 + $0x8e0] sm:$0xff] }
 0x188   : > { %v4917_v2 = vpop.eup %4916  ;;  %v2447_v4 = vmul.f32 0.5, %v4915_v60  ;;  %4932 = vtanh.f32 %v1432_v54  ;;  %3468 = vst [vmem:[%s5687_s17 + $0x810] sm:$0xff] %v2956_v61  ;;  %v1434_v8 = vmul.f32 5.0, %v4092_v63  ;;  %v4094_v13 = vadd.f32 -0.5, %v412_v0  ;;  %v423_v63 = vld [vmem:[%s5640_s30 + $0x8e8] sm:$0xff]  ;;  %v424_v0 = vld [vmem:[%s5640_s30 + $0x8f0] sm:$0xff] }
 0x189   : > { %v2958_v6 = vadd.f32 0.5, %v2446_v62  ;;  %v2448_v7 = vmul.f32 0.5, %v4917_v2  ;;  %v4919_v11 = vpop.eup %4918  ;;  %3469 = vst [vmem:[%s5687_s17 + $0x818] sm:$0xff] %v2957_v3  ;;  %4934 = vtanh.f32 %v1433_v5  ;;  %v4095_v14 = vadd.f32 -0.5, %v413_v1 }
 0x18a   : > { %v2959_v12 = vadd.f32 0.5, %v2447_v4  ;;  %v4921_v18 = vpop.eup %4920  ;;  %v2449_v19 = vmul.f32 0.5, %v4919_v11  ;;  %4936 = vtanh.f32 %v1434_v8  ;;  %v1435_v20 = vmul.f32 5.0, %v4093_v9 }
 0x18b   : > { %3470 = vst [vmem:[%s5687_s17 + $0x820] sm:$0xff] %v2958_v6  ;;  %v2960_v17 = vadd.f32 0.5, %v2448_v7  ;;  %v2450_v21 = vmul.f32 0.5, %v4921_v18  ;;  %v1436_v22 = vmul.f32 5.0, %v4094_v13  ;;  %v1437_v23 = vmul.f32 5.0, %v4095_v14  ;;  %v425_v13 = vld [vmem:[%s5640_s30 + $0x8f8] sm:$0xff] }
 0x18c   : > { %3471 = vst [vmem:[%s5687_s17 + $0x828] sm:$0xff] %v2959_v12  ;;  %v4096_v24 = vadd.f32 -0.5, %v414_v10  ;;  %v4923_v25 = vpop.eup %4922  ;;  %v2961_v26 = vadd.f32 0.5, %v2449_v19  ;;  %4938 = vtanh.f32 %v1435_v20  ;;  %v4097_v27 = vadd.f32 -0.5, %v415_v15 }
 0x18d   : > { %3472 = vst [vmem:[%s5687_s17 + $0x830] sm:$0xff] %v2960_v17  ;;  %v4098_v28 = vadd.f32 -0.5, %v416_v16  ;;  %v4925_v30 = vpop.eup %4924  ;;  %v2962_v31 = vadd.f32 0.5, %v2450_v21  ;;  %v2451_v32 = vmul.f32 0.5, %v4923_v25  ;;  %4940 = vtanh.f32 %v1436_v22  ;;  %v426_v17 = vld [vmem:[%s5640_s30 + $0x900] sm:$0xff] }
 0x18e   : > { %v1438_v33 = vmul.f32 5.0, %v4096_v24  ;;  %v4927_v35 = vpop.eup %4926  ;;  %3473 = vst [vmem:[%s5687_s17 + $0x838] sm:$0xff] %v2961_v26  ;;  %v2452_v36 = vmul.f32 0.5, %v4925_v30  ;;  %4942 = vtanh.f32 %v1437_v23  ;;  %v1439_v37 = vmul.f32 5.0, %v4097_v27  ;;  %v427_v27 = vld [vmem:[%s5640_s30 + $0x908] sm:$0xff] }
 0x18f   : > { %v1440_v38 = vmul.f32 5.0, %v4098_v28  ;;  %3474 = vst [vmem:[%s5687_s17 + $0x840] sm:$0xff] %v2962_v31  ;;  %v2963_v40 = vadd.f32 0.5, %v2451_v32  ;;  %v2453_v41 = vmul.f32 0.5, %v4927_v35  ;;  %v4099_v42 = vadd.f32 -0.5, %v417_v29  ;;  %v428_v32 = vld [vmem:[%s5640_s30 + $0x910] sm:$0xff] }
 0x190   : > { %v4929_v39 = vpop.eup %4928  ;;  %4944 = vtanh.f32 %v1438_v33  ;;  %v2964_v45 = vadd.f32 0.5, %v2452_v36  ;;  %v4100_v47 = vadd.f32 -0.5, %v418_v34  ;;  %v4101_v57 = vadd.f32 -0.5, %v419_v43  ;;  %v429_v33 = vld [vmem:[%s5640_s30 + $0x918] sm:$0xff] }
 0x191   : > { %v4931_v44 = vpop.eup %4930  ;;  %v2454_v46 = vmul.f32 0.5, %v4929_v39  ;;  %4946 = vtanh.f32 %v1439_v37  ;;  %3475 = vst [vmem:[%s5687_s17 + $0x848] sm:$0xff] %v2963_v40  ;;  %v2965_v51 = vadd.f32 0.5, %v2453_v41  ;;  %v1441_v53 = vmul.f32 5.0, %v4099_v42  ;;  %v430_v42 = vld [vmem:[%s5640_s30 + $0x920] sm:$0xff] }
 0x192   : > { %v4933_v50 = vpop.eup %4932  ;;  %v2455_v52 = vmul.f32 0.5, %v4931_v44  ;;  %4948 = vtanh.f32 %v1440_v38  ;;  %3476 = vst [vmem:[%s5687_s17 + $0x850] sm:$0xff] %v2964_v45  ;;  %v1442_v56 = vmul.f32 5.0, %v4100_v47  ;;  %v4102_v61 = vadd.f32 -0.5, %v420_v48  ;;  %v431_v47 = vld [vmem:[%s5640_s30 + $0x928] sm:$0xff]  ;;  %v432_v48 = vld [vmem:[%s5640_s30 + $0x930] sm:$0xff] }
 0x193   : > { %v2966_v54 = vadd.f32 0.5, %v2454_v46  ;;  %v2456_v55 = vmul.f32 0.5, %v4933_v50  ;;  %v4935_v59 = vpop.eup %4934  ;;  %3477 = vst [vmem:[%s5687_s17 + $0x858] sm:$0xff] %v2965_v51  ;;  %4950 = vtanh.f32 %v1441_v53  ;;  %v4103_v62 = vadd.f32 -0.5, %v421_v49 }
 0x194   : > { %v2967_v60 = vadd.f32 0.5, %v2455_v52  ;;  %v4937_v1 = vpop.eup %4936  ;;  %v2457_v3 = vmul.f32 0.5, %v4935_v59  ;;  %4952 = vtanh.f32 %v1442_v56  ;;  %v1443_v4 = vmul.f32 5.0, %v4101_v57 }
 0x195   : > { %3478 = vst [vmem:[%s5687_s17 + $0x860] sm:$0xff] %v2966_v54  ;;  %v2968_v2 = vadd.f32 0.5, %v2456_v55  ;;  %v2458_v5 = vmul.f32 0.5, %v4937_v1  ;;  %v1444_v6 = vmul.f32 5.0, %v4102_v61  ;;  %v1445_v7 = vmul.f32 5.0, %v4103_v62  ;;  %v433_v61 = vld [vmem:[%s5640_s30 + $0x938] sm:$0xff] }
 0x196   : > { %3479 = vst [vmem:[%s5687_s17 + $0x868] sm:$0xff] %v2967_v60  ;;  %v4104_v8 = vadd.f32 -0.5, %v422_v58  ;;  %v4939_v9 = vpop.eup %4938  ;;  %v2969_v10 = vadd.f32 0.5, %v2457_v3  ;;  %4954 = vtanh.f32 %v1443_v4  ;;  %v4105_v11 = vadd.f32 -0.5, %v423_v63 }
 0x197   : > { %3480 = vst [vmem:[%s5687_s17 + $0x870] sm:$0xff] %v2968_v2  ;;  %v4106_v12 = vadd.f32 -0.5, %v424_v0  ;;  %v4941_v14 = vpop.eup %4940  ;;  %v2970_v15 = vadd.f32 0.5, %v2458_v5  ;;  %v2459_v16 = vmul.f32 0.5, %v4939_v9  ;;  %4956 = vtanh.f32 %v1444_v6  ;;  %v434_v2 = vld [vmem:[%s5640_s30 + $0x940] sm:$0xff] }
 0x198   : > { %v1446_v18 = vmul.f32 5.0, %v4104_v8  ;;  %v4943_v19 = vpop.eup %4942  ;;  %3481 = vst [vmem:[%s5687_s17 + $0x878] sm:$0xff] %v2969_v10  ;;  %v2460_v20 = vmul.f32 0.5, %v4941_v14  ;;  %4958 = vtanh.f32 %v1445_v7  ;;  %v1447_v21 = vmul.f32 5.0, %v4105_v11  ;;  %v435_v11 = vld [vmem:[%s5640_s30 + $0x948] sm:$0xff] }
 0x199   : > { %v1448_v22 = vmul.f32 5.0, %v4106_v12  ;;  %3482 = vst [vmem:[%s5687_s17 + $0x880] sm:$0xff] %v2970_v15  ;;  %v2971_v24 = vadd.f32 0.5, %v2459_v16  ;;  %v2461_v25 = vmul.f32 0.5, %v4943_v19  ;;  %v4107_v26 = vadd.f32 -0.5, %v425_v13  ;;  %v436_v16 = vld [vmem:[%s5640_s30 + $0x950] sm:$0xff] }
 0x19a   : > { %v4945_v23 = vpop.eup %4944  ;;  %4960 = vtanh.f32 %v1446_v18  ;;  %v2972_v29 = vadd.f32 0.5, %v2460_v20  ;;  %v4108_v31 = vadd.f32 -0.5, %v426_v17  ;;  %v4109_v41 = vadd.f32 -0.5, %v427_v27  ;;  %v437_v18 = vld [vmem:[%s5640_s30 + $0x958] sm:$0xff] }
 0x19b   : > { %v4947_v28 = vpop.eup %4946  ;;  %v2462_v30 = vmul.f32 0.5, %v4945_v23  ;;  %4962 = vtanh.f32 %v1447_v21  ;;  %3483 = vst [vmem:[%s5687_s17 + $0x888] sm:$0xff] %v2971_v24  ;;  %v2973_v35 = vadd.f32 0.5, %v2461_v25  ;;  %v1449_v37 = vmul.f32 5.0, %v4107_v26  ;;  %v438_v26 = vld [vmem:[%s5640_s30 + $0x960] sm:$0xff] }
 0x19c   : > { %v4949_v34 = vpop.eup %4948  ;;  %v2463_v36 = vmul.f32 0.5, %v4947_v28  ;;  %4964 = vtanh.f32 %v1448_v22  ;;  %3484 = vst [vmem:[%s5687_s17 + $0x890] sm:$0xff] %v2972_v29  ;;  %v1450_v40 = vmul.f32 5.0, %v4108_v31  ;;  %v4110_v45 = vadd.f32 -0.5, %v428_v32  ;;  %v439_v31 = vld [vmem:[%s5640_s30 + $0x968] sm:$0xff]  ;;  %v440_v32 = vld [vmem:[%s5640_s30 + $0x970] sm:$0xff] }
 0x19d   : > { %v2974_v38 = vadd.f32 0.5, %v2462_v30  ;;  %v2464_v39 = vmul.f32 0.5, %v4949_v34  ;;  %v4951_v43 = vpop.eup %4950  ;;  %3485 = vst [vmem:[%s5687_s17 + $0x898] sm:$0xff] %v2973_v35  ;;  %4966 = vtanh.f32 %v1449_v37  ;;  %v4111_v46 = vadd.f32 -0.5, %v429_v33 }
 0x19e   : > { %v2975_v44 = vadd.f32 0.5, %v2463_v36  ;;  %v4953_v49 = vpop.eup %4952  ;;  %v2465_v51 = vmul.f32 0.5, %v4951_v43  ;;  %4968 = vtanh.f32 %v1450_v40  ;;  %v1451_v52 = vmul.f32 5.0, %v4109_v41 }
 0x19f   : > { %3486 = vst [vmem:[%s5687_s17 + $0x8a0] sm:$0xff] %v2974_v38  ;;  %v2976_v50 = vadd.f32 0.5, %v2464_v39  ;;  %v2466_v53 = vmul.f32 0.5, %v4953_v49  ;;  %v1452_v54 = vmul.f32 5.0, %v4110_v45  ;;  %v1453_v55 = vmul.f32 5.0, %v4111_v46  ;;  %v441_v45 = vld [vmem:[%s5640_s30 + $0x978] sm:$0xff] }
 0x1a0   : > { %3487 = vst [vmem:[%s5687_s17 + $0x8a8] sm:$0xff] %v2975_v44  ;;  %v4112_v56 = vadd.f32 -0.5, %v430_v42  ;;  %v4955_v57 = vpop.eup %4954  ;;  %v2977_v58 = vadd.f32 0.5, %v2465_v51  ;;  %4970 = vtanh.f32 %v1451_v52  ;;  %v4113_v59 = vadd.f32 -0.5, %v431_v47 }
 0x1a1   : > { %3488 = vst [vmem:[%s5687_s17 + $0x8b0] sm:$0xff] %v2976_v50  ;;  %v4114_v60 = vadd.f32 -0.5, %v432_v48  ;;  %v4957_v62 = vpop.eup %4956  ;;  %v2978_v63 = vadd.f32 0.5, %v2466_v53  ;;  %v2467_v0 = vmul.f32 0.5, %v4955_v57  ;;  %4972 = vtanh.f32 %v1452_v54  ;;  %v442_v50 = vld [vmem:[%s5640_s30 + $0x980] sm:$0xff] }
 0x1a2   : > { %v1454_v1 = vmul.f32 5.0, %v4112_v56  ;;  %v4959_v3 = vpop.eup %4958  ;;  %3489 = vst [vmem:[%s5687_s17 + $0x8b8] sm:$0xff] %v2977_v58  ;;  %v2468_v4 = vmul.f32 0.5, %v4957_v62  ;;  %4974 = vtanh.f32 %v1453_v55  ;;  %v1455_v5 = vmul.f32 5.0, %v4113_v59  ;;  %v443_v59 = vld [vmem:[%s5640_s30 + $0x988] sm:$0xff] }
 0x1a3   : > { %v1456_v6 = vmul.f32 5.0, %v4114_v60  ;;  %3490 = vst [vmem:[%s5687_s17 + $0x8c0] sm:$0xff] %v2978_v63  ;;  %v2979_v8 = vadd.f32 0.5, %v2467_v0  ;;  %v2469_v9 = vmul.f32 0.5, %v4959_v3  ;;  %v4115_v10 = vadd.f32 -0.5, %v433_v61  ;;  %v444_v0 = vld [vmem:[%s5640_s30 + $0x990] sm:$0xff] }
 0x1a4   : > { %v4961_v7 = vpop.eup %4960  ;;  %4976 = vtanh.f32 %v1454_v1  ;;  %v2980_v13 = vadd.f32 0.5, %v2468_v4  ;;  %v4116_v15 = vadd.f32 -0.5, %v434_v2  ;;  %v4117_v25 = vadd.f32 -0.5, %v435_v11  ;;  %v445_v1 = vld [vmem:[%s5640_s30 + $0x998] sm:$0xff] }
 0x1a5   : > { %v4963_v12 = vpop.eup %4962  ;;  %v2470_v14 = vmul.f32 0.5, %v4961_v7  ;;  %4978 = vtanh.f32 %v1455_v5  ;;  %3491 = vst [vmem:[%s5687_s17 + $0x8c8] sm:$0xff] %v2979_v8  ;;  %v2981_v19 = vadd.f32 0.5, %v2469_v9  ;;  %v1457_v21 = vmul.f32 5.0, %v4115_v10  ;;  %v446_v10 = vld [vmem:[%s5640_s30 + $0x9a0] sm:$0xff] }
 0x1a6   : > { %v4965_v17 = vpop.eup %4964  ;;  %v2471_v20 = vmul.f32 0.5, %v4963_v12  ;;  %4980 = vtanh.f32 %v1456_v6  ;;  %3492 = vst [vmem:[%s5687_s17 + $0x8d0] sm:$0xff] %v2980_v13  ;;  %v1458_v24 = vmul.f32 5.0, %v4116_v15  ;;  %v4118_v29 = vadd.f32 -0.5, %v436_v16  ;;  %v447_v15 = vld [vmem:[%s5640_s30 + $0x9a8] sm:$0xff]  ;;  %v448_v16 = vld [vmem:[%s5640_s30 + $0x9b0] sm:$0xff] }
 0x1a7   : > { %v2982_v22 = vadd.f32 0.5, %v2470_v14  ;;  %v2472_v23 = vmul.f32 0.5, %v4965_v17  ;;  %v4967_v27 = vpop.eup %4966  ;;  %3493 = vst [vmem:[%s5687_s17 + $0x8d8] sm:$0xff] %v2981_v19  ;;  %4982 = vtanh.f32 %v1457_v21  ;;  %v4119_v30 = vadd.f32 -0.5, %v437_v18 }
 0x1a8   : > { %v2983_v28 = vadd.f32 0.5, %v2471_v20  ;;  %v4969_v33 = vpop.eup %4968  ;;  %v2473_v35 = vmul.f32 0.5, %v4967_v27  ;;  %4984 = vtanh.f32 %v1458_v24  ;;  %v1459_v36 = vmul.f32 5.0, %v4117_v25 }
 0x1a9   : > { %3494 = vst [vmem:[%s5687_s17 + $0x8e0] sm:$0xff] %v2982_v22  ;;  %v2984_v34 = vadd.f32 0.5, %v2472_v23  ;;  %v2474_v37 = vmul.f32 0.5, %v4969_v33  ;;  %v1460_v38 = vmul.f32 5.0, %v4118_v29  ;;  %v1461_v39 = vmul.f32 5.0, %v4119_v30  ;;  %v449_v29 = vld [vmem:[%s5640_s30 + $0x9b8] sm:$0xff] }
 0x1aa   : > { %3495 = vst [vmem:[%s5687_s17 + $0x8e8] sm:$0xff] %v2983_v28  ;;  %v4120_v40 = vadd.f32 -0.5, %v438_v26  ;;  %v4971_v41 = vpop.eup %4970  ;;  %v2985_v42 = vadd.f32 0.5, %v2473_v35  ;;  %4986 = vtanh.f32 %v1459_v36  ;;  %v4121_v43 = vadd.f32 -0.5, %v439_v31 }
 0x1ab   : > { %3496 = vst [vmem:[%s5687_s17 + $0x8f0] sm:$0xff] %v2984_v34  ;;  %v4122_v44 = vadd.f32 -0.5, %v440_v32  ;;  %v4973_v46 = vpop.eup %4972  ;;  %v2986_v47 = vadd.f32 0.5, %v2474_v37  ;;  %v2475_v48 = vmul.f32 0.5, %v4971_v41  ;;  %4988 = vtanh.f32 %v1460_v38  ;;  %v450_v34 = vld [vmem:[%s5640_s30 + $0x9c0] sm:$0xff] }
 0x1ac   : > { %v1462_v49 = vmul.f32 5.0, %v4120_v40  ;;  %v4975_v51 = vpop.eup %4974  ;;  %3497 = vst [vmem:[%s5687_s17 + $0x8f8] sm:$0xff] %v2985_v42  ;;  %v2476_v52 = vmul.f32 0.5, %v4973_v46  ;;  %4990 = vtanh.f32 %v1461_v39  ;;  %v1463_v53 = vmul.f32 5.0, %v4121_v43  ;;  %v451_v43 = vld [vmem:[%s5640_s30 + $0x9c8] sm:$0xff] }
 0x1ad   : > { %v1464_v54 = vmul.f32 5.0, %v4122_v44  ;;  %3498 = vst [vmem:[%s5687_s17 + $0x900] sm:$0xff] %v2986_v47  ;;  %v2987_v56 = vadd.f32 0.5, %v2475_v48  ;;  %v2477_v57 = vmul.f32 0.5, %v4975_v51  ;;  %v4123_v58 = vadd.f32 -0.5, %v441_v45  ;;  %v452_v48 = vld [vmem:[%s5640_s30 + $0x9d0] sm:$0xff] }
 0x1ae   : > { %v4977_v55 = vpop.eup %4976  ;;  %4992 = vtanh.f32 %v1462_v49  ;;  %v2988_v61 = vadd.f32 0.5, %v2476_v52  ;;  %v4124_v63 = vadd.f32 -0.5, %v442_v50  ;;  %v4125_v9 = vadd.f32 -0.5, %v443_v59  ;;  %v453_v49 = vld [vmem:[%s5640_s30 + $0x9d8] sm:$0xff] }
 0x1af   : > { %v4979_v60 = vpop.eup %4978  ;;  %v2478_v62 = vmul.f32 0.5, %v4977_v55  ;;  %4994 = vtanh.f32 %v1463_v53  ;;  %3499 = vst [vmem:[%s5687_s17 + $0x908] sm:$0xff] %v2987_v56  ;;  %v2989_v3 = vadd.f32 0.5, %v2477_v57  ;;  %v1465_v5 = vmul.f32 5.0, %v4123_v58  ;;  %v454_v58 = vld [vmem:[%s5640_s30 + $0x9e0] sm:$0xff] }
 0x1b0   : > { %v4981_v2 = vpop.eup %4980  ;;  %v2479_v4 = vmul.f32 0.5, %v4979_v60  ;;  %4996 = vtanh.f32 %v1464_v54  ;;  %3500 = vst [vmem:[%s5687_s17 + $0x910] sm:$0xff] %v2988_v61  ;;  %v1466_v8 = vmul.f32 5.0, %v4124_v63  ;;  %v4126_v13 = vadd.f32 -0.5, %v444_v0  ;;  %v455_v63 = vld [vmem:[%s5640_s30 + $0x9e8] sm:$0xff]  ;;  %v456_v0 = vld [vmem:[%s5640_s30 + $0x9f0] sm:$0xff] }
 0x1b1   : > { %v2990_v6 = vadd.f32 0.5, %v2478_v62  ;;  %v2480_v7 = vmul.f32 0.5, %v4981_v2  ;;  %v4983_v11 = vpop.eup %4982  ;;  %3501 = vst [vmem:[%s5687_s17 + $0x918] sm:$0xff] %v2989_v3  ;;  %4998 = vtanh.f32 %v1465_v5  ;;  %v4127_v14 = vadd.f32 -0.5, %v445_v1 }
 0x1b2   : > { %v2991_v12 = vadd.f32 0.5, %v2479_v4  ;;  %v4985_v18 = vpop.eup %4984  ;;  %v2481_v19 = vmul.f32 0.5, %v4983_v11  ;;  %5000 = vtanh.f32 %v1466_v8  ;;  %v1467_v20 = vmul.f32 5.0, %v4125_v9 }
 0x1b3   : > { %3502 = vst [vmem:[%s5687_s17 + $0x920] sm:$0xff] %v2990_v6  ;;  %v2992_v17 = vadd.f32 0.5, %v2480_v7  ;;  %v2482_v21 = vmul.f32 0.5, %v4985_v18  ;;  %v1468_v22 = vmul.f32 5.0, %v4126_v13  ;;  %v1469_v23 = vmul.f32 5.0, %v4127_v14  ;;  %v457_v13 = vld [vmem:[%s5640_s30 + $0x9f8] sm:$0xff] }
 0x1b4   : > { %3503 = vst [vmem:[%s5687_s17 + $0x928] sm:$0xff] %v2991_v12  ;;  %v4128_v24 = vadd.f32 -0.5, %v446_v10  ;;  %v4987_v25 = vpop.eup %4986  ;;  %v2993_v26 = vadd.f32 0.5, %v2481_v19  ;;  %5002 = vtanh.f32 %v1467_v20  ;;  %v4129_v27 = vadd.f32 -0.5, %v447_v15 }
 0x1b5   : > { %3504 = vst [vmem:[%s5687_s17 + $0x930] sm:$0xff] %v2992_v17  ;;  %v4130_v28 = vadd.f32 -0.5, %v448_v16  ;;  %v4989_v30 = vpop.eup %4988  ;;  %v2994_v31 = vadd.f32 0.5, %v2482_v21  ;;  %v2483_v32 = vmul.f32 0.5, %v4987_v25  ;;  %5004 = vtanh.f32 %v1468_v22  ;;  %v458_v17 = vld [vmem:[%s5640_s30 + $0xa00] sm:$0xff] }
 0x1b6   : > { %v1470_v33 = vmul.f32 5.0, %v4128_v24  ;;  %v4991_v35 = vpop.eup %4990  ;;  %3505 = vst [vmem:[%s5687_s17 + $0x938] sm:$0xff] %v2993_v26  ;;  %v2484_v36 = vmul.f32 0.5, %v4989_v30  ;;  %5006 = vtanh.f32 %v1469_v23  ;;  %v1471_v37 = vmul.f32 5.0, %v4129_v27  ;;  %v459_v27 = vld [vmem:[%s5640_s30 + $0xa08] sm:$0xff] }
 0x1b7   : > { %v1472_v38 = vmul.f32 5.0, %v4130_v28  ;;  %3506 = vst [vmem:[%s5687_s17 + $0x940] sm:$0xff] %v2994_v31  ;;  %v2995_v40 = vadd.f32 0.5, %v2483_v32  ;;  %v2485_v41 = vmul.f32 0.5, %v4991_v35  ;;  %v4131_v42 = vadd.f32 -0.5, %v449_v29  ;;  %v460_v32 = vld [vmem:[%s5640_s30 + $0xa10] sm:$0xff] }
 0x1b8   : > { %v4993_v39 = vpop.eup %4992  ;;  %5008 = vtanh.f32 %v1470_v33  ;;  %v2996_v45 = vadd.f32 0.5, %v2484_v36  ;;  %v4132_v47 = vadd.f32 -0.5, %v450_v34  ;;  %v4133_v57 = vadd.f32 -0.5, %v451_v43  ;;  %v461_v33 = vld [vmem:[%s5640_s30 + $0xa18] sm:$0xff] }
 0x1b9   : > { %v4995_v44 = vpop.eup %4994  ;;  %v2486_v46 = vmul.f32 0.5, %v4993_v39  ;;  %5010 = vtanh.f32 %v1471_v37  ;;  %3507 = vst [vmem:[%s5687_s17 + $0x948] sm:$0xff] %v2995_v40  ;;  %v2997_v51 = vadd.f32 0.5, %v2485_v41  ;;  %v1473_v53 = vmul.f32 5.0, %v4131_v42  ;;  %v462_v42 = vld [vmem:[%s5640_s30 + $0xa20] sm:$0xff] }
 0x1ba   : > { %v4997_v50 = vpop.eup %4996  ;;  %v2487_v52 = vmul.f32 0.5, %v4995_v44  ;;  %5012 = vtanh.f32 %v1472_v38  ;;  %3508 = vst [vmem:[%s5687_s17 + $0x950] sm:$0xff] %v2996_v45  ;;  %v1474_v56 = vmul.f32 5.0, %v4132_v47  ;;  %v4134_v61 = vadd.f32 -0.5, %v452_v48  ;;  %v463_v47 = vld [vmem:[%s5640_s30 + $0xa28] sm:$0xff]  ;;  %v464_v48 = vld [vmem:[%s5640_s30 + $0xa30] sm:$0xff] }
 0x1bb   : > { %v2998_v54 = vadd.f32 0.5, %v2486_v46  ;;  %v2488_v55 = vmul.f32 0.5, %v4997_v50  ;;  %v4999_v59 = vpop.eup %4998  ;;  %3509 = vst [vmem:[%s5687_s17 + $0x958] sm:$0xff] %v2997_v51  ;;  %5014 = vtanh.f32 %v1473_v53  ;;  %v4135_v62 = vadd.f32 -0.5, %v453_v49 }
 0x1bc   : > { %v2999_v60 = vadd.f32 0.5, %v2487_v52  ;;  %v5001_v1 = vpop.eup %5000  ;;  %v2489_v3 = vmul.f32 0.5, %v4999_v59  ;;  %5016 = vtanh.f32 %v1474_v56  ;;  %v1475_v4 = vmul.f32 5.0, %v4133_v57 }
 0x1bd   : > { %3510 = vst [vmem:[%s5687_s17 + $0x960] sm:$0xff] %v2998_v54  ;;  %v3000_v2 = vadd.f32 0.5, %v2488_v55  ;;  %v2490_v5 = vmul.f32 0.5, %v5001_v1  ;;  %v1476_v6 = vmul.f32 5.0, %v4134_v61  ;;  %v1477_v7 = vmul.f32 5.0, %v4135_v62  ;;  %v465_v61 = vld [vmem:[%s5640_s30 + $0xa38] sm:$0xff] }
 0x1be   : > { %3511 = vst [vmem:[%s5687_s17 + $0x968] sm:$0xff] %v2999_v60  ;;  %v4136_v8 = vadd.f32 -0.5, %v454_v58  ;;  %v5003_v9 = vpop.eup %5002  ;;  %v3001_v10 = vadd.f32 0.5, %v2489_v3  ;;  %5018 = vtanh.f32 %v1475_v4  ;;  %v4137_v11 = vadd.f32 -0.5, %v455_v63 }
 0x1bf   : > { %3512 = vst [vmem:[%s5687_s17 + $0x970] sm:$0xff] %v3000_v2  ;;  %v4138_v12 = vadd.f32 -0.5, %v456_v0  ;;  %v5005_v14 = vpop.eup %5004  ;;  %v3002_v15 = vadd.f32 0.5, %v2490_v5  ;;  %v2491_v16 = vmul.f32 0.5, %v5003_v9  ;;  %5020 = vtanh.f32 %v1476_v6  ;;  %v466_v2 = vld [vmem:[%s5640_s30 + $0xa40] sm:$0xff] }
 0x1c0   : > { %v1478_v18 = vmul.f32 5.0, %v4136_v8  ;;  %v5007_v19 = vpop.eup %5006  ;;  %3513 = vst [vmem:[%s5687_s17 + $0x978] sm:$0xff] %v3001_v10  ;;  %v2492_v20 = vmul.f32 0.5, %v5005_v14  ;;  %5022 = vtanh.f32 %v1477_v7  ;;  %v1479_v21 = vmul.f32 5.0, %v4137_v11  ;;  %v467_v11 = vld [vmem:[%s5640_s30 + $0xa48] sm:$0xff] }
 0x1c1   : > { %v1480_v22 = vmul.f32 5.0, %v4138_v12  ;;  %3514 = vst [vmem:[%s5687_s17 + $0x980] sm:$0xff] %v3002_v15  ;;  %v3003_v24 = vadd.f32 0.5, %v2491_v16  ;;  %v2493_v25 = vmul.f32 0.5, %v5007_v19  ;;  %v4139_v26 = vadd.f32 -0.5, %v457_v13  ;;  %v468_v16 = vld [vmem:[%s5640_s30 + $0xa50] sm:$0xff] }
 0x1c2   : > { %v5009_v23 = vpop.eup %5008  ;;  %5024 = vtanh.f32 %v1478_v18  ;;  %v3004_v29 = vadd.f32 0.5, %v2492_v20  ;;  %v4140_v31 = vadd.f32 -0.5, %v458_v17  ;;  %v4141_v41 = vadd.f32 -0.5, %v459_v27  ;;  %v469_v18 = vld [vmem:[%s5640_s30 + $0xa58] sm:$0xff] }
 0x1c3   : > { %v5011_v28 = vpop.eup %5010  ;;  %v2494_v30 = vmul.f32 0.5, %v5009_v23  ;;  %5026 = vtanh.f32 %v1479_v21  ;;  %3515 = vst [vmem:[%s5687_s17 + $0x988] sm:$0xff] %v3003_v24  ;;  %v3005_v35 = vadd.f32 0.5, %v2493_v25  ;;  %v1481_v37 = vmul.f32 5.0, %v4139_v26  ;;  %v470_v26 = vld [vmem:[%s5640_s30 + $0xa60] sm:$0xff] }
 0x1c4   : > { %v5013_v34 = vpop.eup %5012  ;;  %v2495_v36 = vmul.f32 0.5, %v5011_v28  ;;  %5028 = vtanh.f32 %v1480_v22  ;;  %3516 = vst [vmem:[%s5687_s17 + $0x990] sm:$0xff] %v3004_v29  ;;  %v1482_v40 = vmul.f32 5.0, %v4140_v31  ;;  %v4142_v45 = vadd.f32 -0.5, %v460_v32  ;;  %v471_v31 = vld [vmem:[%s5640_s30 + $0xa68] sm:$0xff]  ;;  %v472_v32 = vld [vmem:[%s5640_s30 + $0xa70] sm:$0xff] }
 0x1c5   : > { %v3006_v38 = vadd.f32 0.5, %v2494_v30  ;;  %v2496_v39 = vmul.f32 0.5, %v5013_v34  ;;  %v5015_v43 = vpop.eup %5014  ;;  %3517 = vst [vmem:[%s5687_s17 + $0x998] sm:$0xff] %v3005_v35  ;;  %5030 = vtanh.f32 %v1481_v37  ;;  %v4143_v46 = vadd.f32 -0.5, %v461_v33 }
 0x1c6   : > { %v3007_v44 = vadd.f32 0.5, %v2495_v36  ;;  %v5017_v49 = vpop.eup %5016  ;;  %v2497_v51 = vmul.f32 0.5, %v5015_v43  ;;  %5032 = vtanh.f32 %v1482_v40  ;;  %v1483_v52 = vmul.f32 5.0, %v4141_v41 }
 0x1c7   : > { %3518 = vst [vmem:[%s5687_s17 + $0x9a0] sm:$0xff] %v3006_v38  ;;  %v3008_v50 = vadd.f32 0.5, %v2496_v39  ;;  %v2498_v53 = vmul.f32 0.5, %v5017_v49  ;;  %v1484_v54 = vmul.f32 5.0, %v4142_v45  ;;  %v1485_v55 = vmul.f32 5.0, %v4143_v46  ;;  %v473_v45 = vld [vmem:[%s5640_s30 + $0xa78] sm:$0xff] }
 0x1c8   : > { %3519 = vst [vmem:[%s5687_s17 + $0x9a8] sm:$0xff] %v3007_v44  ;;  %v4144_v56 = vadd.f32 -0.5, %v462_v42  ;;  %v5019_v57 = vpop.eup %5018  ;;  %v3009_v58 = vadd.f32 0.5, %v2497_v51  ;;  %5034 = vtanh.f32 %v1483_v52  ;;  %v4145_v59 = vadd.f32 -0.5, %v463_v47 }
 0x1c9   : > { %3520 = vst [vmem:[%s5687_s17 + $0x9b0] sm:$0xff] %v3008_v50  ;;  %v4146_v60 = vadd.f32 -0.5, %v464_v48  ;;  %v5021_v62 = vpop.eup %5020  ;;  %v3010_v63 = vadd.f32 0.5, %v2498_v53  ;;  %v2499_v0 = vmul.f32 0.5, %v5019_v57  ;;  %5036 = vtanh.f32 %v1484_v54  ;;  %v474_v50 = vld [vmem:[%s5640_s30 + $0xa80] sm:$0xff] }
 0x1ca   : > { %v1486_v1 = vmul.f32 5.0, %v4144_v56  ;;  %v5023_v3 = vpop.eup %5022  ;;  %3521 = vst [vmem:[%s5687_s17 + $0x9b8] sm:$0xff] %v3009_v58  ;;  %v2500_v4 = vmul.f32 0.5, %v5021_v62  ;;  %5038 = vtanh.f32 %v1485_v55  ;;  %v1487_v5 = vmul.f32 5.0, %v4145_v59  ;;  %v475_v59 = vld [vmem:[%s5640_s30 + $0xa88] sm:$0xff] }
 0x1cb   : > { %v1488_v6 = vmul.f32 5.0, %v4146_v60  ;;  %3522 = vst [vmem:[%s5687_s17 + $0x9c0] sm:$0xff] %v3010_v63  ;;  %v3011_v8 = vadd.f32 0.5, %v2499_v0  ;;  %v2501_v9 = vmul.f32 0.5, %v5023_v3  ;;  %v4147_v10 = vadd.f32 -0.5, %v465_v61  ;;  %v476_v0 = vld [vmem:[%s5640_s30 + $0xa90] sm:$0xff] }
 0x1cc   : > { %v5025_v7 = vpop.eup %5024  ;;  %5040 = vtanh.f32 %v1486_v1  ;;  %v3012_v13 = vadd.f32 0.5, %v2500_v4  ;;  %v4148_v15 = vadd.f32 -0.5, %v466_v2  ;;  %v4149_v25 = vadd.f32 -0.5, %v467_v11  ;;  %v477_v1 = vld [vmem:[%s5640_s30 + $0xa98] sm:$0xff] }
 0x1cd   : > { %v5027_v12 = vpop.eup %5026  ;;  %v2502_v14 = vmul.f32 0.5, %v5025_v7  ;;  %5042 = vtanh.f32 %v1487_v5  ;;  %3523 = vst [vmem:[%s5687_s17 + $0x9c8] sm:$0xff] %v3011_v8  ;;  %v3013_v19 = vadd.f32 0.5, %v2501_v9  ;;  %v1489_v21 = vmul.f32 5.0, %v4147_v10  ;;  %v478_v10 = vld [vmem:[%s5640_s30 + $0xaa0] sm:$0xff] }
 0x1ce   : > { %v5029_v17 = vpop.eup %5028  ;;  %v2503_v20 = vmul.f32 0.5, %v5027_v12  ;;  %5044 = vtanh.f32 %v1488_v6  ;;  %3524 = vst [vmem:[%s5687_s17 + $0x9d0] sm:$0xff] %v3012_v13  ;;  %v1490_v24 = vmul.f32 5.0, %v4148_v15  ;;  %v4150_v29 = vadd.f32 -0.5, %v468_v16  ;;  %v479_v15 = vld [vmem:[%s5640_s30 + $0xaa8] sm:$0xff]  ;;  %v480_v16 = vld [vmem:[%s5640_s30 + $0xab0] sm:$0xff] }
 0x1cf   : > { %v3014_v22 = vadd.f32 0.5, %v2502_v14  ;;  %v2504_v23 = vmul.f32 0.5, %v5029_v17  ;;  %v5031_v27 = vpop.eup %5030  ;;  %3525 = vst [vmem:[%s5687_s17 + $0x9d8] sm:$0xff] %v3013_v19  ;;  %5046 = vtanh.f32 %v1489_v21  ;;  %v4151_v30 = vadd.f32 -0.5, %v469_v18 }
 0x1d0   : > { %v3015_v28 = vadd.f32 0.5, %v2503_v20  ;;  %v5033_v33 = vpop.eup %5032  ;;  %v2505_v35 = vmul.f32 0.5, %v5031_v27  ;;  %5048 = vtanh.f32 %v1490_v24  ;;  %v1491_v36 = vmul.f32 5.0, %v4149_v25 }
 0x1d1   : > { %3526 = vst [vmem:[%s5687_s17 + $0x9e0] sm:$0xff] %v3014_v22  ;;  %v3016_v34 = vadd.f32 0.5, %v2504_v23  ;;  %v2506_v37 = vmul.f32 0.5, %v5033_v33  ;;  %v1492_v38 = vmul.f32 5.0, %v4150_v29  ;;  %v1493_v39 = vmul.f32 5.0, %v4151_v30  ;;  %v481_v29 = vld [vmem:[%s5640_s30 + $0xab8] sm:$0xff] }
 0x1d2   : > { %3527 = vst [vmem:[%s5687_s17 + $0x9e8] sm:$0xff] %v3015_v28  ;;  %v4152_v40 = vadd.f32 -0.5, %v470_v26  ;;  %v5035_v41 = vpop.eup %5034  ;;  %v3017_v42 = vadd.f32 0.5, %v2505_v35  ;;  %5050 = vtanh.f32 %v1491_v36  ;;  %v4153_v43 = vadd.f32 -0.5, %v471_v31 }
 0x1d3   : > { %3528 = vst [vmem:[%s5687_s17 + $0x9f0] sm:$0xff] %v3016_v34  ;;  %v4154_v44 = vadd.f32 -0.5, %v472_v32  ;;  %v5037_v46 = vpop.eup %5036  ;;  %v3018_v47 = vadd.f32 0.5, %v2506_v37  ;;  %v2507_v48 = vmul.f32 0.5, %v5035_v41  ;;  %5052 = vtanh.f32 %v1492_v38  ;;  %v482_v34 = vld [vmem:[%s5640_s30 + $0xac0] sm:$0xff] }
 0x1d4   : > { %v1494_v49 = vmul.f32 5.0, %v4152_v40  ;;  %v5039_v51 = vpop.eup %5038  ;;  %3529 = vst [vmem:[%s5687_s17 + $0x9f8] sm:$0xff] %v3017_v42  ;;  %v2508_v52 = vmul.f32 0.5, %v5037_v46  ;;  %5054 = vtanh.f32 %v1493_v39  ;;  %v1495_v53 = vmul.f32 5.0, %v4153_v43  ;;  %v483_v43 = vld [vmem:[%s5640_s30 + $0xac8] sm:$0xff] }
 0x1d5   : > { %v1496_v54 = vmul.f32 5.0, %v4154_v44  ;;  %3530 = vst [vmem:[%s5687_s17 + $0xa00] sm:$0xff] %v3018_v47  ;;  %v3019_v56 = vadd.f32 0.5, %v2507_v48  ;;  %v2509_v57 = vmul.f32 0.5, %v5039_v51  ;;  %v4155_v58 = vadd.f32 -0.5, %v473_v45  ;;  %v484_v48 = vld [vmem:[%s5640_s30 + $0xad0] sm:$0xff] }
 0x1d6   : > { %v5041_v55 = vpop.eup %5040  ;;  %5056 = vtanh.f32 %v1494_v49  ;;  %v3020_v61 = vadd.f32 0.5, %v2508_v52  ;;  %v4156_v63 = vadd.f32 -0.5, %v474_v50  ;;  %v4157_v9 = vadd.f32 -0.5, %v475_v59  ;;  %v485_v49 = vld [vmem:[%s5640_s30 + $0xad8] sm:$0xff] }
 0x1d7   : > { %v5043_v60 = vpop.eup %5042  ;;  %v2510_v62 = vmul.f32 0.5, %v5041_v55  ;;  %5058 = vtanh.f32 %v1495_v53  ;;  %3531 = vst [vmem:[%s5687_s17 + $0xa08] sm:$0xff] %v3019_v56  ;;  %v3021_v3 = vadd.f32 0.5, %v2509_v57  ;;  %v1497_v5 = vmul.f32 5.0, %v4155_v58  ;;  %v486_v58 = vld [vmem:[%s5640_s30 + $0xae0] sm:$0xff] }
 0x1d8   : > { %v5045_v2 = vpop.eup %5044  ;;  %v2511_v4 = vmul.f32 0.5, %v5043_v60  ;;  %5060 = vtanh.f32 %v1496_v54  ;;  %3532 = vst [vmem:[%s5687_s17 + $0xa10] sm:$0xff] %v3020_v61  ;;  %v1498_v8 = vmul.f32 5.0, %v4156_v63  ;;  %v4158_v13 = vadd.f32 -0.5, %v476_v0  ;;  %v487_v63 = vld [vmem:[%s5640_s30 + $0xae8] sm:$0xff]  ;;  %v488_v0 = vld [vmem:[%s5640_s30 + $0xaf0] sm:$0xff] }
 0x1d9   : > { %v3022_v6 = vadd.f32 0.5, %v2510_v62  ;;  %v2512_v7 = vmul.f32 0.5, %v5045_v2  ;;  %v5047_v11 = vpop.eup %5046  ;;  %3533 = vst [vmem:[%s5687_s17 + $0xa18] sm:$0xff] %v3021_v3  ;;  %5062 = vtanh.f32 %v1497_v5  ;;  %v4159_v14 = vadd.f32 -0.5, %v477_v1 }
 0x1da   : > { %v3023_v12 = vadd.f32 0.5, %v2511_v4  ;;  %v5049_v18 = vpop.eup %5048  ;;  %v2513_v19 = vmul.f32 0.5, %v5047_v11  ;;  %5064 = vtanh.f32 %v1498_v8  ;;  %v1499_v20 = vmul.f32 5.0, %v4157_v9 }
 0x1db   : > { %3534 = vst [vmem:[%s5687_s17 + $0xa20] sm:$0xff] %v3022_v6  ;;  %v3024_v17 = vadd.f32 0.5, %v2512_v7  ;;  %v2514_v21 = vmul.f32 0.5, %v5049_v18  ;;  %v1500_v22 = vmul.f32 5.0, %v4158_v13  ;;  %v1501_v23 = vmul.f32 5.0, %v4159_v14  ;;  %v489_v13 = vld [vmem:[%s5640_s30 + $0xaf8] sm:$0xff] }
 0x1dc   : > { %3535 = vst [vmem:[%s5687_s17 + $0xa28] sm:$0xff] %v3023_v12  ;;  %v4160_v24 = vadd.f32 -0.5, %v478_v10  ;;  %v5051_v25 = vpop.eup %5050  ;;  %v3025_v26 = vadd.f32 0.5, %v2513_v19  ;;  %5066 = vtanh.f32 %v1499_v20  ;;  %v4161_v27 = vadd.f32 -0.5, %v479_v15 }
 0x1dd   : > { %3536 = vst [vmem:[%s5687_s17 + $0xa30] sm:$0xff] %v3024_v17  ;;  %v4162_v28 = vadd.f32 -0.5, %v480_v16  ;;  %v5053_v30 = vpop.eup %5052  ;;  %v3026_v31 = vadd.f32 0.5, %v2514_v21  ;;  %v2515_v32 = vmul.f32 0.5, %v5051_v25  ;;  %5068 = vtanh.f32 %v1500_v22  ;;  %v490_v17 = vld [vmem:[%s5640_s30 + $0xb00] sm:$0xff] }
 0x1de   : > { %v1502_v33 = vmul.f32 5.0, %v4160_v24  ;;  %v5055_v35 = vpop.eup %5054  ;;  %3537 = vst [vmem:[%s5687_s17 + $0xa38] sm:$0xff] %v3025_v26  ;;  %v2516_v36 = vmul.f32 0.5, %v5053_v30  ;;  %5070 = vtanh.f32 %v1501_v23  ;;  %v1503_v37 = vmul.f32 5.0, %v4161_v27  ;;  %v491_v27 = vld [vmem:[%s5640_s30 + $0xb08] sm:$0xff] }
 0x1df   : > { %v1504_v38 = vmul.f32 5.0, %v4162_v28  ;;  %3538 = vst [vmem:[%s5687_s17 + $0xa40] sm:$0xff] %v3026_v31  ;;  %v3027_v40 = vadd.f32 0.5, %v2515_v32  ;;  %v2517_v41 = vmul.f32 0.5, %v5055_v35  ;;  %v4163_v42 = vadd.f32 -0.5, %v481_v29  ;;  %v492_v32 = vld [vmem:[%s5640_s30 + $0xb10] sm:$0xff] }
 0x1e0   : > { %v5057_v39 = vpop.eup %5056  ;;  %5072 = vtanh.f32 %v1502_v33  ;;  %v3028_v45 = vadd.f32 0.5, %v2516_v36  ;;  %v4164_v47 = vadd.f32 -0.5, %v482_v34  ;;  %v4165_v57 = vadd.f32 -0.5, %v483_v43  ;;  %v493_v33 = vld [vmem:[%s5640_s30 + $0xb18] sm:$0xff] }
 0x1e1   : > { %v5059_v44 = vpop.eup %5058  ;;  %v2518_v46 = vmul.f32 0.5, %v5057_v39  ;;  %5074 = vtanh.f32 %v1503_v37  ;;  %3539 = vst [vmem:[%s5687_s17 + $0xa48] sm:$0xff] %v3027_v40  ;;  %v3029_v51 = vadd.f32 0.5, %v2517_v41  ;;  %v1505_v53 = vmul.f32 5.0, %v4163_v42  ;;  %v494_v42 = vld [vmem:[%s5640_s30 + $0xb20] sm:$0xff] }
 0x1e2   : > { %v5061_v50 = vpop.eup %5060  ;;  %v2519_v52 = vmul.f32 0.5, %v5059_v44  ;;  %5076 = vtanh.f32 %v1504_v38  ;;  %3540 = vst [vmem:[%s5687_s17 + $0xa50] sm:$0xff] %v3028_v45  ;;  %v1506_v56 = vmul.f32 5.0, %v4164_v47  ;;  %v4166_v61 = vadd.f32 -0.5, %v484_v48  ;;  %v495_v47 = vld [vmem:[%s5640_s30 + $0xb28] sm:$0xff]  ;;  %v496_v48 = vld [vmem:[%s5640_s30 + $0xb30] sm:$0xff] }
 0x1e3   : > { %v3030_v54 = vadd.f32 0.5, %v2518_v46  ;;  %v2520_v55 = vmul.f32 0.5, %v5061_v50  ;;  %v5063_v59 = vpop.eup %5062  ;;  %3541 = vst [vmem:[%s5687_s17 + $0xa58] sm:$0xff] %v3029_v51  ;;  %5078 = vtanh.f32 %v1505_v53  ;;  %v4167_v62 = vadd.f32 -0.5, %v485_v49 }
 0x1e4   : > { %v3031_v60 = vadd.f32 0.5, %v2519_v52  ;;  %v5065_v1 = vpop.eup %5064  ;;  %v2521_v3 = vmul.f32 0.5, %v5063_v59  ;;  %5080 = vtanh.f32 %v1506_v56  ;;  %v1507_v4 = vmul.f32 5.0, %v4165_v57 }
 0x1e5   : > { %3542 = vst [vmem:[%s5687_s17 + $0xa60] sm:$0xff] %v3030_v54  ;;  %v3032_v2 = vadd.f32 0.5, %v2520_v55  ;;  %v2522_v5 = vmul.f32 0.5, %v5065_v1  ;;  %v1508_v6 = vmul.f32 5.0, %v4166_v61  ;;  %v1509_v7 = vmul.f32 5.0, %v4167_v62  ;;  %v497_v61 = vld [vmem:[%s5640_s30 + $0xb38] sm:$0xff] }
 0x1e6   : > { %3543 = vst [vmem:[%s5687_s17 + $0xa68] sm:$0xff] %v3031_v60  ;;  %v4168_v8 = vadd.f32 -0.5, %v486_v58  ;;  %v5067_v9 = vpop.eup %5066  ;;  %v3033_v10 = vadd.f32 0.5, %v2521_v3  ;;  %5082 = vtanh.f32 %v1507_v4  ;;  %v4169_v11 = vadd.f32 -0.5, %v487_v63 }
 0x1e7   : > { %3544 = vst [vmem:[%s5687_s17 + $0xa70] sm:$0xff] %v3032_v2  ;;  %v4170_v12 = vadd.f32 -0.5, %v488_v0  ;;  %v5069_v14 = vpop.eup %5068  ;;  %v3034_v15 = vadd.f32 0.5, %v2522_v5  ;;  %v2523_v16 = vmul.f32 0.5, %v5067_v9  ;;  %5084 = vtanh.f32 %v1508_v6  ;;  %v498_v2 = vld [vmem:[%s5640_s30 + $0xb40] sm:$0xff] }
 0x1e8   : > { %v1510_v18 = vmul.f32 5.0, %v4168_v8  ;;  %v5071_v19 = vpop.eup %5070  ;;  %3545 = vst [vmem:[%s5687_s17 + $0xa78] sm:$0xff] %v3033_v10  ;;  %v2524_v20 = vmul.f32 0.5, %v5069_v14  ;;  %5086 = vtanh.f32 %v1509_v7  ;;  %v1511_v21 = vmul.f32 5.0, %v4169_v11  ;;  %v499_v11 = vld [vmem:[%s5640_s30 + $0xb48] sm:$0xff] }
 0x1e9   : > { %v1512_v22 = vmul.f32 5.0, %v4170_v12  ;;  %3546 = vst [vmem:[%s5687_s17 + $0xa80] sm:$0xff] %v3034_v15  ;;  %v3035_v24 = vadd.f32 0.5, %v2523_v16  ;;  %v2525_v25 = vmul.f32 0.5, %v5071_v19  ;;  %v4171_v26 = vadd.f32 -0.5, %v489_v13  ;;  %v500_v16 = vld [vmem:[%s5640_s30 + $0xb50] sm:$0xff] }
 0x1ea   : > { %v5073_v23 = vpop.eup %5072  ;;  %5088 = vtanh.f32 %v1510_v18  ;;  %v3036_v29 = vadd.f32 0.5, %v2524_v20  ;;  %v4172_v31 = vadd.f32 -0.5, %v490_v17  ;;  %v4173_v41 = vadd.f32 -0.5, %v491_v27  ;;  %v501_v18 = vld [vmem:[%s5640_s30 + $0xb58] sm:$0xff] }
 0x1eb   : > { %v5075_v28 = vpop.eup %5074  ;;  %v2526_v30 = vmul.f32 0.5, %v5073_v23  ;;  %5090 = vtanh.f32 %v1511_v21  ;;  %3547 = vst [vmem:[%s5687_s17 + $0xa88] sm:$0xff] %v3035_v24  ;;  %v3037_v35 = vadd.f32 0.5, %v2525_v25  ;;  %v1513_v37 = vmul.f32 5.0, %v4171_v26  ;;  %v502_v26 = vld [vmem:[%s5640_s30 + $0xb60] sm:$0xff] }
 0x1ec   : > { %v5077_v34 = vpop.eup %5076  ;;  %v2527_v36 = vmul.f32 0.5, %v5075_v28  ;;  %5092 = vtanh.f32 %v1512_v22  ;;  %3548 = vst [vmem:[%s5687_s17 + $0xa90] sm:$0xff] %v3036_v29  ;;  %v1514_v40 = vmul.f32 5.0, %v4172_v31  ;;  %v4174_v45 = vadd.f32 -0.5, %v492_v32  ;;  %v503_v31 = vld [vmem:[%s5640_s30 + $0xb68] sm:$0xff]  ;;  %v504_v32 = vld [vmem:[%s5640_s30 + $0xb70] sm:$0xff] }
 0x1ed   : > { %v3038_v38 = vadd.f32 0.5, %v2526_v30  ;;  %v2528_v39 = vmul.f32 0.5, %v5077_v34  ;;  %v5079_v43 = vpop.eup %5078  ;;  %3549 = vst [vmem:[%s5687_s17 + $0xa98] sm:$0xff] %v3037_v35  ;;  %5094 = vtanh.f32 %v1513_v37  ;;  %v4175_v46 = vadd.f32 -0.5, %v493_v33 }
 0x1ee   : > { %v3039_v44 = vadd.f32 0.5, %v2527_v36  ;;  %v5081_v49 = vpop.eup %5080  ;;  %v2529_v51 = vmul.f32 0.5, %v5079_v43  ;;  %5096 = vtanh.f32 %v1514_v40  ;;  %v1515_v52 = vmul.f32 5.0, %v4173_v41 }
 0x1ef   : > { %3550 = vst [vmem:[%s5687_s17 + $0xaa0] sm:$0xff] %v3038_v38  ;;  %v3040_v50 = vadd.f32 0.5, %v2528_v39  ;;  %v2530_v53 = vmul.f32 0.5, %v5081_v49  ;;  %v1516_v54 = vmul.f32 5.0, %v4174_v45  ;;  %v1517_v55 = vmul.f32 5.0, %v4175_v46  ;;  %v505_v45 = vld [vmem:[%s5640_s30 + $0xb78] sm:$0xff] }
 0x1f0   : > { %3551 = vst [vmem:[%s5687_s17 + $0xaa8] sm:$0xff] %v3039_v44  ;;  %v4176_v56 = vadd.f32 -0.5, %v494_v42  ;;  %v5083_v57 = vpop.eup %5082  ;;  %v3041_v58 = vadd.f32 0.5, %v2529_v51  ;;  %5098 = vtanh.f32 %v1515_v52  ;;  %v4177_v59 = vadd.f32 -0.5, %v495_v47 }
 0x1f1   : > { %3552 = vst [vmem:[%s5687_s17 + $0xab0] sm:$0xff] %v3040_v50  ;;  %v4178_v60 = vadd.f32 -0.5, %v496_v48  ;;  %v5085_v62 = vpop.eup %5084  ;;  %v3042_v63 = vadd.f32 0.5, %v2530_v53  ;;  %v2531_v0 = vmul.f32 0.5, %v5083_v57  ;;  %5100 = vtanh.f32 %v1516_v54  ;;  %v506_v50 = vld [vmem:[%s5640_s30 + $0xb80] sm:$0xff] }
 0x1f2   : > { %v1518_v1 = vmul.f32 5.0, %v4176_v56  ;;  %v5087_v3 = vpop.eup %5086  ;;  %3553 = vst [vmem:[%s5687_s17 + $0xab8] sm:$0xff] %v3041_v58  ;;  %v2532_v4 = vmul.f32 0.5, %v5085_v62  ;;  %5102 = vtanh.f32 %v1517_v55  ;;  %v1519_v5 = vmul.f32 5.0, %v4177_v59  ;;  %v507_v59 = vld [vmem:[%s5640_s30 + $0xb88] sm:$0xff] }
 0x1f3   : > { %v1520_v6 = vmul.f32 5.0, %v4178_v60  ;;  %3554 = vst [vmem:[%s5687_s17 + $0xac0] sm:$0xff] %v3042_v63  ;;  %v3043_v8 = vadd.f32 0.5, %v2531_v0  ;;  %v2533_v9 = vmul.f32 0.5, %v5087_v3  ;;  %v4179_v10 = vadd.f32 -0.5, %v497_v61  ;;  %v508_v0 = vld [vmem:[%s5640_s30 + $0xb90] sm:$0xff] }
 0x1f4   : > { %v5089_v7 = vpop.eup %5088  ;;  %5104 = vtanh.f32 %v1518_v1  ;;  %v3044_v13 = vadd.f32 0.5, %v2532_v4  ;;  %v4180_v15 = vadd.f32 -0.5, %v498_v2  ;;  %v4181_v25 = vadd.f32 -0.5, %v499_v11  ;;  %v509_v1 = vld [vmem:[%s5640_s30 + $0xb98] sm:$0xff] }
 0x1f5   : > { %v5091_v12 = vpop.eup %5090  ;;  %v2534_v14 = vmul.f32 0.5, %v5089_v7  ;;  %5106 = vtanh.f32 %v1519_v5  ;;  %3555 = vst [vmem:[%s5687_s17 + $0xac8] sm:$0xff] %v3043_v8  ;;  %v3045_v19 = vadd.f32 0.5, %v2533_v9  ;;  %v1521_v21 = vmul.f32 5.0, %v4179_v10  ;;  %v510_v10 = vld [vmem:[%s5640_s30 + $0xba0] sm:$0xff] }
 0x1f6   : > { %v5093_v17 = vpop.eup %5092  ;;  %v2535_v20 = vmul.f32 0.5, %v5091_v12  ;;  %5108 = vtanh.f32 %v1520_v6  ;;  %3556 = vst [vmem:[%s5687_s17 + $0xad0] sm:$0xff] %v3044_v13  ;;  %v1522_v24 = vmul.f32 5.0, %v4180_v15  ;;  %v4182_v29 = vadd.f32 -0.5, %v500_v16  ;;  %v511_v15 = vld [vmem:[%s5640_s30 + $0xba8] sm:$0xff]  ;;  %v512_v16 = vld [vmem:[%s5640_s30 + $0xbb0] sm:$0xff] }
 0x1f7   : > { %v3046_v22 = vadd.f32 0.5, %v2534_v14  ;;  %v2536_v23 = vmul.f32 0.5, %v5093_v17  ;;  %v5095_v27 = vpop.eup %5094  ;;  %3557 = vst [vmem:[%s5687_s17 + $0xad8] sm:$0xff] %v3045_v19  ;;  %5110 = vtanh.f32 %v1521_v21  ;;  %v4183_v30 = vadd.f32 -0.5, %v501_v18 }
 0x1f8   : > { %v3047_v28 = vadd.f32 0.5, %v2535_v20  ;;  %v5097_v33 = vpop.eup %5096  ;;  %v2537_v35 = vmul.f32 0.5, %v5095_v27  ;;  %5112 = vtanh.f32 %v1522_v24  ;;  %v1523_v36 = vmul.f32 5.0, %v4181_v25 }
 0x1f9   : > { %3558 = vst [vmem:[%s5687_s17 + $0xae0] sm:$0xff] %v3046_v22  ;;  %v3048_v34 = vadd.f32 0.5, %v2536_v23  ;;  %v2538_v37 = vmul.f32 0.5, %v5097_v33  ;;  %v1524_v38 = vmul.f32 5.0, %v4182_v29  ;;  %v1525_v39 = vmul.f32 5.0, %v4183_v30  ;;  %v513_v29 = vld [vmem:[%s5640_s30 + $0xbb8] sm:$0xff] }
 0x1fa   : > { %3559 = vst [vmem:[%s5687_s17 + $0xae8] sm:$0xff] %v3047_v28  ;;  %v4184_v40 = vadd.f32 -0.5, %v502_v26  ;;  %v5099_v41 = vpop.eup %5098  ;;  %v3049_v42 = vadd.f32 0.5, %v2537_v35  ;;  %5114 = vtanh.f32 %v1523_v36  ;;  %v4185_v43 = vadd.f32 -0.5, %v503_v31 }
 0x1fb   : > { %3560 = vst [vmem:[%s5687_s17 + $0xaf0] sm:$0xff] %v3048_v34  ;;  %v4186_v44 = vadd.f32 -0.5, %v504_v32  ;;  %v5101_v46 = vpop.eup %5100  ;;  %v3050_v47 = vadd.f32 0.5, %v2538_v37  ;;  %v2539_v48 = vmul.f32 0.5, %v5099_v41  ;;  %5116 = vtanh.f32 %v1524_v38  ;;  %v514_v34 = vld [vmem:[%s5640_s30 + $0xbc0] sm:$0xff] }
 0x1fc   : > { %v1526_v49 = vmul.f32 5.0, %v4184_v40  ;;  %v5103_v51 = vpop.eup %5102  ;;  %3561 = vst [vmem:[%s5687_s17 + $0xaf8] sm:$0xff] %v3049_v42  ;;  %v2540_v52 = vmul.f32 0.5, %v5101_v46  ;;  %5118 = vtanh.f32 %v1525_v39  ;;  %v1527_v53 = vmul.f32 5.0, %v4185_v43  ;;  %v515_v43 = vld [vmem:[%s5640_s30 + $0xbc8] sm:$0xff] }
 0x1fd   : > { %v1528_v54 = vmul.f32 5.0, %v4186_v44  ;;  %3562 = vst [vmem:[%s5687_s17 + $0xb00] sm:$0xff] %v3050_v47  ;;  %v3051_v56 = vadd.f32 0.5, %v2539_v48  ;;  %v2541_v57 = vmul.f32 0.5, %v5103_v51  ;;  %v4187_v58 = vadd.f32 -0.5, %v505_v45  ;;  %v516_v48 = vld [vmem:[%s5640_s30 + $0xbd0] sm:$0xff] }
 0x1fe   : > { %v5105_v55 = vpop.eup %5104  ;;  %5120 = vtanh.f32 %v1526_v49  ;;  %v3052_v61 = vadd.f32 0.5, %v2540_v52  ;;  %v4188_v63 = vadd.f32 -0.5, %v506_v50  ;;  %v4189_v9 = vadd.f32 -0.5, %v507_v59  ;;  %v517_v49 = vld [vmem:[%s5640_s30 + $0xbd8] sm:$0xff] }
 0x1ff   : > { %v5107_v60 = vpop.eup %5106  ;;  %v2542_v62 = vmul.f32 0.5, %v5105_v55  ;;  %5122 = vtanh.f32 %v1527_v53  ;;  %3563 = vst [vmem:[%s5687_s17 + $0xb08] sm:$0xff] %v3051_v56  ;;  %v3053_v3 = vadd.f32 0.5, %v2541_v57  ;;  %v1529_v5 = vmul.f32 5.0, %v4187_v58  ;;  %v518_v58 = vld [vmem:[%s5640_s30 + $0xbe0] sm:$0xff] }
 0x200   : > { %v5109_v2 = vpop.eup %5108  ;;  %v2543_v4 = vmul.f32 0.5, %v5107_v60  ;;  %5124 = vtanh.f32 %v1528_v54  ;;  %3564 = vst [vmem:[%s5687_s17 + $0xb10] sm:$0xff] %v3052_v61  ;;  %v1530_v8 = vmul.f32 5.0, %v4188_v63  ;;  %v4190_v13 = vadd.f32 -0.5, %v508_v0  ;;  %v519_v63 = vld [vmem:[%s5640_s30 + $0xbe8] sm:$0xff]  ;;  %v520_v0 = vld [vmem:[%s5640_s30 + $0xbf0] sm:$0xff] }
 0x201   : > { %v3054_v6 = vadd.f32 0.5, %v2542_v62  ;;  %v2544_v7 = vmul.f32 0.5, %v5109_v2  ;;  %v5111_v11 = vpop.eup %5110  ;;  %3565 = vst [vmem:[%s5687_s17 + $0xb18] sm:$0xff] %v3053_v3  ;;  %5126 = vtanh.f32 %v1529_v5  ;;  %v4191_v14 = vadd.f32 -0.5, %v509_v1 }
 0x202   : > { %v3055_v12 = vadd.f32 0.5, %v2543_v4  ;;  %v5113_v18 = vpop.eup %5112  ;;  %v2545_v19 = vmul.f32 0.5, %v5111_v11  ;;  %5128 = vtanh.f32 %v1530_v8  ;;  %v1531_v20 = vmul.f32 5.0, %v4189_v9 }
 0x203   : > { %3566 = vst [vmem:[%s5687_s17 + $0xb20] sm:$0xff] %v3054_v6  ;;  %v3056_v17 = vadd.f32 0.5, %v2544_v7  ;;  %v2546_v21 = vmul.f32 0.5, %v5113_v18  ;;  %v1532_v22 = vmul.f32 5.0, %v4190_v13  ;;  %v1533_v23 = vmul.f32 5.0, %v4191_v14  ;;  %v521_v13 = vld [vmem:[%s5640_s30 + $0xbf8] sm:$0xff] }
 0x204   : > { %3567 = vst [vmem:[%s5687_s17 + $0xb28] sm:$0xff] %v3055_v12  ;;  %v4192_v24 = vadd.f32 -0.5, %v510_v10  ;;  %v5115_v25 = vpop.eup %5114  ;;  %v3057_v26 = vadd.f32 0.5, %v2545_v19  ;;  %5130 = vtanh.f32 %v1531_v20  ;;  %v4193_v27 = vadd.f32 -0.5, %v511_v15 }
 0x205   : > { %3568 = vst [vmem:[%s5687_s17 + $0xb30] sm:$0xff] %v3056_v17  ;;  %v4194_v28 = vadd.f32 -0.5, %v512_v16  ;;  %v5117_v30 = vpop.eup %5116  ;;  %v3058_v31 = vadd.f32 0.5, %v2546_v21  ;;  %v2547_v32 = vmul.f32 0.5, %v5115_v25  ;;  %5132 = vtanh.f32 %v1532_v22  ;;  %v522_v17 = vld [vmem:[%s5640_s30 + $0xc00] sm:$0xff] }
 0x206   : > { %v1534_v33 = vmul.f32 5.0, %v4192_v24  ;;  %v5119_v35 = vpop.eup %5118  ;;  %3569 = vst [vmem:[%s5687_s17 + $0xb38] sm:$0xff] %v3057_v26  ;;  %v2548_v36 = vmul.f32 0.5, %v5117_v30  ;;  %5134 = vtanh.f32 %v1533_v23  ;;  %v1535_v37 = vmul.f32 5.0, %v4193_v27  ;;  %v523_v27 = vld [vmem:[%s5640_s30 + $0xc08] sm:$0xff] }
 0x207   : > { %v1536_v38 = vmul.f32 5.0, %v4194_v28  ;;  %3570 = vst [vmem:[%s5687_s17 + $0xb40] sm:$0xff] %v3058_v31  ;;  %v3059_v40 = vadd.f32 0.5, %v2547_v32  ;;  %v2549_v41 = vmul.f32 0.5, %v5119_v35  ;;  %v4195_v42 = vadd.f32 -0.5, %v513_v29  ;;  %v524_v32 = vld [vmem:[%s5640_s30 + $0xc10] sm:$0xff] }
 0x208   : > { %v5121_v39 = vpop.eup %5120  ;;  %5136 = vtanh.f32 %v1534_v33  ;;  %v3060_v45 = vadd.f32 0.5, %v2548_v36  ;;  %v4196_v47 = vadd.f32 -0.5, %v514_v34  ;;  %v4197_v57 = vadd.f32 -0.5, %v515_v43  ;;  %v525_v33 = vld [vmem:[%s5640_s30 + $0xc18] sm:$0xff] }
 0x209   : > { %v5123_v44 = vpop.eup %5122  ;;  %v2550_v46 = vmul.f32 0.5, %v5121_v39  ;;  %5138 = vtanh.f32 %v1535_v37  ;;  %3571 = vst [vmem:[%s5687_s17 + $0xb48] sm:$0xff] %v3059_v40  ;;  %v3061_v51 = vadd.f32 0.5, %v2549_v41  ;;  %v1537_v53 = vmul.f32 5.0, %v4195_v42  ;;  %v526_v42 = vld [vmem:[%s5640_s30 + $0xc20] sm:$0xff] }
 0x20a   : > { %v5125_v50 = vpop.eup %5124  ;;  %v2551_v52 = vmul.f32 0.5, %v5123_v44  ;;  %5140 = vtanh.f32 %v1536_v38  ;;  %3572 = vst [vmem:[%s5687_s17 + $0xb50] sm:$0xff] %v3060_v45  ;;  %v1538_v56 = vmul.f32 5.0, %v4196_v47  ;;  %v4198_v61 = vadd.f32 -0.5, %v516_v48  ;;  %v527_v47 = vld [vmem:[%s5640_s30 + $0xc28] sm:$0xff]  ;;  %v528_v48 = vld [vmem:[%s5640_s30 + $0xc30] sm:$0xff] }
 0x20b   : > { %v3062_v54 = vadd.f32 0.5, %v2550_v46  ;;  %v2552_v55 = vmul.f32 0.5, %v5125_v50  ;;  %v5127_v59 = vpop.eup %5126  ;;  %3573 = vst [vmem:[%s5687_s17 + $0xb58] sm:$0xff] %v3061_v51  ;;  %5142 = vtanh.f32 %v1537_v53  ;;  %v4199_v62 = vadd.f32 -0.5, %v517_v49 }
 0x20c   : > { %v3063_v60 = vadd.f32 0.5, %v2551_v52  ;;  %v5129_v1 = vpop.eup %5128  ;;  %v2553_v3 = vmul.f32 0.5, %v5127_v59  ;;  %5144 = vtanh.f32 %v1538_v56  ;;  %v1539_v4 = vmul.f32 5.0, %v4197_v57 }
 0x20d   : > { %3574 = vst [vmem:[%s5687_s17 + $0xb60] sm:$0xff] %v3062_v54  ;;  %v3064_v2 = vadd.f32 0.5, %v2552_v55  ;;  %v2554_v5 = vmul.f32 0.5, %v5129_v1  ;;  %v1540_v6 = vmul.f32 5.0, %v4198_v61  ;;  %v1541_v7 = vmul.f32 5.0, %v4199_v62  ;;  %v529_v61 = vld [vmem:[%s5640_s30 + $0xc38] sm:$0xff] }
 0x20e   : > { %3575 = vst [vmem:[%s5687_s17 + $0xb68] sm:$0xff] %v3063_v60  ;;  %v4200_v8 = vadd.f32 -0.5, %v518_v58  ;;  %v5131_v9 = vpop.eup %5130  ;;  %v3065_v10 = vadd.f32 0.5, %v2553_v3  ;;  %5146 = vtanh.f32 %v1539_v4  ;;  %v4201_v11 = vadd.f32 -0.5, %v519_v63 }
 0x20f   : > { %3576 = vst [vmem:[%s5687_s17 + $0xb70] sm:$0xff] %v3064_v2  ;;  %v4202_v12 = vadd.f32 -0.5, %v520_v0  ;;  %v5133_v14 = vpop.eup %5132  ;;  %v3066_v15 = vadd.f32 0.5, %v2554_v5  ;;  %v2555_v16 = vmul.f32 0.5, %v5131_v9  ;;  %5148 = vtanh.f32 %v1540_v6  ;;  %v530_v2 = vld [vmem:[%s5640_s30 + $0xc40] sm:$0xff] }
 0x210   : > { %v1542_v18 = vmul.f32 5.0, %v4200_v8  ;;  %v5135_v19 = vpop.eup %5134  ;;  %3577 = vst [vmem:[%s5687_s17 + $0xb78] sm:$0xff] %v3065_v10  ;;  %v2556_v20 = vmul.f32 0.5, %v5133_v14  ;;  %5150 = vtanh.f32 %v1541_v7  ;;  %v1543_v21 = vmul.f32 5.0, %v4201_v11  ;;  %v531_v11 = vld [vmem:[%s5640_s30 + $0xc48] sm:$0xff] }
 0x211   : > { %v1544_v22 = vmul.f32 5.0, %v4202_v12  ;;  %3578 = vst [vmem:[%s5687_s17 + $0xb80] sm:$0xff] %v3066_v15  ;;  %v3067_v24 = vadd.f32 0.5, %v2555_v16  ;;  %v2557_v25 = vmul.f32 0.5, %v5135_v19  ;;  %v4203_v26 = vadd.f32 -0.5, %v521_v13  ;;  %v532_v16 = vld [vmem:[%s5640_s30 + $0xc50] sm:$0xff] }
 0x212   : > { %v5137_v23 = vpop.eup %5136  ;;  %5152 = vtanh.f32 %v1542_v18  ;;  %v3068_v29 = vadd.f32 0.5, %v2556_v20  ;;  %v4204_v31 = vadd.f32 -0.5, %v522_v17  ;;  %v4205_v41 = vadd.f32 -0.5, %v523_v27  ;;  %v533_v18 = vld [vmem:[%s5640_s30 + $0xc58] sm:$0xff] }
 0x213   : > { %v5139_v28 = vpop.eup %5138  ;;  %v2558_v30 = vmul.f32 0.5, %v5137_v23  ;;  %5154 = vtanh.f32 %v1543_v21  ;;  %3579 = vst [vmem:[%s5687_s17 + $0xb88] sm:$0xff] %v3067_v24  ;;  %v3069_v35 = vadd.f32 0.5, %v2557_v25  ;;  %v1545_v37 = vmul.f32 5.0, %v4203_v26  ;;  %v534_v26 = vld [vmem:[%s5640_s30 + $0xc60] sm:$0xff] }
 0x214   : > { %v5141_v34 = vpop.eup %5140  ;;  %v2559_v36 = vmul.f32 0.5, %v5139_v28  ;;  %5156 = vtanh.f32 %v1544_v22  ;;  %3580 = vst [vmem:[%s5687_s17 + $0xb90] sm:$0xff] %v3068_v29  ;;  %v1546_v40 = vmul.f32 5.0, %v4204_v31  ;;  %v4206_v45 = vadd.f32 -0.5, %v524_v32  ;;  %v535_v31 = vld [vmem:[%s5640_s30 + $0xc68] sm:$0xff]  ;;  %v536_v32 = vld [vmem:[%s5640_s30 + $0xc70] sm:$0xff] }
 0x215   : > { %v3070_v38 = vadd.f32 0.5, %v2558_v30  ;;  %v2560_v39 = vmul.f32 0.5, %v5141_v34  ;;  %v5143_v43 = vpop.eup %5142  ;;  %3581 = vst [vmem:[%s5687_s17 + $0xb98] sm:$0xff] %v3069_v35  ;;  %5158 = vtanh.f32 %v1545_v37  ;;  %v4207_v46 = vadd.f32 -0.5, %v525_v33 }
 0x216   : > { %v3071_v44 = vadd.f32 0.5, %v2559_v36  ;;  %v5145_v49 = vpop.eup %5144  ;;  %v2561_v51 = vmul.f32 0.5, %v5143_v43  ;;  %5160 = vtanh.f32 %v1546_v40  ;;  %v1547_v52 = vmul.f32 5.0, %v4205_v41 }
 0x217   : > { %3582 = vst [vmem:[%s5687_s17 + $0xba0] sm:$0xff] %v3070_v38  ;;  %v3072_v50 = vadd.f32 0.5, %v2560_v39  ;;  %v2562_v53 = vmul.f32 0.5, %v5145_v49  ;;  %v1548_v54 = vmul.f32 5.0, %v4206_v45  ;;  %v1549_v55 = vmul.f32 5.0, %v4207_v46  ;;  %v537_v45 = vld [vmem:[%s5640_s30 + $0xc78] sm:$0xff] }
 0x218   : > { %3583 = vst [vmem:[%s5687_s17 + $0xba8] sm:$0xff] %v3071_v44  ;;  %v4208_v56 = vadd.f32 -0.5, %v526_v42  ;;  %v5147_v57 = vpop.eup %5146  ;;  %v3073_v58 = vadd.f32 0.5, %v2561_v51  ;;  %5162 = vtanh.f32 %v1547_v52  ;;  %v4209_v59 = vadd.f32 -0.5, %v527_v47 }
 0x219   : > { %3584 = vst [vmem:[%s5687_s17 + $0xbb0] sm:$0xff] %v3072_v50  ;;  %v4210_v60 = vadd.f32 -0.5, %v528_v48  ;;  %v5149_v62 = vpop.eup %5148  ;;  %v3074_v63 = vadd.f32 0.5, %v2562_v53  ;;  %v2563_v0 = vmul.f32 0.5, %v5147_v57  ;;  %5164 = vtanh.f32 %v1548_v54  ;;  %v538_v50 = vld [vmem:[%s5640_s30 + $0xc80] sm:$0xff] }
 0x21a   : > { %v1550_v1 = vmul.f32 5.0, %v4208_v56  ;;  %v5151_v3 = vpop.eup %5150  ;;  %3585 = vst [vmem:[%s5687_s17 + $0xbb8] sm:$0xff] %v3073_v58  ;;  %v2564_v4 = vmul.f32 0.5, %v5149_v62  ;;  %5166 = vtanh.f32 %v1549_v55  ;;  %v1551_v5 = vmul.f32 5.0, %v4209_v59  ;;  %v539_v59 = vld [vmem:[%s5640_s30 + $0xc88] sm:$0xff] }
 0x21b   : > { %v1552_v6 = vmul.f32 5.0, %v4210_v60  ;;  %3586 = vst [vmem:[%s5687_s17 + $0xbc0] sm:$0xff] %v3074_v63  ;;  %v3075_v8 = vadd.f32 0.5, %v2563_v0  ;;  %v2565_v9 = vmul.f32 0.5, %v5151_v3  ;;  %v4211_v10 = vadd.f32 -0.5, %v529_v61  ;;  %v540_v0 = vld [vmem:[%s5640_s30 + $0xc90] sm:$0xff] }
 0x21c   : > { %v5153_v7 = vpop.eup %5152  ;;  %5168 = vtanh.f32 %v1550_v1  ;;  %v3076_v13 = vadd.f32 0.5, %v2564_v4  ;;  %v4212_v15 = vadd.f32 -0.5, %v530_v2  ;;  %v4213_v25 = vadd.f32 -0.5, %v531_v11  ;;  %v541_v1 = vld [vmem:[%s5640_s30 + $0xc98] sm:$0xff] }
 0x21d   : > { %v5155_v12 = vpop.eup %5154  ;;  %v2566_v14 = vmul.f32 0.5, %v5153_v7  ;;  %5170 = vtanh.f32 %v1551_v5  ;;  %3587 = vst [vmem:[%s5687_s17 + $0xbc8] sm:$0xff] %v3075_v8  ;;  %v3077_v19 = vadd.f32 0.5, %v2565_v9  ;;  %v1553_v21 = vmul.f32 5.0, %v4211_v10  ;;  %v542_v10 = vld [vmem:[%s5640_s30 + $0xca0] sm:$0xff] }
 0x21e   : > { %v5157_v17 = vpop.eup %5156  ;;  %v2567_v20 = vmul.f32 0.5, %v5155_v12  ;;  %5172 = vtanh.f32 %v1552_v6  ;;  %3588 = vst [vmem:[%s5687_s17 + $0xbd0] sm:$0xff] %v3076_v13  ;;  %v1554_v24 = vmul.f32 5.0, %v4212_v15  ;;  %v4214_v29 = vadd.f32 -0.5, %v532_v16  ;;  %v543_v15 = vld [vmem:[%s5640_s30 + $0xca8] sm:$0xff]  ;;  %v544_v16 = vld [vmem:[%s5640_s30 + $0xcb0] sm:$0xff] }
 0x21f   : > { %v3078_v22 = vadd.f32 0.5, %v2566_v14  ;;  %v2568_v23 = vmul.f32 0.5, %v5157_v17  ;;  %v5159_v27 = vpop.eup %5158  ;;  %3589 = vst [vmem:[%s5687_s17 + $0xbd8] sm:$0xff] %v3077_v19  ;;  %5174 = vtanh.f32 %v1553_v21  ;;  %v4215_v30 = vadd.f32 -0.5, %v533_v18 }
 0x220   : > { %v3079_v28 = vadd.f32 0.5, %v2567_v20  ;;  %v5161_v33 = vpop.eup %5160  ;;  %v2569_v35 = vmul.f32 0.5, %v5159_v27  ;;  %5176 = vtanh.f32 %v1554_v24  ;;  %v1555_v36 = vmul.f32 5.0, %v4213_v25 }
 0x221   : > { %3590 = vst [vmem:[%s5687_s17 + $0xbe0] sm:$0xff] %v3078_v22  ;;  %v3080_v34 = vadd.f32 0.5, %v2568_v23  ;;  %v2570_v37 = vmul.f32 0.5, %v5161_v33  ;;  %v1556_v38 = vmul.f32 5.0, %v4214_v29  ;;  %v1557_v39 = vmul.f32 5.0, %v4215_v30  ;;  %v545_v29 = vld [vmem:[%s5640_s30 + $0xcb8] sm:$0xff] }
 0x222   : > { %3591 = vst [vmem:[%s5687_s17 + $0xbe8] sm:$0xff] %v3079_v28  ;;  %v4216_v40 = vadd.f32 -0.5, %v534_v26  ;;  %v5163_v41 = vpop.eup %5162  ;;  %v3081_v42 = vadd.f32 0.5, %v2569_v35  ;;  %5178 = vtanh.f32 %v1555_v36  ;;  %v4217_v43 = vadd.f32 -0.5, %v535_v31 }
 0x223   : > { %3592 = vst [vmem:[%s5687_s17 + $0xbf0] sm:$0xff] %v3080_v34  ;;  %v4218_v44 = vadd.f32 -0.5, %v536_v32  ;;  %v5165_v46 = vpop.eup %5164  ;;  %v3082_v47 = vadd.f32 0.5, %v2570_v37  ;;  %v2571_v48 = vmul.f32 0.5, %v5163_v41  ;;  %5180 = vtanh.f32 %v1556_v38  ;;  %v546_v34 = vld [vmem:[%s5640_s30 + $0xcc0] sm:$0xff] }
 0x224   : > { %v1558_v49 = vmul.f32 5.0, %v4216_v40  ;;  %v5167_v51 = vpop.eup %5166  ;;  %3593 = vst [vmem:[%s5687_s17 + $0xbf8] sm:$0xff] %v3081_v42  ;;  %v2572_v52 = vmul.f32 0.5, %v5165_v46  ;;  %5182 = vtanh.f32 %v1557_v39  ;;  %v1559_v53 = vmul.f32 5.0, %v4217_v43  ;;  %v547_v43 = vld [vmem:[%s5640_s30 + $0xcc8] sm:$0xff] }
 0x225   : > { %v1560_v54 = vmul.f32 5.0, %v4218_v44  ;;  %3594 = vst [vmem:[%s5687_s17 + $0xc00] sm:$0xff] %v3082_v47  ;;  %v3083_v56 = vadd.f32 0.5, %v2571_v48  ;;  %v2573_v57 = vmul.f32 0.5, %v5167_v51  ;;  %v4219_v58 = vadd.f32 -0.5, %v537_v45  ;;  %v548_v48 = vld [vmem:[%s5640_s30 + $0xcd0] sm:$0xff] }
 0x226   : > { %v5169_v55 = vpop.eup %5168  ;;  %5184 = vtanh.f32 %v1558_v49  ;;  %v3084_v61 = vadd.f32 0.5, %v2572_v52  ;;  %v4220_v63 = vadd.f32 -0.5, %v538_v50  ;;  %v4221_v9 = vadd.f32 -0.5, %v539_v59  ;;  %v549_v49 = vld [vmem:[%s5640_s30 + $0xcd8] sm:$0xff] }
 0x227   : > { %v5171_v60 = vpop.eup %5170  ;;  %v2574_v62 = vmul.f32 0.5, %v5169_v55  ;;  %5186 = vtanh.f32 %v1559_v53  ;;  %3595 = vst [vmem:[%s5687_s17 + $0xc08] sm:$0xff] %v3083_v56  ;;  %v3085_v3 = vadd.f32 0.5, %v2573_v57  ;;  %v1561_v5 = vmul.f32 5.0, %v4219_v58  ;;  %v550_v58 = vld [vmem:[%s5640_s30 + $0xce0] sm:$0xff] }
 0x228   : > { %v5173_v2 = vpop.eup %5172  ;;  %v2575_v4 = vmul.f32 0.5, %v5171_v60  ;;  %5188 = vtanh.f32 %v1560_v54  ;;  %3596 = vst [vmem:[%s5687_s17 + $0xc10] sm:$0xff] %v3084_v61  ;;  %v1562_v8 = vmul.f32 5.0, %v4220_v63  ;;  %v4222_v13 = vadd.f32 -0.5, %v540_v0  ;;  %v551_v63 = vld [vmem:[%s5640_s30 + $0xce8] sm:$0xff]  ;;  %v552_v0 = vld [vmem:[%s5640_s30 + $0xcf0] sm:$0xff] }
 0x229   : > { %v3086_v6 = vadd.f32 0.5, %v2574_v62  ;;  %v2576_v7 = vmul.f32 0.5, %v5173_v2  ;;  %v5175_v11 = vpop.eup %5174  ;;  %3597 = vst [vmem:[%s5687_s17 + $0xc18] sm:$0xff] %v3085_v3  ;;  %5190 = vtanh.f32 %v1561_v5  ;;  %v4223_v14 = vadd.f32 -0.5, %v541_v1 }
 0x22a   : > { %v3087_v12 = vadd.f32 0.5, %v2575_v4  ;;  %v5177_v18 = vpop.eup %5176  ;;  %v2577_v19 = vmul.f32 0.5, %v5175_v11  ;;  %5192 = vtanh.f32 %v1562_v8  ;;  %v1563_v20 = vmul.f32 5.0, %v4221_v9 }
 0x22b   : > { %3598 = vst [vmem:[%s5687_s17 + $0xc20] sm:$0xff] %v3086_v6  ;;  %v3088_v17 = vadd.f32 0.5, %v2576_v7  ;;  %v2578_v21 = vmul.f32 0.5, %v5177_v18  ;;  %v1564_v22 = vmul.f32 5.0, %v4222_v13  ;;  %v1565_v23 = vmul.f32 5.0, %v4223_v14  ;;  %v553_v13 = vld [vmem:[%s5640_s30 + $0xcf8] sm:$0xff] }
 0x22c   : > { %3599 = vst [vmem:[%s5687_s17 + $0xc28] sm:$0xff] %v3087_v12  ;;  %v4224_v24 = vadd.f32 -0.5, %v542_v10  ;;  %v5179_v25 = vpop.eup %5178  ;;  %v3089_v26 = vadd.f32 0.5, %v2577_v19  ;;  %5194 = vtanh.f32 %v1563_v20  ;;  %v4225_v27 = vadd.f32 -0.5, %v543_v15 }
 0x22d   : > { %3600 = vst [vmem:[%s5687_s17 + $0xc30] sm:$0xff] %v3088_v17  ;;  %v4226_v28 = vadd.f32 -0.5, %v544_v16  ;;  %v5181_v30 = vpop.eup %5180  ;;  %v3090_v31 = vadd.f32 0.5, %v2578_v21  ;;  %v2579_v32 = vmul.f32 0.5, %v5179_v25  ;;  %5196 = vtanh.f32 %v1564_v22  ;;  %v554_v17 = vld [vmem:[%s5640_s30 + $0xd00] sm:$0xff] }
 0x22e   : > { %v1566_v33 = vmul.f32 5.0, %v4224_v24  ;;  %v5183_v35 = vpop.eup %5182  ;;  %3601 = vst [vmem:[%s5687_s17 + $0xc38] sm:$0xff] %v3089_v26  ;;  %v2580_v36 = vmul.f32 0.5, %v5181_v30  ;;  %5198 = vtanh.f32 %v1565_v23  ;;  %v1567_v37 = vmul.f32 5.0, %v4225_v27  ;;  %v555_v27 = vld [vmem:[%s5640_s30 + $0xd08] sm:$0xff] }
 0x22f   : > { %v1568_v38 = vmul.f32 5.0, %v4226_v28  ;;  %3602 = vst [vmem:[%s5687_s17 + $0xc40] sm:$0xff] %v3090_v31  ;;  %v3091_v40 = vadd.f32 0.5, %v2579_v32  ;;  %v2581_v41 = vmul.f32 0.5, %v5183_v35  ;;  %v4227_v42 = vadd.f32 -0.5, %v545_v29  ;;  %v556_v32 = vld [vmem:[%s5640_s30 + $0xd10] sm:$0xff] }
 0x230   : > { %v5185_v39 = vpop.eup %5184  ;;  %5200 = vtanh.f32 %v1566_v33  ;;  %v3092_v45 = vadd.f32 0.5, %v2580_v36  ;;  %v4228_v47 = vadd.f32 -0.5, %v546_v34  ;;  %v4229_v57 = vadd.f32 -0.5, %v547_v43  ;;  %v557_v33 = vld [vmem:[%s5640_s30 + $0xd18] sm:$0xff] }
 0x231   : > { %v5187_v44 = vpop.eup %5186  ;;  %v2582_v46 = vmul.f32 0.5, %v5185_v39  ;;  %5202 = vtanh.f32 %v1567_v37  ;;  %3603 = vst [vmem:[%s5687_s17 + $0xc48] sm:$0xff] %v3091_v40  ;;  %v3093_v51 = vadd.f32 0.5, %v2581_v41  ;;  %v1569_v53 = vmul.f32 5.0, %v4227_v42  ;;  %v558_v42 = vld [vmem:[%s5640_s30 + $0xd20] sm:$0xff] }
 0x232   : > { %v5189_v50 = vpop.eup %5188  ;;  %v2583_v52 = vmul.f32 0.5, %v5187_v44  ;;  %5204 = vtanh.f32 %v1568_v38  ;;  %3604 = vst [vmem:[%s5687_s17 + $0xc50] sm:$0xff] %v3092_v45  ;;  %v1570_v56 = vmul.f32 5.0, %v4228_v47  ;;  %v4230_v61 = vadd.f32 -0.5, %v548_v48  ;;  %v559_v47 = vld [vmem:[%s5640_s30 + $0xd28] sm:$0xff]  ;;  %v560_v48 = vld [vmem:[%s5640_s30 + $0xd30] sm:$0xff] }
 0x233   : > { %v3094_v54 = vadd.f32 0.5, %v2582_v46  ;;  %v2584_v55 = vmul.f32 0.5, %v5189_v50  ;;  %v5191_v59 = vpop.eup %5190  ;;  %3605 = vst [vmem:[%s5687_s17 + $0xc58] sm:$0xff] %v3093_v51  ;;  %5206 = vtanh.f32 %v1569_v53  ;;  %v4231_v62 = vadd.f32 -0.5, %v549_v49 }
 0x234   : > { %v3095_v60 = vadd.f32 0.5, %v2583_v52  ;;  %v5193_v1 = vpop.eup %5192  ;;  %v2585_v3 = vmul.f32 0.5, %v5191_v59  ;;  %5208 = vtanh.f32 %v1570_v56  ;;  %v1571_v4 = vmul.f32 5.0, %v4229_v57 }
 0x235   : > { %3606 = vst [vmem:[%s5687_s17 + $0xc60] sm:$0xff] %v3094_v54  ;;  %v3096_v2 = vadd.f32 0.5, %v2584_v55  ;;  %v2586_v5 = vmul.f32 0.5, %v5193_v1  ;;  %v1572_v6 = vmul.f32 5.0, %v4230_v61  ;;  %v1573_v7 = vmul.f32 5.0, %v4231_v62  ;;  %v561_v61 = vld [vmem:[%s5640_s30 + $0xd38] sm:$0xff] }
 0x236   : > { %3607 = vst [vmem:[%s5687_s17 + $0xc68] sm:$0xff] %v3095_v60  ;;  %v4232_v8 = vadd.f32 -0.5, %v550_v58  ;;  %v5195_v9 = vpop.eup %5194  ;;  %v3097_v10 = vadd.f32 0.5, %v2585_v3  ;;  %5210 = vtanh.f32 %v1571_v4  ;;  %v4233_v11 = vadd.f32 -0.5, %v551_v63 }
 0x237   : > { %3608 = vst [vmem:[%s5687_s17 + $0xc70] sm:$0xff] %v3096_v2  ;;  %v4234_v12 = vadd.f32 -0.5, %v552_v0  ;;  %v5197_v14 = vpop.eup %5196  ;;  %v3098_v15 = vadd.f32 0.5, %v2586_v5  ;;  %v2587_v16 = vmul.f32 0.5, %v5195_v9  ;;  %5212 = vtanh.f32 %v1572_v6  ;;  %v562_v2 = vld [vmem:[%s5640_s30 + $0xd40] sm:$0xff] }
 0x238   : > { %v1574_v18 = vmul.f32 5.0, %v4232_v8  ;;  %v5199_v19 = vpop.eup %5198  ;;  %3609 = vst [vmem:[%s5687_s17 + $0xc78] sm:$0xff] %v3097_v10  ;;  %v2588_v20 = vmul.f32 0.5, %v5197_v14  ;;  %5214 = vtanh.f32 %v1573_v7  ;;  %v1575_v21 = vmul.f32 5.0, %v4233_v11  ;;  %v563_v11 = vld [vmem:[%s5640_s30 + $0xd48] sm:$0xff] }
 0x239   : > { %v1576_v22 = vmul.f32 5.0, %v4234_v12  ;;  %3610 = vst [vmem:[%s5687_s17 + $0xc80] sm:$0xff] %v3098_v15  ;;  %v3099_v24 = vadd.f32 0.5, %v2587_v16  ;;  %v2589_v25 = vmul.f32 0.5, %v5199_v19  ;;  %v4235_v26 = vadd.f32 -0.5, %v553_v13  ;;  %v564_v16 = vld [vmem:[%s5640_s30 + $0xd50] sm:$0xff] }
 0x23a   : > { %v5201_v23 = vpop.eup %5200  ;;  %5216 = vtanh.f32 %v1574_v18  ;;  %v3100_v29 = vadd.f32 0.5, %v2588_v20  ;;  %v4236_v31 = vadd.f32 -0.5, %v554_v17  ;;  %v4237_v41 = vadd.f32 -0.5, %v555_v27  ;;  %v565_v18 = vld [vmem:[%s5640_s30 + $0xd58] sm:$0xff] }
 0x23b   : > { %v5203_v28 = vpop.eup %5202  ;;  %v2590_v30 = vmul.f32 0.5, %v5201_v23  ;;  %5218 = vtanh.f32 %v1575_v21  ;;  %3611 = vst [vmem:[%s5687_s17 + $0xc88] sm:$0xff] %v3099_v24  ;;  %v3101_v35 = vadd.f32 0.5, %v2589_v25  ;;  %v1577_v37 = vmul.f32 5.0, %v4235_v26  ;;  %v566_v26 = vld [vmem:[%s5640_s30 + $0xd60] sm:$0xff] }
 0x23c   : > { %v5205_v34 = vpop.eup %5204  ;;  %v2591_v36 = vmul.f32 0.5, %v5203_v28  ;;  %5220 = vtanh.f32 %v1576_v22  ;;  %3612 = vst [vmem:[%s5687_s17 + $0xc90] sm:$0xff] %v3100_v29  ;;  %v1578_v40 = vmul.f32 5.0, %v4236_v31  ;;  %v4238_v45 = vadd.f32 -0.5, %v556_v32  ;;  %v567_v31 = vld [vmem:[%s5640_s30 + $0xd68] sm:$0xff]  ;;  %v568_v32 = vld [vmem:[%s5640_s30 + $0xd70] sm:$0xff] }
 0x23d   : > { %v3102_v38 = vadd.f32 0.5, %v2590_v30  ;;  %v2592_v39 = vmul.f32 0.5, %v5205_v34  ;;  %v5207_v43 = vpop.eup %5206  ;;  %3613 = vst [vmem:[%s5687_s17 + $0xc98] sm:$0xff] %v3101_v35  ;;  %5222 = vtanh.f32 %v1577_v37  ;;  %v4239_v46 = vadd.f32 -0.5, %v557_v33 }
 0x23e   : > { %v3103_v44 = vadd.f32 0.5, %v2591_v36  ;;  %v5209_v49 = vpop.eup %5208  ;;  %v2593_v51 = vmul.f32 0.5, %v5207_v43  ;;  %5224 = vtanh.f32 %v1578_v40  ;;  %v1579_v52 = vmul.f32 5.0, %v4237_v41 }
 0x23f   : > { %3614 = vst [vmem:[%s5687_s17 + $0xca0] sm:$0xff] %v3102_v38  ;;  %v3104_v50 = vadd.f32 0.5, %v2592_v39  ;;  %v2594_v53 = vmul.f32 0.5, %v5209_v49  ;;  %v1580_v54 = vmul.f32 5.0, %v4238_v45  ;;  %v1581_v55 = vmul.f32 5.0, %v4239_v46  ;;  %v569_v45 = vld [vmem:[%s5640_s30 + $0xd78] sm:$0xff] }
 0x240   : > { %3615 = vst [vmem:[%s5687_s17 + $0xca8] sm:$0xff] %v3103_v44  ;;  %v4240_v56 = vadd.f32 -0.5, %v558_v42  ;;  %v5211_v57 = vpop.eup %5210  ;;  %v3105_v58 = vadd.f32 0.5, %v2593_v51  ;;  %5226 = vtanh.f32 %v1579_v52  ;;  %v4241_v59 = vadd.f32 -0.5, %v559_v47 }
 0x241   : > { %3616 = vst [vmem:[%s5687_s17 + $0xcb0] sm:$0xff] %v3104_v50  ;;  %v4242_v60 = vadd.f32 -0.5, %v560_v48  ;;  %v5213_v62 = vpop.eup %5212  ;;  %v3106_v63 = vadd.f32 0.5, %v2594_v53  ;;  %v2595_v0 = vmul.f32 0.5, %v5211_v57  ;;  %5228 = vtanh.f32 %v1580_v54  ;;  %v570_v50 = vld [vmem:[%s5640_s30 + $0xd80] sm:$0xff] }
 0x242   : > { %v1582_v1 = vmul.f32 5.0, %v4240_v56  ;;  %v5215_v3 = vpop.eup %5214  ;;  %3617 = vst [vmem:[%s5687_s17 + $0xcb8] sm:$0xff] %v3105_v58  ;;  %v2596_v4 = vmul.f32 0.5, %v5213_v62  ;;  %5230 = vtanh.f32 %v1581_v55  ;;  %v1583_v5 = vmul.f32 5.0, %v4241_v59  ;;  %v571_v59 = vld [vmem:[%s5640_s30 + $0xd88] sm:$0xff] }
 0x243   : > { %v1584_v6 = vmul.f32 5.0, %v4242_v60  ;;  %3618 = vst [vmem:[%s5687_s17 + $0xcc0] sm:$0xff] %v3106_v63  ;;  %v3107_v8 = vadd.f32 0.5, %v2595_v0  ;;  %v2597_v9 = vmul.f32 0.5, %v5215_v3  ;;  %v4243_v10 = vadd.f32 -0.5, %v561_v61  ;;  %v572_v0 = vld [vmem:[%s5640_s30 + $0xd90] sm:$0xff] }
 0x244   : > { %v5217_v7 = vpop.eup %5216  ;;  %5232 = vtanh.f32 %v1582_v1  ;;  %v3108_v13 = vadd.f32 0.5, %v2596_v4  ;;  %v4244_v15 = vadd.f32 -0.5, %v562_v2  ;;  %v4245_v25 = vadd.f32 -0.5, %v563_v11  ;;  %v573_v1 = vld [vmem:[%s5640_s30 + $0xd98] sm:$0xff] }
 0x245   : > { %v5219_v12 = vpop.eup %5218  ;;  %v2598_v14 = vmul.f32 0.5, %v5217_v7  ;;  %5234 = vtanh.f32 %v1583_v5  ;;  %3619 = vst [vmem:[%s5687_s17 + $0xcc8] sm:$0xff] %v3107_v8  ;;  %v3109_v19 = vadd.f32 0.5, %v2597_v9  ;;  %v1585_v21 = vmul.f32 5.0, %v4243_v10  ;;  %v574_v10 = vld [vmem:[%s5640_s30 + $0xda0] sm:$0xff] }
 0x246   : > { %v5221_v17 = vpop.eup %5220  ;;  %v2599_v20 = vmul.f32 0.5, %v5219_v12  ;;  %5236 = vtanh.f32 %v1584_v6  ;;  %3620 = vst [vmem:[%s5687_s17 + $0xcd0] sm:$0xff] %v3108_v13  ;;  %v1586_v24 = vmul.f32 5.0, %v4244_v15  ;;  %v4246_v29 = vadd.f32 -0.5, %v564_v16  ;;  %v575_v15 = vld [vmem:[%s5640_s30 + $0xda8] sm:$0xff]  ;;  %v576_v16 = vld [vmem:[%s5640_s30 + $0xdb0] sm:$0xff] }
 0x247   : > { %v3110_v22 = vadd.f32 0.5, %v2598_v14  ;;  %v2600_v23 = vmul.f32 0.5, %v5221_v17  ;;  %v5223_v27 = vpop.eup %5222  ;;  %3621 = vst [vmem:[%s5687_s17 + $0xcd8] sm:$0xff] %v3109_v19  ;;  %5238 = vtanh.f32 %v1585_v21  ;;  %v4247_v30 = vadd.f32 -0.5, %v565_v18 }
 0x248   : > { %v3111_v28 = vadd.f32 0.5, %v2599_v20  ;;  %v5225_v33 = vpop.eup %5224  ;;  %v2601_v35 = vmul.f32 0.5, %v5223_v27  ;;  %5240 = vtanh.f32 %v1586_v24  ;;  %v1587_v36 = vmul.f32 5.0, %v4245_v25 }
 0x249   : > { %3622 = vst [vmem:[%s5687_s17 + $0xce0] sm:$0xff] %v3110_v22  ;;  %v3112_v34 = vadd.f32 0.5, %v2600_v23  ;;  %v2602_v37 = vmul.f32 0.5, %v5225_v33  ;;  %v1588_v38 = vmul.f32 5.0, %v4246_v29  ;;  %v1589_v39 = vmul.f32 5.0, %v4247_v30  ;;  %v577_v29 = vld [vmem:[%s5640_s30 + $0xdb8] sm:$0xff] }
 0x24a   : > { %3623 = vst [vmem:[%s5687_s17 + $0xce8] sm:$0xff] %v3111_v28  ;;  %v4248_v40 = vadd.f32 -0.5, %v566_v26  ;;  %v5227_v41 = vpop.eup %5226  ;;  %v3113_v42 = vadd.f32 0.5, %v2601_v35  ;;  %5242 = vtanh.f32 %v1587_v36  ;;  %v4249_v43 = vadd.f32 -0.5, %v567_v31 }
 0x24b   : > { %3624 = vst [vmem:[%s5687_s17 + $0xcf0] sm:$0xff] %v3112_v34  ;;  %v4250_v44 = vadd.f32 -0.5, %v568_v32  ;;  %v5229_v46 = vpop.eup %5228  ;;  %v3114_v47 = vadd.f32 0.5, %v2602_v37  ;;  %v2603_v48 = vmul.f32 0.5, %v5227_v41  ;;  %5244 = vtanh.f32 %v1588_v38  ;;  %v578_v34 = vld [vmem:[%s5640_s30 + $0xdc0] sm:$0xff] }
 0x24c   : > { %v1590_v49 = vmul.f32 5.0, %v4248_v40  ;;  %v5231_v51 = vpop.eup %5230  ;;  %3625 = vst [vmem:[%s5687_s17 + $0xcf8] sm:$0xff] %v3113_v42  ;;  %v2604_v52 = vmul.f32 0.5, %v5229_v46  ;;  %5246 = vtanh.f32 %v1589_v39  ;;  %v1591_v53 = vmul.f32 5.0, %v4249_v43  ;;  %v579_v43 = vld [vmem:[%s5640_s30 + $0xdc8] sm:$0xff] }
 0x24d   : > { %v1592_v54 = vmul.f32 5.0, %v4250_v44  ;;  %3626 = vst [vmem:[%s5687_s17 + $0xd00] sm:$0xff] %v3114_v47  ;;  %v3115_v56 = vadd.f32 0.5, %v2603_v48  ;;  %v2605_v57 = vmul.f32 0.5, %v5231_v51  ;;  %v4251_v58 = vadd.f32 -0.5, %v569_v45  ;;  %v580_v48 = vld [vmem:[%s5640_s30 + $0xdd0] sm:$0xff] }
 0x24e   : > { %v5233_v55 = vpop.eup %5232  ;;  %5248 = vtanh.f32 %v1590_v49  ;;  %v3116_v61 = vadd.f32 0.5, %v2604_v52  ;;  %v4252_v63 = vadd.f32 -0.5, %v570_v50  ;;  %v4253_v9 = vadd.f32 -0.5, %v571_v59  ;;  %v581_v49 = vld [vmem:[%s5640_s30 + $0xdd8] sm:$0xff] }
 0x24f   : > { %v5235_v60 = vpop.eup %5234  ;;  %v2606_v62 = vmul.f32 0.5, %v5233_v55  ;;  %5250 = vtanh.f32 %v1591_v53  ;;  %3627 = vst [vmem:[%s5687_s17 + $0xd08] sm:$0xff] %v3115_v56  ;;  %v3117_v3 = vadd.f32 0.5, %v2605_v57  ;;  %v1593_v5 = vmul.f32 5.0, %v4251_v58  ;;  %v582_v58 = vld [vmem:[%s5640_s30 + $0xde0] sm:$0xff] }
 0x250   : > { %v5237_v2 = vpop.eup %5236  ;;  %v2607_v4 = vmul.f32 0.5, %v5235_v60  ;;  %5252 = vtanh.f32 %v1592_v54  ;;  %3628 = vst [vmem:[%s5687_s17 + $0xd10] sm:$0xff] %v3116_v61  ;;  %v1594_v8 = vmul.f32 5.0, %v4252_v63  ;;  %v4254_v13 = vadd.f32 -0.5, %v572_v0  ;;  %v583_v63 = vld [vmem:[%s5640_s30 + $0xde8] sm:$0xff]  ;;  %v584_v0 = vld [vmem:[%s5640_s30 + $0xdf0] sm:$0xff] }
 0x251   : > { %v3118_v6 = vadd.f32 0.5, %v2606_v62  ;;  %v2608_v7 = vmul.f32 0.5, %v5237_v2  ;;  %v5239_v11 = vpop.eup %5238  ;;  %3629 = vst [vmem:[%s5687_s17 + $0xd18] sm:$0xff] %v3117_v3  ;;  %5254 = vtanh.f32 %v1593_v5  ;;  %v4255_v14 = vadd.f32 -0.5, %v573_v1 }
 0x252   : > { %v3119_v12 = vadd.f32 0.5, %v2607_v4  ;;  %v5241_v18 = vpop.eup %5240  ;;  %v2609_v19 = vmul.f32 0.5, %v5239_v11  ;;  %5256 = vtanh.f32 %v1594_v8  ;;  %v1595_v20 = vmul.f32 5.0, %v4253_v9 }
 0x253   : > { %3630 = vst [vmem:[%s5687_s17 + $0xd20] sm:$0xff] %v3118_v6  ;;  %v3120_v17 = vadd.f32 0.5, %v2608_v7  ;;  %v2610_v21 = vmul.f32 0.5, %v5241_v18  ;;  %v1596_v22 = vmul.f32 5.0, %v4254_v13  ;;  %v1597_v23 = vmul.f32 5.0, %v4255_v14  ;;  %v585_v13 = vld [vmem:[%s5640_s30 + $0xdf8] sm:$0xff] }
 0x254   : > { %3631 = vst [vmem:[%s5687_s17 + $0xd28] sm:$0xff] %v3119_v12  ;;  %v4256_v24 = vadd.f32 -0.5, %v574_v10  ;;  %v5243_v25 = vpop.eup %5242  ;;  %v3121_v26 = vadd.f32 0.5, %v2609_v19  ;;  %5258 = vtanh.f32 %v1595_v20  ;;  %v4257_v27 = vadd.f32 -0.5, %v575_v15 }
 0x255   : > { %3632 = vst [vmem:[%s5687_s17 + $0xd30] sm:$0xff] %v3120_v17  ;;  %v4258_v28 = vadd.f32 -0.5, %v576_v16  ;;  %v5245_v30 = vpop.eup %5244  ;;  %v3122_v31 = vadd.f32 0.5, %v2610_v21  ;;  %v2611_v32 = vmul.f32 0.5, %v5243_v25  ;;  %5260 = vtanh.f32 %v1596_v22  ;;  %v586_v17 = vld [vmem:[%s5640_s30 + $0xe00] sm:$0xff] }
 0x256   : > { %v1598_v33 = vmul.f32 5.0, %v4256_v24  ;;  %v5247_v35 = vpop.eup %5246  ;;  %3633 = vst [vmem:[%s5687_s17 + $0xd38] sm:$0xff] %v3121_v26  ;;  %v2612_v36 = vmul.f32 0.5, %v5245_v30  ;;  %5262 = vtanh.f32 %v1597_v23  ;;  %v1599_v37 = vmul.f32 5.0, %v4257_v27  ;;  %v587_v27 = vld [vmem:[%s5640_s30 + $0xe08] sm:$0xff] }
 0x257   : > { %v1600_v38 = vmul.f32 5.0, %v4258_v28  ;;  %3634 = vst [vmem:[%s5687_s17 + $0xd40] sm:$0xff] %v3122_v31  ;;  %v3123_v40 = vadd.f32 0.5, %v2611_v32  ;;  %v2613_v41 = vmul.f32 0.5, %v5247_v35  ;;  %v4259_v42 = vadd.f32 -0.5, %v577_v29  ;;  %v588_v32 = vld [vmem:[%s5640_s30 + $0xe10] sm:$0xff] }
 0x258   : > { %v5249_v39 = vpop.eup %5248  ;;  %5264 = vtanh.f32 %v1598_v33  ;;  %v3124_v45 = vadd.f32 0.5, %v2612_v36  ;;  %v4260_v47 = vadd.f32 -0.5, %v578_v34  ;;  %v4261_v57 = vadd.f32 -0.5, %v579_v43  ;;  %v589_v33 = vld [vmem:[%s5640_s30 + $0xe18] sm:$0xff] }
 0x259   : > { %v5251_v44 = vpop.eup %5250  ;;  %v2614_v46 = vmul.f32 0.5, %v5249_v39  ;;  %5266 = vtanh.f32 %v1599_v37  ;;  %3635 = vst [vmem:[%s5687_s17 + $0xd48] sm:$0xff] %v3123_v40  ;;  %v3125_v51 = vadd.f32 0.5, %v2613_v41  ;;  %v1601_v53 = vmul.f32 5.0, %v4259_v42  ;;  %v590_v42 = vld [vmem:[%s5640_s30 + $0xe20] sm:$0xff] }
 0x25a   : > { %v5253_v50 = vpop.eup %5252  ;;  %v2615_v52 = vmul.f32 0.5, %v5251_v44  ;;  %5268 = vtanh.f32 %v1600_v38  ;;  %3636 = vst [vmem:[%s5687_s17 + $0xd50] sm:$0xff] %v3124_v45  ;;  %v1602_v56 = vmul.f32 5.0, %v4260_v47  ;;  %v4262_v61 = vadd.f32 -0.5, %v580_v48  ;;  %v591_v47 = vld [vmem:[%s5640_s30 + $0xe28] sm:$0xff]  ;;  %v592_v48 = vld [vmem:[%s5640_s30 + $0xe30] sm:$0xff] }
 0x25b   : > { %v3126_v54 = vadd.f32 0.5, %v2614_v46  ;;  %v2616_v55 = vmul.f32 0.5, %v5253_v50  ;;  %v5255_v59 = vpop.eup %5254  ;;  %3637 = vst [vmem:[%s5687_s17 + $0xd58] sm:$0xff] %v3125_v51  ;;  %5270 = vtanh.f32 %v1601_v53  ;;  %v4263_v62 = vadd.f32 -0.5, %v581_v49 }
 0x25c   : > { %v3127_v60 = vadd.f32 0.5, %v2615_v52  ;;  %v5257_v1 = vpop.eup %5256  ;;  %v2617_v3 = vmul.f32 0.5, %v5255_v59  ;;  %5272 = vtanh.f32 %v1602_v56  ;;  %v1603_v4 = vmul.f32 5.0, %v4261_v57 }
 0x25d   : > { %3638 = vst [vmem:[%s5687_s17 + $0xd60] sm:$0xff] %v3126_v54  ;;  %v3128_v2 = vadd.f32 0.5, %v2616_v55  ;;  %v2618_v5 = vmul.f32 0.5, %v5257_v1  ;;  %v1604_v6 = vmul.f32 5.0, %v4262_v61  ;;  %v1605_v7 = vmul.f32 5.0, %v4263_v62  ;;  %v593_v61 = vld [vmem:[%s5640_s30 + $0xe38] sm:$0xff] }
 0x25e   : > { %3639 = vst [vmem:[%s5687_s17 + $0xd68] sm:$0xff] %v3127_v60  ;;  %v4264_v8 = vadd.f32 -0.5, %v582_v58  ;;  %v5259_v9 = vpop.eup %5258  ;;  %v3129_v10 = vadd.f32 0.5, %v2617_v3  ;;  %5274 = vtanh.f32 %v1603_v4  ;;  %v4265_v11 = vadd.f32 -0.5, %v583_v63 }
 0x25f   : > { %3640 = vst [vmem:[%s5687_s17 + $0xd70] sm:$0xff] %v3128_v2  ;;  %v4266_v12 = vadd.f32 -0.5, %v584_v0  ;;  %v5261_v14 = vpop.eup %5260  ;;  %v3130_v15 = vadd.f32 0.5, %v2618_v5  ;;  %v2619_v16 = vmul.f32 0.5, %v5259_v9  ;;  %5276 = vtanh.f32 %v1604_v6  ;;  %v594_v2 = vld [vmem:[%s5640_s30 + $0xe40] sm:$0xff] }
 0x260   : > { %v1606_v18 = vmul.f32 5.0, %v4264_v8  ;;  %v5263_v19 = vpop.eup %5262  ;;  %3641 = vst [vmem:[%s5687_s17 + $0xd78] sm:$0xff] %v3129_v10  ;;  %v2620_v20 = vmul.f32 0.5, %v5261_v14  ;;  %5278 = vtanh.f32 %v1605_v7  ;;  %v1607_v21 = vmul.f32 5.0, %v4265_v11  ;;  %v595_v11 = vld [vmem:[%s5640_s30 + $0xe48] sm:$0xff] }
 0x261   : > { %v1608_v22 = vmul.f32 5.0, %v4266_v12  ;;  %3642 = vst [vmem:[%s5687_s17 + $0xd80] sm:$0xff] %v3130_v15  ;;  %v3131_v24 = vadd.f32 0.5, %v2619_v16  ;;  %v2621_v25 = vmul.f32 0.5, %v5263_v19  ;;  %v4267_v26 = vadd.f32 -0.5, %v585_v13  ;;  %v596_v16 = vld [vmem:[%s5640_s30 + $0xe50] sm:$0xff] }
 0x262   : > { %v5265_v23 = vpop.eup %5264  ;;  %5280 = vtanh.f32 %v1606_v18  ;;  %v3132_v29 = vadd.f32 0.5, %v2620_v20  ;;  %v4268_v31 = vadd.f32 -0.5, %v586_v17  ;;  %v4269_v41 = vadd.f32 -0.5, %v587_v27  ;;  %v597_v18 = vld [vmem:[%s5640_s30 + $0xe58] sm:$0xff] }
 0x263   : > { %v5267_v28 = vpop.eup %5266  ;;  %v2622_v30 = vmul.f32 0.5, %v5265_v23  ;;  %5282 = vtanh.f32 %v1607_v21  ;;  %3643 = vst [vmem:[%s5687_s17 + $0xd88] sm:$0xff] %v3131_v24  ;;  %v3133_v35 = vadd.f32 0.5, %v2621_v25  ;;  %v1609_v37 = vmul.f32 5.0, %v4267_v26  ;;  %v598_v26 = vld [vmem:[%s5640_s30 + $0xe60] sm:$0xff] }
 0x264   : > { %v5269_v34 = vpop.eup %5268  ;;  %v2623_v36 = vmul.f32 0.5, %v5267_v28  ;;  %5284 = vtanh.f32 %v1608_v22  ;;  %3644 = vst [vmem:[%s5687_s17 + $0xd90] sm:$0xff] %v3132_v29  ;;  %v1610_v40 = vmul.f32 5.0, %v4268_v31  ;;  %v4270_v45 = vadd.f32 -0.5, %v588_v32  ;;  %v599_v31 = vld [vmem:[%s5640_s30 + $0xe68] sm:$0xff]  ;;  %v600_v32 = vld [vmem:[%s5640_s30 + $0xe70] sm:$0xff] }
 0x265   : > { %v3134_v38 = vadd.f32 0.5, %v2622_v30  ;;  %v2624_v39 = vmul.f32 0.5, %v5269_v34  ;;  %v5271_v43 = vpop.eup %5270  ;;  %3645 = vst [vmem:[%s5687_s17 + $0xd98] sm:$0xff] %v3133_v35  ;;  %5286 = vtanh.f32 %v1609_v37  ;;  %v4271_v46 = vadd.f32 -0.5, %v589_v33 }
 0x266   : > { %v3135_v44 = vadd.f32 0.5, %v2623_v36  ;;  %v5273_v49 = vpop.eup %5272  ;;  %v2625_v51 = vmul.f32 0.5, %v5271_v43  ;;  %5288 = vtanh.f32 %v1610_v40  ;;  %v1611_v52 = vmul.f32 5.0, %v4269_v41 }
 0x267   : > { %3646 = vst [vmem:[%s5687_s17 + $0xda0] sm:$0xff] %v3134_v38  ;;  %v3136_v50 = vadd.f32 0.5, %v2624_v39  ;;  %v2626_v53 = vmul.f32 0.5, %v5273_v49  ;;  %v1612_v54 = vmul.f32 5.0, %v4270_v45  ;;  %v1613_v55 = vmul.f32 5.0, %v4271_v46  ;;  %v601_v45 = vld [vmem:[%s5640_s30 + $0xe78] sm:$0xff] }
 0x268   : > { %3647 = vst [vmem:[%s5687_s17 + $0xda8] sm:$0xff] %v3135_v44  ;;  %v4272_v56 = vadd.f32 -0.5, %v590_v42  ;;  %v5275_v57 = vpop.eup %5274  ;;  %v3137_v58 = vadd.f32 0.5, %v2625_v51  ;;  %5290 = vtanh.f32 %v1611_v52  ;;  %v4273_v59 = vadd.f32 -0.5, %v591_v47 }
 0x269   : > { %3648 = vst [vmem:[%s5687_s17 + $0xdb0] sm:$0xff] %v3136_v50  ;;  %v4274_v60 = vadd.f32 -0.5, %v592_v48  ;;  %v5277_v62 = vpop.eup %5276  ;;  %v3138_v63 = vadd.f32 0.5, %v2626_v53  ;;  %v2627_v0 = vmul.f32 0.5, %v5275_v57  ;;  %5292 = vtanh.f32 %v1612_v54  ;;  %v602_v50 = vld [vmem:[%s5640_s30 + $0xe80] sm:$0xff] }
 0x26a   : > { %v1614_v1 = vmul.f32 5.0, %v4272_v56  ;;  %v5279_v3 = vpop.eup %5278  ;;  %3649 = vst [vmem:[%s5687_s17 + $0xdb8] sm:$0xff] %v3137_v58  ;;  %v2628_v4 = vmul.f32 0.5, %v5277_v62  ;;  %5294 = vtanh.f32 %v1613_v55  ;;  %v1615_v5 = vmul.f32 5.0, %v4273_v59  ;;  %v603_v59 = vld [vmem:[%s5640_s30 + $0xe88] sm:$0xff] }
 0x26b   : > { %v1616_v6 = vmul.f32 5.0, %v4274_v60  ;;  %3650 = vst [vmem:[%s5687_s17 + $0xdc0] sm:$0xff] %v3138_v63  ;;  %v3139_v8 = vadd.f32 0.5, %v2627_v0  ;;  %v2629_v9 = vmul.f32 0.5, %v5279_v3  ;;  %v4275_v10 = vadd.f32 -0.5, %v593_v61  ;;  %v604_v0 = vld [vmem:[%s5640_s30 + $0xe90] sm:$0xff] }
 0x26c   : > { %v5281_v7 = vpop.eup %5280  ;;  %5296 = vtanh.f32 %v1614_v1  ;;  %v3140_v13 = vadd.f32 0.5, %v2628_v4  ;;  %v4276_v15 = vadd.f32 -0.5, %v594_v2  ;;  %v4277_v25 = vadd.f32 -0.5, %v595_v11  ;;  %v605_v1 = vld [vmem:[%s5640_s30 + $0xe98] sm:$0xff] }
 0x26d   : > { %v5283_v12 = vpop.eup %5282  ;;  %v2630_v14 = vmul.f32 0.5, %v5281_v7  ;;  %5298 = vtanh.f32 %v1615_v5  ;;  %3651 = vst [vmem:[%s5687_s17 + $0xdc8] sm:$0xff] %v3139_v8  ;;  %v3141_v19 = vadd.f32 0.5, %v2629_v9  ;;  %v1617_v21 = vmul.f32 5.0, %v4275_v10  ;;  %v606_v10 = vld [vmem:[%s5640_s30 + $0xea0] sm:$0xff] }
 0x26e   : > { %v5285_v17 = vpop.eup %5284  ;;  %v2631_v20 = vmul.f32 0.5, %v5283_v12  ;;  %5300 = vtanh.f32 %v1616_v6  ;;  %3652 = vst [vmem:[%s5687_s17 + $0xdd0] sm:$0xff] %v3140_v13  ;;  %v1618_v24 = vmul.f32 5.0, %v4276_v15  ;;  %v4278_v29 = vadd.f32 -0.5, %v596_v16  ;;  %v607_v15 = vld [vmem:[%s5640_s30 + $0xea8] sm:$0xff]  ;;  %v608_v16 = vld [vmem:[%s5640_s30 + $0xeb0] sm:$0xff] }
 0x26f   : > { %v3142_v22 = vadd.f32 0.5, %v2630_v14  ;;  %v2632_v23 = vmul.f32 0.5, %v5285_v17  ;;  %v5287_v27 = vpop.eup %5286  ;;  %3653 = vst [vmem:[%s5687_s17 + $0xdd8] sm:$0xff] %v3141_v19  ;;  %5302 = vtanh.f32 %v1617_v21  ;;  %v4279_v30 = vadd.f32 -0.5, %v597_v18 }
 0x270   : > { %v3143_v28 = vadd.f32 0.5, %v2631_v20  ;;  %v5289_v33 = vpop.eup %5288  ;;  %v2633_v35 = vmul.f32 0.5, %v5287_v27  ;;  %5304 = vtanh.f32 %v1618_v24  ;;  %v1619_v36 = vmul.f32 5.0, %v4277_v25 }
 0x271   : > { %3654 = vst [vmem:[%s5687_s17 + $0xde0] sm:$0xff] %v3142_v22  ;;  %v3144_v34 = vadd.f32 0.5, %v2632_v23  ;;  %v2634_v37 = vmul.f32 0.5, %v5289_v33  ;;  %v1620_v38 = vmul.f32 5.0, %v4278_v29  ;;  %v1621_v39 = vmul.f32 5.0, %v4279_v30  ;;  %v609_v29 = vld [vmem:[%s5640_s30 + $0xeb8] sm:$0xff] }
 0x272   : > { %3655 = vst [vmem:[%s5687_s17 + $0xde8] sm:$0xff] %v3143_v28  ;;  %v4280_v40 = vadd.f32 -0.5, %v598_v26  ;;  %v5291_v41 = vpop.eup %5290  ;;  %v3145_v42 = vadd.f32 0.5, %v2633_v35  ;;  %5306 = vtanh.f32 %v1619_v36  ;;  %v4281_v43 = vadd.f32 -0.5, %v599_v31 }
 0x273   : > { %3656 = vst [vmem:[%s5687_s17 + $0xdf0] sm:$0xff] %v3144_v34  ;;  %v4282_v44 = vadd.f32 -0.5, %v600_v32  ;;  %v5293_v46 = vpop.eup %5292  ;;  %v3146_v47 = vadd.f32 0.5, %v2634_v37  ;;  %v2635_v48 = vmul.f32 0.5, %v5291_v41  ;;  %5308 = vtanh.f32 %v1620_v38  ;;  %v610_v34 = vld [vmem:[%s5640_s30 + $0xec0] sm:$0xff] }
 0x274   : > { %v1622_v49 = vmul.f32 5.0, %v4280_v40  ;;  %v5295_v51 = vpop.eup %5294  ;;  %3657 = vst [vmem:[%s5687_s17 + $0xdf8] sm:$0xff] %v3145_v42  ;;  %v2636_v52 = vmul.f32 0.5, %v5293_v46  ;;  %5310 = vtanh.f32 %v1621_v39  ;;  %v1623_v53 = vmul.f32 5.0, %v4281_v43  ;;  %v611_v43 = vld [vmem:[%s5640_s30 + $0xec8] sm:$0xff] }
 0x275   : > { %v1624_v54 = vmul.f32 5.0, %v4282_v44  ;;  %3658 = vst [vmem:[%s5687_s17 + $0xe00] sm:$0xff] %v3146_v47  ;;  %v3147_v56 = vadd.f32 0.5, %v2635_v48  ;;  %v2637_v57 = vmul.f32 0.5, %v5295_v51  ;;  %v4283_v58 = vadd.f32 -0.5, %v601_v45  ;;  %v612_v48 = vld [vmem:[%s5640_s30 + $0xed0] sm:$0xff] }
 0x276   : > { %v5297_v55 = vpop.eup %5296  ;;  %5312 = vtanh.f32 %v1622_v49  ;;  %v3148_v61 = vadd.f32 0.5, %v2636_v52  ;;  %v4284_v63 = vadd.f32 -0.5, %v602_v50  ;;  %v4285_v9 = vadd.f32 -0.5, %v603_v59  ;;  %v613_v49 = vld [vmem:[%s5640_s30 + $0xed8] sm:$0xff] }
 0x277   : > { %v5299_v60 = vpop.eup %5298  ;;  %v2638_v62 = vmul.f32 0.5, %v5297_v55  ;;  %5314 = vtanh.f32 %v1623_v53  ;;  %3659 = vst [vmem:[%s5687_s17 + $0xe08] sm:$0xff] %v3147_v56  ;;  %v3149_v3 = vadd.f32 0.5, %v2637_v57  ;;  %v1625_v5 = vmul.f32 5.0, %v4283_v58  ;;  %v614_v58 = vld [vmem:[%s5640_s30 + $0xee0] sm:$0xff] }
 0x278   : > { %v5301_v2 = vpop.eup %5300  ;;  %v2639_v4 = vmul.f32 0.5, %v5299_v60  ;;  %5316 = vtanh.f32 %v1624_v54  ;;  %3660 = vst [vmem:[%s5687_s17 + $0xe10] sm:$0xff] %v3148_v61  ;;  %v1626_v8 = vmul.f32 5.0, %v4284_v63  ;;  %v4286_v13 = vadd.f32 -0.5, %v604_v0  ;;  %v615_v63 = vld [vmem:[%s5640_s30 + $0xee8] sm:$0xff]  ;;  %v616_v0 = vld [vmem:[%s5640_s30 + $0xef0] sm:$0xff] }
 0x279   : > { %v3150_v6 = vadd.f32 0.5, %v2638_v62  ;;  %v2640_v7 = vmul.f32 0.5, %v5301_v2  ;;  %v5303_v11 = vpop.eup %5302  ;;  %3661 = vst [vmem:[%s5687_s17 + $0xe18] sm:$0xff] %v3149_v3  ;;  %5318 = vtanh.f32 %v1625_v5  ;;  %v4287_v14 = vadd.f32 -0.5, %v605_v1 }
 0x27a   : > { %v3151_v12 = vadd.f32 0.5, %v2639_v4  ;;  %v5305_v18 = vpop.eup %5304  ;;  %v2641_v19 = vmul.f32 0.5, %v5303_v11  ;;  %5320 = vtanh.f32 %v1626_v8  ;;  %v1627_v20 = vmul.f32 5.0, %v4285_v9 }
 0x27b   : > { %3662 = vst [vmem:[%s5687_s17 + $0xe20] sm:$0xff] %v3150_v6  ;;  %v3152_v17 = vadd.f32 0.5, %v2640_v7  ;;  %v2642_v21 = vmul.f32 0.5, %v5305_v18  ;;  %v1628_v22 = vmul.f32 5.0, %v4286_v13  ;;  %v1629_v23 = vmul.f32 5.0, %v4287_v14  ;;  %v617_v13 = vld [vmem:[%s5640_s30 + $0xef8] sm:$0xff] }
 0x27c   : > { %3663 = vst [vmem:[%s5687_s17 + $0xe28] sm:$0xff] %v3151_v12  ;;  %v4288_v24 = vadd.f32 -0.5, %v606_v10  ;;  %v5307_v25 = vpop.eup %5306  ;;  %v3153_v26 = vadd.f32 0.5, %v2641_v19  ;;  %5322 = vtanh.f32 %v1627_v20  ;;  %v4289_v27 = vadd.f32 -0.5, %v607_v15 }
 0x27d   : > { %3664 = vst [vmem:[%s5687_s17 + $0xe30] sm:$0xff] %v3152_v17  ;;  %v4290_v28 = vadd.f32 -0.5, %v608_v16  ;;  %v5309_v30 = vpop.eup %5308  ;;  %v3154_v31 = vadd.f32 0.5, %v2642_v21  ;;  %v2643_v32 = vmul.f32 0.5, %v5307_v25  ;;  %5324 = vtanh.f32 %v1628_v22  ;;  %v618_v17 = vld [vmem:[%s5640_s30 + $0xf00] sm:$0xff] }
 0x27e   : > { %v1630_v33 = vmul.f32 5.0, %v4288_v24  ;;  %v5311_v35 = vpop.eup %5310  ;;  %3665 = vst [vmem:[%s5687_s17 + $0xe38] sm:$0xff] %v3153_v26  ;;  %v2644_v36 = vmul.f32 0.5, %v5309_v30  ;;  %5326 = vtanh.f32 %v1629_v23  ;;  %v1631_v37 = vmul.f32 5.0, %v4289_v27  ;;  %v619_v27 = vld [vmem:[%s5640_s30 + $0xf08] sm:$0xff] }
 0x27f   : > { %v1632_v38 = vmul.f32 5.0, %v4290_v28  ;;  %3666 = vst [vmem:[%s5687_s17 + $0xe40] sm:$0xff] %v3154_v31  ;;  %v3155_v40 = vadd.f32 0.5, %v2643_v32  ;;  %v2645_v41 = vmul.f32 0.5, %v5311_v35  ;;  %v4291_v42 = vadd.f32 -0.5, %v609_v29  ;;  %v620_v32 = vld [vmem:[%s5640_s30 + $0xf10] sm:$0xff] }
 0x280   : > { %v5313_v39 = vpop.eup %5312  ;;  %5328 = vtanh.f32 %v1630_v33  ;;  %v3156_v45 = vadd.f32 0.5, %v2644_v36  ;;  %v4292_v47 = vadd.f32 -0.5, %v610_v34  ;;  %v4293_v57 = vadd.f32 -0.5, %v611_v43  ;;  %v621_v33 = vld [vmem:[%s5640_s30 + $0xf18] sm:$0xff] }
 0x281   : > { %v5315_v44 = vpop.eup %5314  ;;  %v2646_v46 = vmul.f32 0.5, %v5313_v39  ;;  %5330 = vtanh.f32 %v1631_v37  ;;  %3667 = vst [vmem:[%s5687_s17 + $0xe48] sm:$0xff] %v3155_v40  ;;  %v3157_v51 = vadd.f32 0.5, %v2645_v41  ;;  %v1633_v53 = vmul.f32 5.0, %v4291_v42  ;;  %v622_v42 = vld [vmem:[%s5640_s30 + $0xf20] sm:$0xff] }
 0x282   : > { %v5317_v50 = vpop.eup %5316  ;;  %v2647_v52 = vmul.f32 0.5, %v5315_v44  ;;  %5332 = vtanh.f32 %v1632_v38  ;;  %3668 = vst [vmem:[%s5687_s17 + $0xe50] sm:$0xff] %v3156_v45  ;;  %v1634_v56 = vmul.f32 5.0, %v4292_v47  ;;  %v4294_v61 = vadd.f32 -0.5, %v612_v48  ;;  %v623_v47 = vld [vmem:[%s5640_s30 + $0xf28] sm:$0xff]  ;;  %v624_v48 = vld [vmem:[%s5640_s30 + $0xf30] sm:$0xff] }
 0x283   : > { %v3158_v54 = vadd.f32 0.5, %v2646_v46  ;;  %v2648_v55 = vmul.f32 0.5, %v5317_v50  ;;  %v5319_v59 = vpop.eup %5318  ;;  %3669 = vst [vmem:[%s5687_s17 + $0xe58] sm:$0xff] %v3157_v51  ;;  %5334 = vtanh.f32 %v1633_v53  ;;  %v4295_v62 = vadd.f32 -0.5, %v613_v49 }
 0x284   : > { %v3159_v60 = vadd.f32 0.5, %v2647_v52  ;;  %v5321_v1 = vpop.eup %5320  ;;  %v2649_v3 = vmul.f32 0.5, %v5319_v59  ;;  %5336 = vtanh.f32 %v1634_v56  ;;  %v1635_v4 = vmul.f32 5.0, %v4293_v57 }
 0x285   : > { %3670 = vst [vmem:[%s5687_s17 + $0xe60] sm:$0xff] %v3158_v54  ;;  %v3160_v2 = vadd.f32 0.5, %v2648_v55  ;;  %v2650_v5 = vmul.f32 0.5, %v5321_v1  ;;  %v1636_v6 = vmul.f32 5.0, %v4294_v61  ;;  %v1637_v7 = vmul.f32 5.0, %v4295_v62  ;;  %v625_v61 = vld [vmem:[%s5640_s30 + $0xf38] sm:$0xff] }
 0x286   : > { %3671 = vst [vmem:[%s5687_s17 + $0xe68] sm:$0xff] %v3159_v60  ;;  %v4296_v8 = vadd.f32 -0.5, %v614_v58  ;;  %v5323_v9 = vpop.eup %5322  ;;  %v3161_v10 = vadd.f32 0.5, %v2649_v3  ;;  %5338 = vtanh.f32 %v1635_v4  ;;  %v4297_v11 = vadd.f32 -0.5, %v615_v63 }
 0x287   : > { %3672 = vst [vmem:[%s5687_s17 + $0xe70] sm:$0xff] %v3160_v2  ;;  %v4298_v12 = vadd.f32 -0.5, %v616_v0  ;;  %v5325_v14 = vpop.eup %5324  ;;  %v3162_v15 = vadd.f32 0.5, %v2650_v5  ;;  %v2651_v16 = vmul.f32 0.5, %v5323_v9  ;;  %5340 = vtanh.f32 %v1636_v6  ;;  %v626_v2 = vld [vmem:[%s5640_s30 + $0xf40] sm:$0xff] }
 0x288   : > { %v1638_v18 = vmul.f32 5.0, %v4296_v8  ;;  %v5327_v19 = vpop.eup %5326  ;;  %3673 = vst [vmem:[%s5687_s17 + $0xe78] sm:$0xff] %v3161_v10  ;;  %v2652_v20 = vmul.f32 0.5, %v5325_v14  ;;  %5342 = vtanh.f32 %v1637_v7  ;;  %v1639_v21 = vmul.f32 5.0, %v4297_v11  ;;  %v627_v11 = vld [vmem:[%s5640_s30 + $0xf48] sm:$0xff] }
 0x289   : > { %v1640_v22 = vmul.f32 5.0, %v4298_v12  ;;  %3674 = vst [vmem:[%s5687_s17 + $0xe80] sm:$0xff] %v3162_v15  ;;  %v3163_v24 = vadd.f32 0.5, %v2651_v16  ;;  %v2653_v25 = vmul.f32 0.5, %v5327_v19  ;;  %v4299_v26 = vadd.f32 -0.5, %v617_v13  ;;  %v628_v16 = vld [vmem:[%s5640_s30 + $0xf50] sm:$0xff] }
 0x28a   : > { %v5329_v23 = vpop.eup %5328  ;;  %5344 = vtanh.f32 %v1638_v18  ;;  %v3164_v29 = vadd.f32 0.5, %v2652_v20  ;;  %v4300_v31 = vadd.f32 -0.5, %v618_v17  ;;  %v4301_v41 = vadd.f32 -0.5, %v619_v27  ;;  %v629_v18 = vld [vmem:[%s5640_s30 + $0xf58] sm:$0xff] }
 0x28b   : > { %v5331_v28 = vpop.eup %5330  ;;  %v2654_v30 = vmul.f32 0.5, %v5329_v23  ;;  %5346 = vtanh.f32 %v1639_v21  ;;  %3675 = vst [vmem:[%s5687_s17 + $0xe88] sm:$0xff] %v3163_v24  ;;  %v3165_v35 = vadd.f32 0.5, %v2653_v25  ;;  %v1641_v37 = vmul.f32 5.0, %v4299_v26  ;;  %v630_v26 = vld [vmem:[%s5640_s30 + $0xf60] sm:$0xff] }
 0x28c   : > { %v5333_v34 = vpop.eup %5332  ;;  %v2655_v36 = vmul.f32 0.5, %v5331_v28  ;;  %5348 = vtanh.f32 %v1640_v22  ;;  %3676 = vst [vmem:[%s5687_s17 + $0xe90] sm:$0xff] %v3164_v29  ;;  %v1642_v40 = vmul.f32 5.0, %v4300_v31  ;;  %v4302_v45 = vadd.f32 -0.5, %v620_v32  ;;  %v631_v31 = vld [vmem:[%s5640_s30 + $0xf68] sm:$0xff]  ;;  %v632_v32 = vld [vmem:[%s5640_s30 + $0xf70] sm:$0xff] }
 0x28d   : > { %v3166_v38 = vadd.f32 0.5, %v2654_v30  ;;  %v2656_v39 = vmul.f32 0.5, %v5333_v34  ;;  %v5335_v43 = vpop.eup %5334  ;;  %3677 = vst [vmem:[%s5687_s17 + $0xe98] sm:$0xff] %v3165_v35  ;;  %5350 = vtanh.f32 %v1641_v37  ;;  %v4303_v46 = vadd.f32 -0.5, %v621_v33 }
 0x28e   : > { %v3167_v44 = vadd.f32 0.5, %v2655_v36  ;;  %v5337_v49 = vpop.eup %5336  ;;  %v2657_v51 = vmul.f32 0.5, %v5335_v43  ;;  %5352 = vtanh.f32 %v1642_v40  ;;  %v1643_v52 = vmul.f32 5.0, %v4301_v41 }
 0x28f   : > { %3678 = vst [vmem:[%s5687_s17 + $0xea0] sm:$0xff] %v3166_v38  ;;  %v3168_v50 = vadd.f32 0.5, %v2656_v39  ;;  %v2658_v53 = vmul.f32 0.5, %v5337_v49  ;;  %v1644_v54 = vmul.f32 5.0, %v4302_v45  ;;  %v1645_v55 = vmul.f32 5.0, %v4303_v46  ;;  %v633_v45 = vld [vmem:[%s5640_s30 + $0xf78] sm:$0xff] }
 0x290   : > { %3679 = vst [vmem:[%s5687_s17 + $0xea8] sm:$0xff] %v3167_v44  ;;  %v4304_v56 = vadd.f32 -0.5, %v622_v42  ;;  %v5339_v57 = vpop.eup %5338  ;;  %v3169_v58 = vadd.f32 0.5, %v2657_v51  ;;  %5354 = vtanh.f32 %v1643_v52  ;;  %v4305_v59 = vadd.f32 -0.5, %v623_v47 }
 0x291   : > { %3680 = vst [vmem:[%s5687_s17 + $0xeb0] sm:$0xff] %v3168_v50  ;;  %v4306_v60 = vadd.f32 -0.5, %v624_v48  ;;  %v5341_v62 = vpop.eup %5340  ;;  %v3170_v63 = vadd.f32 0.5, %v2658_v53  ;;  %v2659_v0 = vmul.f32 0.5, %v5339_v57  ;;  %5356 = vtanh.f32 %v1644_v54  ;;  %v634_v50 = vld [vmem:[%s5640_s30 + $0xf80] sm:$0xff] }
 0x292   : > { %v1646_v1 = vmul.f32 5.0, %v4304_v56  ;;  %v5343_v3 = vpop.eup %5342  ;;  %3681 = vst [vmem:[%s5687_s17 + $0xeb8] sm:$0xff] %v3169_v58  ;;  %v2660_v4 = vmul.f32 0.5, %v5341_v62  ;;  %5358 = vtanh.f32 %v1645_v55  ;;  %v1647_v5 = vmul.f32 5.0, %v4305_v59  ;;  %v635_v59 = vld [vmem:[%s5640_s30 + $0xf88] sm:$0xff] }
 0x293   : > { %v1648_v6 = vmul.f32 5.0, %v4306_v60  ;;  %3682 = vst [vmem:[%s5687_s17 + $0xec0] sm:$0xff] %v3170_v63  ;;  %v3171_v8 = vadd.f32 0.5, %v2659_v0  ;;  %v2661_v9 = vmul.f32 0.5, %v5343_v3  ;;  %v4307_v10 = vadd.f32 -0.5, %v625_v61  ;;  %v636_v0 = vld [vmem:[%s5640_s30 + $0xf90] sm:$0xff] }
 0x294   : > { %v5345_v7 = vpop.eup %5344  ;;  %5360 = vtanh.f32 %v1646_v1  ;;  %v3172_v13 = vadd.f32 0.5, %v2660_v4  ;;  %v4308_v15 = vadd.f32 -0.5, %v626_v2  ;;  %v4309_v25 = vadd.f32 -0.5, %v627_v11  ;;  %v637_v1 = vld [vmem:[%s5640_s30 + $0xf98] sm:$0xff] }
 0x295   : > { %v5347_v12 = vpop.eup %5346  ;;  %v2662_v14 = vmul.f32 0.5, %v5345_v7  ;;  %5362 = vtanh.f32 %v1647_v5  ;;  %3683 = vst [vmem:[%s5687_s17 + $0xec8] sm:$0xff] %v3171_v8  ;;  %v3173_v19 = vadd.f32 0.5, %v2661_v9  ;;  %v1649_v21 = vmul.f32 5.0, %v4307_v10  ;;  %v638_v10 = vld [vmem:[%s5640_s30 + $0xfa0] sm:$0xff] }
 0x296   : > { %v5349_v17 = vpop.eup %5348  ;;  %v2663_v20 = vmul.f32 0.5, %v5347_v12  ;;  %5364 = vtanh.f32 %v1648_v6  ;;  %3684 = vst [vmem:[%s5687_s17 + $0xed0] sm:$0xff] %v3172_v13  ;;  %v1650_v24 = vmul.f32 5.0, %v4308_v15  ;;  %v4310_v29 = vadd.f32 -0.5, %v628_v16  ;;  %v639_v15 = vld [vmem:[%s5640_s30 + $0xfa8] sm:$0xff]  ;;  %v640_v16 = vld [vmem:[%s5640_s30 + $0xfb0] sm:$0xff] }
 0x297   : > { %v3174_v22 = vadd.f32 0.5, %v2662_v14  ;;  %v2664_v23 = vmul.f32 0.5, %v5349_v17  ;;  %v5351_v27 = vpop.eup %5350  ;;  %3685 = vst [vmem:[%s5687_s17 + $0xed8] sm:$0xff] %v3173_v19  ;;  %5366 = vtanh.f32 %v1649_v21  ;;  %v4311_v30 = vadd.f32 -0.5, %v629_v18 }
 0x298   : > { %v3175_v28 = vadd.f32 0.5, %v2663_v20  ;;  %v5353_v33 = vpop.eup %5352  ;;  %v2665_v35 = vmul.f32 0.5, %v5351_v27  ;;  %5368 = vtanh.f32 %v1650_v24  ;;  %v1651_v36 = vmul.f32 5.0, %v4309_v25 }
 0x299   : > { %3686 = vst [vmem:[%s5687_s17 + $0xee0] sm:$0xff] %v3174_v22  ;;  %v3176_v34 = vadd.f32 0.5, %v2664_v23  ;;  %v2666_v37 = vmul.f32 0.5, %v5353_v33  ;;  %v1652_v38 = vmul.f32 5.0, %v4310_v29  ;;  %v1653_v39 = vmul.f32 5.0, %v4311_v30  ;;  %v641_v29 = vld [vmem:[%s5640_s30 + $0xfb8] sm:$0xff] }
 0x29a   : > { %3687 = vst [vmem:[%s5687_s17 + $0xee8] sm:$0xff] %v3175_v28  ;;  %v4312_v40 = vadd.f32 -0.5, %v630_v26  ;;  %v5355_v41 = vpop.eup %5354  ;;  %v3177_v42 = vadd.f32 0.5, %v2665_v35  ;;  %5370 = vtanh.f32 %v1651_v36  ;;  %v4313_v43 = vadd.f32 -0.5, %v631_v31 }
 0x29b   : > { %3688 = vst [vmem:[%s5687_s17 + $0xef0] sm:$0xff] %v3176_v34  ;;  %v4314_v44 = vadd.f32 -0.5, %v632_v32  ;;  %v5357_v46 = vpop.eup %5356  ;;  %v3178_v47 = vadd.f32 0.5, %v2666_v37  ;;  %v2667_v48 = vmul.f32 0.5, %v5355_v41  ;;  %5372 = vtanh.f32 %v1652_v38  ;;  %v642_v34 = vld [vmem:[%s5640_s30 + $0xfc0] sm:$0xff] }
 0x29c   : > { %v1654_v49 = vmul.f32 5.0, %v4312_v40  ;;  %v5359_v51 = vpop.eup %5358  ;;  %3689 = vst [vmem:[%s5687_s17 + $0xef8] sm:$0xff] %v3177_v42  ;;  %v2668_v52 = vmul.f32 0.5, %v5357_v46  ;;  %5374 = vtanh.f32 %v1653_v39  ;;  %v1655_v53 = vmul.f32 5.0, %v4313_v43  ;;  %v643_v43 = vld [vmem:[%s5640_s30 + $0xfc8] sm:$0xff] }
 0x29d   : > { %v1656_v54 = vmul.f32 5.0, %v4314_v44  ;;  %3690 = vst [vmem:[%s5687_s17 + $0xf00] sm:$0xff] %v3178_v47  ;;  %v3179_v56 = vadd.f32 0.5, %v2667_v48  ;;  %v2669_v57 = vmul.f32 0.5, %v5359_v51  ;;  %v4315_v58 = vadd.f32 -0.5, %v633_v45  ;;  %v644_v48 = vld [vmem:[%s5640_s30 + $0xfd0] sm:$0xff] }
 0x29e   : > { %v5361_v55 = vpop.eup %5360  ;;  %5376 = vtanh.f32 %v1654_v49  ;;  %v3180_v61 = vadd.f32 0.5, %v2668_v52  ;;  %v4316_v63 = vadd.f32 -0.5, %v634_v50  ;;  %v4317_v9 = vadd.f32 -0.5, %v635_v59  ;;  %v645_v49 = vld [vmem:[%s5640_s30 + $0xfd8] sm:$0xff] }
 0x29f   : > { %v5363_v60 = vpop.eup %5362  ;;  %v2670_v62 = vmul.f32 0.5, %v5361_v55  ;;  %5378 = vtanh.f32 %v1655_v53  ;;  %3691 = vst [vmem:[%s5687_s17 + $0xf08] sm:$0xff] %v3179_v56  ;;  %v3181_v3 = vadd.f32 0.5, %v2669_v57  ;;  %v1657_v5 = vmul.f32 5.0, %v4315_v58  ;;  %v646_v58 = vld [vmem:[%s5640_s30 + $0xfe0] sm:$0xff] }
 0x2a0   : > { %v5365_v2 = vpop.eup %5364  ;;  %v2671_v4 = vmul.f32 0.5, %v5363_v60  ;;  %5380 = vtanh.f32 %v1656_v54  ;;  %3692 = vst [vmem:[%s5687_s17 + $0xf10] sm:$0xff] %v3180_v61  ;;  %v1658_v8 = vmul.f32 5.0, %v4316_v63  ;;  %v4318_v13 = vadd.f32 -0.5, %v636_v0  ;;  %v647_v63 = vld [vmem:[%s5640_s30 + $0xfe8] sm:$0xff]  ;;  %v648_v0 = vld [vmem:[%s5640_s30 + $0xff0] sm:$0xff] }
 0x2a1   : > { %v3182_v6 = vadd.f32 0.5, %v2670_v62  ;;  %v2672_v7 = vmul.f32 0.5, %v5365_v2  ;;  %v5367_v11 = vpop.eup %5366  ;;  %3693 = vst [vmem:[%s5687_s17 + $0xf18] sm:$0xff] %v3181_v3  ;;  %5382 = vtanh.f32 %v1657_v5  ;;  %v4319_v14 = vadd.f32 -0.5, %v637_v1 }
 0x2a2   : > { %v3183_v12 = vadd.f32 0.5, %v2671_v4  ;;  %v5369_v18 = vpop.eup %5368  ;;  %v2673_v19 = vmul.f32 0.5, %v5367_v11  ;;  %5384 = vtanh.f32 %v1658_v8  ;;  %v1659_v20 = vmul.f32 5.0, %v4317_v9 }
 0x2a3   : > { %3694 = vst [vmem:[%s5687_s17 + $0xf20] sm:$0xff] %v3182_v6  ;;  %v3184_v17 = vadd.f32 0.5, %v2672_v7  ;;  %v2674_v21 = vmul.f32 0.5, %v5369_v18  ;;  %v1660_v22 = vmul.f32 5.0, %v4318_v13  ;;  %v1661_v23 = vmul.f32 5.0, %v4319_v14  ;;  %v649_v13 = vld [vmem:[%s5640_s30 + $0xff8] sm:$0xff] }
 0x2a4   : > { %3695 = vst [vmem:[%s5687_s17 + $0xf28] sm:$0xff] %v3183_v12  ;;  %v4320_v24 = vadd.f32 -0.5, %v638_v10  ;;  %v5371_v25 = vpop.eup %5370  ;;  %v3185_v26 = vadd.f32 0.5, %v2673_v19  ;;  %5386 = vtanh.f32 %v1659_v20  ;;  %v4321_v27 = vadd.f32 -0.5, %v639_v15 }
 0x2a5   : > { %3696 = vst [vmem:[%s5687_s17 + $0xf30] sm:$0xff] %v3184_v17  ;;  %v4322_v28 = vadd.f32 -0.5, %v640_v16  ;;  %v5373_v30 = vpop.eup %5372  ;;  %v3186_v31 = vadd.f32 0.5, %v2674_v21  ;;  %v2675_v32 = vmul.f32 0.5, %v5371_v25  ;;  %5388 = vtanh.f32 %v1660_v22 }
 0x2a6   : > { %v1662_v33 = vmul.f32 5.0, %v4320_v24  ;;  %v5375_v35 = vpop.eup %5374  ;;  %3697 = vst [vmem:[%s5687_s17 + $0xf38] sm:$0xff] %v3185_v26  ;;  %v2676_v36 = vmul.f32 0.5, %v5373_v30  ;;  %5390 = vtanh.f32 %v1661_v23  ;;  %v1663_v37 = vmul.f32 5.0, %v4321_v27 }
 0x2a7   : > { %v1664_v38 = vmul.f32 5.0, %v4322_v28  ;;  %3698 = vst [vmem:[%s5687_s17 + $0xf40] sm:$0xff] %v3186_v31  ;;  %v3187_v40 = vadd.f32 0.5, %v2675_v32  ;;  %v2677_v41 = vmul.f32 0.5, %v5375_v35  ;;  %v4323_v42 = vadd.f32 -0.5, %v641_v29 }
 0x2a8   : > { %v5377_v39 = vpop.eup %5376  ;;  %5392 = vtanh.f32 %v1662_v33  ;;  %v3188_v45 = vadd.f32 0.5, %v2676_v36  ;;  %v4324_v47 = vadd.f32 -0.5, %v642_v34  ;;  %v4325_v57 = vadd.f32 -0.5, %v643_v43 }
 0x2a9   : > { %v5379_v44 = vpop.eup %5378  ;;  %v2678_v46 = vmul.f32 0.5, %v5377_v39  ;;  %5394 = vtanh.f32 %v1663_v37  ;;  %3699 = vst [vmem:[%s5687_s17 + $0xf48] sm:$0xff] %v3187_v40  ;;  %v3189_v51 = vadd.f32 0.5, %v2677_v41  ;;  %v1665_v53 = vmul.f32 5.0, %v4323_v42 }
 0x2aa   : > { %v5381_v50 = vpop.eup %5380  ;;  %v2679_v52 = vmul.f32 0.5, %v5379_v44  ;;  %5396 = vtanh.f32 %v1664_v38  ;;  %3700 = vst [vmem:[%s5687_s17 + $0xf50] sm:$0xff] %v3188_v45  ;;  %v1666_v56 = vmul.f32 5.0, %v4324_v47  ;;  %v4326_v61 = vadd.f32 -0.5, %v644_v48 }
 0x2ab   : > { %v3190_v54 = vadd.f32 0.5, %v2678_v46  ;;  %v2680_v55 = vmul.f32 0.5, %v5381_v50  ;;  %v5383_v59 = vpop.eup %5382  ;;  %3701 = vst [vmem:[%s5687_s17 + $0xf58] sm:$0xff] %v3189_v51  ;;  %5398 = vtanh.f32 %v1665_v53  ;;  %v4327_v62 = vadd.f32 -0.5, %v645_v49 }
 0x2ac   : > { %v3191_v60 = vadd.f32 0.5, %v2679_v52  ;;  %v5385_v1 = vpop.eup %5384  ;;  %v2681_v3 = vmul.f32 0.5, %v5383_v59  ;;  %5400 = vtanh.f32 %v1666_v56  ;;  %v1667_v4 = vmul.f32 5.0, %v4325_v57 }
 0x2ad   : > { %3702 = vst [vmem:[%s5687_s17 + $0xf60] sm:$0xff] %v3190_v54  ;;  %v3192_v2 = vadd.f32 0.5, %v2680_v55  ;;  %v2682_v5 = vmul.f32 0.5, %v5385_v1  ;;  %v1668_v6 = vmul.f32 5.0, %v4326_v61  ;;  %v1669_v7 = vmul.f32 5.0, %v4327_v62 }
 0x2ae   : > { %3703 = vst [vmem:[%s5687_s17 + $0xf68] sm:$0xff] %v3191_v60  ;;  %v4328_v8 = vadd.f32 -0.5, %v646_v58  ;;  %v5387_v9 = vpop.eup %5386  ;;  %v3193_v10 = vadd.f32 0.5, %v2681_v3  ;;  %5402 = vtanh.f32 %v1667_v4  ;;  %v4329_v11 = vadd.f32 -0.5, %v647_v63 }
 0x2af   : > { %3704 = vst [vmem:[%s5687_s17 + $0xf70] sm:$0xff] %v3192_v2  ;;  %v4330_v12 = vadd.f32 -0.5, %v648_v0  ;;  %v5389_v14 = vpop.eup %5388  ;;  %v3194_v15 = vadd.f32 0.5, %v2682_v5  ;;  %v2683_v16 = vmul.f32 0.5, %v5387_v9  ;;  %5404 = vtanh.f32 %v1668_v6 }
 0x2b0   : > { %v1670_v18 = vmul.f32 5.0, %v4328_v8  ;;  %v5391_v17 = vpop.eup %5390  ;;  %3705 = vst [vmem:[%s5687_s17 + $0xf78] sm:$0xff] %v3193_v10  ;;  %v2684_v19 = vmul.f32 0.5, %v5389_v14  ;;  %5406 = vtanh.f32 %v1669_v7  ;;  %v1671_v20 = vmul.f32 5.0, %v4329_v11 }
 0x2b1   : > { %v1672_v21 = vmul.f32 5.0, %v4330_v12  ;;  %3706 = vst [vmem:[%s5687_s17 + $0xf80] sm:$0xff] %v3194_v15  ;;  %v3195_v23 = vadd.f32 0.5, %v2683_v16  ;;  %v2685_v24 = vmul.f32 0.5, %v5391_v17  ;;  %v4331_v25 = vadd.f32 -0.5, %v649_v13 }
 0x2b2   : > { %v5393_v22 = vpop.eup %5392  ;;  %5408 = vtanh.f32 %v1670_v18  ;;  %v3196_v27 = vadd.f32 0.5, %v2684_v19 }
 0x2b3   : > { %v5395_v26 = vpop.eup %5394  ;;  %v2686_v28 = vmul.f32 0.5, %v5393_v22  ;;  %5410 = vtanh.f32 %v1671_v20  ;;  %3707 = vst [vmem:[%s5687_s17 + $0xf88] sm:$0xff] %v3195_v23  ;;  %v3197_v30 = vadd.f32 0.5, %v2685_v24  ;;  %v1673_v32 = vmul.f32 5.0, %v4331_v25 }
 0x2b4   : > { %v5397_v29 = vpop.eup %5396  ;;  %v2687_v31 = vmul.f32 0.5, %v5395_v26  ;;  %5412 = vtanh.f32 %v1672_v21  ;;  %3708 = vst [vmem:[%s5687_s17 + $0xf90] sm:$0xff] %v3196_v27 }
 0x2b5   : > { %v3198_v33 = vadd.f32 0.5, %v2686_v28  ;;  %v2688_v34 = vmul.f32 0.5, %v5397_v29  ;;  %v5399_v35 = vpop.eup %5398  ;;  %3709 = vst [vmem:[%s5687_s17 + $0xf98] sm:$0xff] %v3197_v30  ;;  %5414 = vtanh.f32 %v1673_v32 }
 0x2b6   : > { %v3199_v36 = vadd.f32 0.5, %v2687_v31  ;;  %v5401_v37 = vpop.eup %5400  ;;  %v2689_v39 = vmul.f32 0.5, %v5399_v35 }
 0x2b7   : > { %3710 = vst [vmem:[%s5687_s17 + $0xfa0] sm:$0xff] %v3198_v33  ;;  %v3200_v38 = vadd.f32 0.5, %v2688_v34  ;;  %v2690_v40 = vmul.f32 0.5, %v5401_v37 }
 0x2b8   : > { %3711 = vst [vmem:[%s5687_s17 + $0xfa8] sm:$0xff] %v3199_v36  ;;  %v5403_v41 = vpop.eup %5402  ;;  %v3201_v42 = vadd.f32 0.5, %v2689_v39 }
 0x2b9   : > { %3712 = vst [vmem:[%s5687_s17 + $0xfb0] sm:$0xff] %v3200_v38  ;;  %v5405_v43 = vpop.eup %5404  ;;  %v3202_v44 = vadd.f32 0.5, %v2690_v40  ;;  %v2691_v45 = vmul.f32 0.5, %v5403_v41 }
 0x2ba   : > { %v5407_v46 = vpop.eup %5406  ;;  %3713 = vst [vmem:[%s5687_s17 + $0xfb8] sm:$0xff] %v3201_v42  ;;  %v2692_v47 = vmul.f32 0.5, %v5405_v43 }
 0x2bb   : > { %3714 = vst [vmem:[%s5687_s17 + $0xfc0] sm:$0xff] %v3202_v44  ;;  %v3203_v49 = vadd.f32 0.5, %v2691_v45  ;;  %v2693_v50 = vmul.f32 0.5, %v5407_v46 }
 0x2bc   : > { %v5409_v48 = vpop.eup %5408  ;;  %v3204_v52 = vadd.f32 0.5, %v2692_v47 }
 0x2bd   : > { %v5411_v51 = vpop.eup %5410  ;;  %v2694_v53 = vmul.f32 0.5, %v5409_v48  ;;  %3715 = vst [vmem:[%s5687_s17 + $0xfc8] sm:$0xff] %v3203_v49  ;;  %v3205_v55 = vadd.f32 0.5, %v2693_v50 }
 0x2be   : > { %v5413_v54 = vpop.eup %5412  ;;  %v2695_v56 = vmul.f32 0.5, %v5411_v51  ;;  %3716 = vst [vmem:[%s5687_s17 + $0xfd0] sm:$0xff] %v3204_v52 }
 0x2bf   : > { %v3206_v57 = vadd.f32 0.5, %v2694_v53  ;;  %v2696_v58 = vmul.f32 0.5, %v5413_v54  ;;  %v5415_v59 = vpop.eup %5414  ;;  %3717 = vst [vmem:[%s5687_s17 + $0xfd8] sm:$0xff] %v3205_v55 }
 0x2c0   : > { %v3207_v60 = vadd.f32 0.5, %v2695_v56  ;;  %v2697_v62 = vmul.f32 0.5, %v5415_v59 }
 0x2c1   : > { %3718 = vst [vmem:[%s5687_s17 + $0xfe0] sm:$0xff] %v3206_v57  ;;  %v3208_v61 = vadd.f32 0.5, %v2696_v58 }
 0x2c2   : > { %3719 = vst [vmem:[%s5687_s17 + $0xfe8] sm:$0xff] %v3207_v60  ;;  %v3209_v63 = vadd.f32 0.5, %v2697_v62 }
 0x2c3   : > { %3720 = vst [vmem:[%s5687_s17 + $0xff0] sm:$0xff] %v3208_v61 }
 0x2c4   : > { %3721 = vst [vmem:[%s5687_s17 + $0xff8] sm:$0xff] %v3209_v63 }
 0x2c5   : > { %5459 = shalt.err (!%p5456_p2)
}
 0x2c6   : > { %s5460_s13 = scalar_lea.hbm %s6695_s2, 65536  ;;  %s5464_s20 = scalar_lea.hbm %s6744_s1, 131072 }
 0x2c7   : > { %p5461_p4 = scmp.ne.s32.totalorder %s6695_s2, %s5460_s13  ;;  %p5465_p9 = scmp.lt.u32.totalorder %s6695_s2, %s6744_s1 }
 0x2c8   : > { %p5466_p1 = scmp.lt.u32.totalorder %s5464_s20, %s5460_s13  ;;  %p5468_p6 = scmp.lt.u32.totalorder %s5460_s13, %s6695_s2 }
 0x2c9   : > { %p5462_p5 = pnand %p5461_p4, %p6751_p11 }
 0x2ca   : > { %p5467_p3 = por %p5466_p1, %p5465_p9 }
 0x2cb   : > { %p5463_p7 = pneg %p5462_p5 }
 0x2cc   : > { %p5469_p12 = por %p5468_p6, %p5467_p3 }
 0x2ce   : > { %p5470_p13 = pnand %p5469_p12, %p5463_p7 }
 0x2d0   : > { %5473 = shalt.err (!%p5470_p13)
}
 0x2d1   : > { %s5518_s24 = smov 1024   ;;  %s5519_s26 = smov 64  }
 0x2d2   : > { %4344 = dma.vmem_to_hbm [thread:$0]  (%p6751_p11), %s6697_s27, 65536, %s6695_s2, %s3723_s10, %s5518_s24, %s5518_s24, %s5519_s26  }
 0x2d3 PF: > { %s3752_s30 = sand.u32 1, %s5500_s6   ;;  %p6752_p8 = scmp.ne.s32.totalorder %s6749_s19, 0 }
 0x2d4   : > { %p6753_p10 = scmp.ge.s32.totalorder %s5512_s9, 2  ;;  %s3753_s17 = scalar_lea.sflag [#allocation4], %s3752_s30 }
 0x2d6   : > { %p4351_p0 = pnand %p6753_p10, %p6752_p8 }
 0x2d8   : > { %5495 = dma.done.wait (!%p4351_p0), %s3753_s17, 65536  }
 0x2d9   : > { %5497 = vsyncadd (!%p4351_p0), %s3753_s17, 4294901760  ;;  %p14_p2 = scmp.ge.s32.totalorder %s5555_s12, 4   ;;  %s6754_s6 = smov %s5504_s7 }
 0x2da   : > { %s6755_s7 = smov %s5508_s8  ;;  %s6756_s8 = smov %s5567_s15 }
 0x2db   : > { %s6757_s9 = smov %s5555_s12  ;;  %16 = sbr.rel (!%p14_p2) target bundleno = 5 (0x5), region = 69 }
 0x2e2   :  { %3758 = vsyncpa [#allocation3], 1 }
 0x2e3   :  { %3760 = vsyncpa [#allocation3 + $0x1], 1 }
 0x2e4   :  { %3761 = vsyncpa [#allocation4], 1 }
 0x2e5   :  { %3763 = vsyncpa [#allocation4 + $0x1], 1 }

</bundles_post_ra>
